<compile_context>
chip_gen: v7x
topology: tpu7x:2x2x1
jax: 0.10.0
libtpu: 0.0.40
codegen_flags: <defaults>
</compile_context>

<pallas_src>
import functools

import jax
import jax.numpy as jnp
from jax.experimental import pallas as pl
from jax.experimental.pallas import tpu as pltpu


# ----------------------------------------------------------------------------
# Pallas kernel: fused (input projection + GRU recurrence) for one time chunk
# of one direction.
# ----------------------------------------------------------------------------
def gru_layer_kernel(x_ref, wih_ref, whh_ref, bih_ref, bhhn_ref, out_ref,
                     gi_sc, h_sc):
    """Grid = (direction d [parallel], time-chunk c [arbitrary]).

    x:    (TC, Bp, Dp)   bf16  input chunk (fwd: chunk c, bwd: chunk nc-1-c)
    wih:  (1, Dp, 3Hp)   bf16  input->hidden weights (gate slabs at 0/Hp/2Hp)
    whh:  (1, Hp, 3Hp)   bf16  hidden->hidden weights
    bih:  (1, 1, 3Hp)    f32   b_ih with b_hr/b_hz folded in
    bhhn: (1, 1, Hp)     f32   b_hn (must stay inside r * (...))
    out:  (TC, Bp, Hp)   bf16  this direction's half of the layer output
    gi_sc:(TC, Bp, 3Hp)  f32   scratch: precomputed input gates for the chunk
    h_sc: (Bp, Hp)       f32   scratch: hidden state carried across chunks
    """
    d = pl.program_id(0)
    c = pl.program_id(1)
    TC, B, Dp = x_ref.shape
    Hp = h_sc.shape[-1]

    # Fused input projection for this chunk: one MXU matmul, result stays in VMEM.
    x2d = x_ref[...].reshape(TC * B, Dp)                               # bf16
    gi = jnp.dot(x2d, wih_ref[0], preferred_element_type=jnp.float32) + bih_ref[0]
    gi_sc[...] = gi.reshape(TC, B, 3 * Hp)

    # New sequence (per direction) starts at chunk 0 -> reset the carry.
    @pl.when(c == 0)
    def _():
        h_sc[...] = jnp.zeros_like(h_sc)

    whh = whh_ref[0]                       # (Hp, 3Hp) bf16, hoisted out of the loop
    bhn = bhhn_ref[0]                      # (1, Hp)   f32

    def step(s, carry):
        # backward direction walks its chunk in reverse but writes to the original
        # time positions (PyTorch bidirectional GRU semantics).
        t = jnp.where(d == 1, TC - 1 - s, s)
        gi_t = gi_sc[t]                                                # (B, 3Hp) f32
        h = h_sc[...]                                                  # (B, Hp)  f32
        gh = jnp.dot(h.astype(whh.dtype), whh,
                     preferred_element_type=jnp.float32)               # (B, 3Hp) f32
        r = jax.nn.sigmoid(gi_t[:, :Hp] + gh[:, :Hp])
        z = jax.nn.sigmoid(gi_t[:, Hp:2 * Hp] + gh[:, Hp:2 * Hp])
        n = jnp.tanh(gi_t[:, 2 * Hp:] + r * (gh[:, 2 * Hp:] + bhn))
        h_new = (1.0 - z) * n + z * h
        h_sc[...] = h_new
        out_ref[t] = h_new.astype(out_ref.dtype)
        return carry

    jax.lax.fori_loop(0, TC, step, 0, unroll=min(8, TC))


# ----------------------------------------------------------------------------
# Wrapper around pallas_call for one bidirectional GRU layer
# ----------------------------------------------------------------------------
def _vmem_limit_bytes(TC, Bp, Dp, Hp):
    G = 3 * Hp
    est = (2 * TC * Bp * Dp * 2        # x chunk, bf16, double-buffered
           + 2 * TC * Bp * Hp * 2      # out chunk, bf16, double-buffered
           + 2 * Dp * G * 2            # wih bf16 (conservatively x2)
           + 2 * Hp * G * 2            # whh bf16
           + 2 * (G + Hp) * 4          # biases
           + TC * Bp * G * 4           # gi scratch (f32)
           + Bp * Hp * 4)              # hidden-state scratch
    return int(min(max(2 * est, 32 * 2 ** 20), 64 * 2 ** 20))


def gru_layer(x, wih, whh, bih, bhhn, time_chunk):
    """x: (T, Bp, Dp) bf16 -> out: (T, Bp, 2*Hp) bf16 (fwd half | bwd half)."""
    T, Bp, Dp = x.shape
    Hp = whh.shape[1]
    G = 3 * Hp
    assert wih.shape == (2, Dp, G)
    assert T % time_chunk == 0, (T, time_chunk)
    TC = time_chunk
    nc = T // TC

    # fwd (d=0) consumes/produces chunk c; bwd (d=1) consumes/produces chunk nc-1-c.
    def x_map(d, c):
        return (c + d * (nc - 1 - 2 * c), 0, 0)

    def out_map(d, c):
        return (c + d * (nc - 1 - 2 * c), 0, d)   # last-dim block = direction half

    grid_spec = pltpu.PrefetchScalarGridSpec(
        num_scalar_prefetch=0,
        grid=(2, nc),
        in_specs=[
            pl.BlockSpec((TC, Bp, Dp), x_map),
            pl.BlockSpec((1, Dp, G), lambda d, c: (d, 0, 0)),
            pl.BlockSpec((1, Hp, G), lambda d, c: (d, 0, 0)),
            pl.BlockSpec((1, 1, G), lambda d, c: (d, 0, 0)),
            pl.BlockSpec((1, 1, Hp), lambda d, c: (d, 0, 0)),
        ],
        out_specs=pl.BlockSpec((TC, Bp, Hp), out_map),
        scratch_shapes=[
            pltpu.VMEM((TC, Bp, G), jnp.float32),   # gi for the current chunk
            pltpu.VMEM((Bp, Hp), jnp.float32),      # hidden state carry
        ],
    )
    return pl.pallas_call(
        gru_layer_kernel,
        out_shape=jax.ShapeDtypeStruct((T, Bp, 2 * Hp), jnp.bfloat16),
        grid_spec=grid_spec,
        compiler_params=pltpu.CompilerParams(
            dimension_semantics=("parallel", "arbitrary"),
            vmem_limit_bytes=_vmem_limit_bytes(TC, Bp, Dp, Hp),
        ),
    )(x, wih, whh, bih, bhhn)


# ----------------------------------------------------------------------------
# Parameter preparation (once; pad to hardware tiles, fold biases, cast to bf16)
# ----------------------------------------------------------------------------
def _round_up(x, m):
    return ((x + m - 1) // m) * m


def _pad_gate_cols(m, H, Hp):
    """m: (rows, 3H) -> (rows, 3*Hp) with gate g placed at lanes [g*Hp, g*Hp+H)."""
    rows = m.shape[0]
    out = jnp.zeros((rows, 3 * Hp), m.dtype)
    for g in range(3):
        out = out.at[:, g * Hp:g * Hp + H].set(m[:, g * H:(g + 1) * H])
    return out


def prepare_params(params, hidden_dim, emb_dim, n_layers):
    H = hidden_dim
    Hp = _round_up(H, 128)
    Ep = _round_up(emb_dim, 128)
    prep = {
        "embedding": params["embedding"],
        "fc_wT": jnp.transpose(params["fc_w"]),   # (2H, O) f32
        "fc_b": params["fc_b"],
    }
    for l in range(n_layers):
        wihs, whhs, bihs, bhhns = [], [], [], []
        for name in ("fwd", "bwd"):
            w_ih, w_hh, b_ih, b_hh = params[f"gru_l{l}_{name}"]
            in_dim = w_ih.shape[1]
            wih_t = _pad_gate_cols(w_ih.T, H, Hp)                      # (in_dim, 3Hp)
            whh_t = _pad_gate_cols(w_hh.T, H, Hp)                      # (H, 3Hp)
            whh_t = jnp.pad(whh_t, ((0, Hp - H), (0, 0)))              # (Hp, 3Hp)
            if l == 0:
                wih_p = jnp.pad(wih_t, ((0, Ep - in_dim), (0, 0)))     # (Ep, 3Hp)
            else:
                # next-layer input layout is [fwd half (Hp) | bwd half (Hp)]
                wih_p = jnp.zeros((2 * Hp, 3 * Hp), jnp.float32)
                wih_p = wih_p.at[:H].set(wih_t[:H])
                wih_p = wih_p.at[Hp:Hp + H].set(wih_t[H:2 * H])
            # fold b_hr, b_hz into b_ih (b_hn must stay inside r * (...))
            b_comb = b_ih + jnp.concatenate(
                [b_hh[:2 * H], jnp.zeros((H,), b_hh.dtype)])
            bih_p = _pad_gate_cols(b_comb.reshape(1, -1), H, Hp)       # (1, 3Hp)
            bhhn_p = jnp.pad(b_hh[2 * H:].reshape(1, -1),
                             ((0, 0), (0, Hp - H)))                    # (1, Hp)
            wihs.append(wih_p); whhs.append(whh_t)
            bihs.append(bih_p); bhhns.append(bhhn_p)
        prep[f"l{l}_wih"] = jnp.stack(wihs).astype(jnp.bfloat16)       # (2, Dp, 3Hp)
        prep[f"l{l}_whh"] = jnp.stack(whhs).astype(jnp.bfloat16)       # (2, Hp, 3Hp)
        prep[f"l{l}_bih"] = jnp.stack(bihs)[:, None, 0:1, :].reshape(2, 1, 3 * Hp)
        prep[f"l{l}_bhhn"] = jnp.stack(bhhns).reshape(2, 1, Hp)
    return prep


def _auto_time_chunk(T, Bp, Dp, Hp, budget_bytes=4 * 2 ** 20):
    per_step = Bp * (2 * Dp * 2 + 2 * Hp * 2 + 3 * Hp * 4)
    best = 1
    for tc in range(1, T + 1):
        if T % tc == 0 and tc * per_step <= budget_bytes:
            best = tc
    return best


# ----------------------------------------------------------------------------
# Model: embedding -> multi-layer bidirectional GRU -> fc on cat(h_fwd, h_bwd)
# ----------------------------------------------------------------------------
def rnn_forward(text, prep, hidden_dim, n_layers, time_chunk=None):
    """text: (T, B) int32 token ids.  Returns (B, output_dim)."""
    T, B = text.shape
    H = hidden_dim
    Hp = prep["l0_whh"].shape[1]
    Ep = prep["l0_wih"].shape[1]
    Bp = max(8, _round_up(B, 8))

    x = jnp.take(prep["embedding"], text, axis=0)                      # (T, B, E) f32
    # TODO(synk): dropout is identity (eval mode); training dropout would need pltpu PRNG.
    E = x.shape[-1]
    x = jnp.pad(x, ((0, 0), (0, Bp - B), (0, Ep - E))).astype(jnp.bfloat16)

    if time_chunk is None:
        time_chunk = _auto_time_chunk(T, Bp, Ep, Hp)

    inp = x
    out = None
    for l in range(n_layers):
        out = gru_layer(inp, prep[f"l{l}_wih"], prep[f"l{l}_whh"],
                        prep[f"l{l}_bih"], prep[f"l{l}_bhhn"], time_chunk)
        inp = out                     # (T, Bp, 2Hp) bf16 — feeds next layer directly

    # final hidden states of the last layer: fwd at t=T-1 (half 0), bwd at t=0 (half 1)
    h_fwd = out[T - 1, :B, :H].astype(jnp.float32)
    h_bwd = out[0, :B, Hp:Hp + H].astype(jnp.float32)
    hidden = jnp.concatenate([h_fwd, h_bwd], axis=-1)                  # (B, 2H)
    # tiny classifier: plain XLA dot (a Pallas call here is pure launch overhead)
    return hidden @ prep["fc_wT"] + prep["fc_b"]                       # (B, O)


# ----------------------------------------------------------------------------
# Pure-JAX reference (for correctness check)
# ----------------------------------------------------------------------------
def _gru_dir_ref(x_seq, w_ih, w_hh, b_ih, b_hh, H, reverse, matmul_dtype):
    T, B, _ = x_seq.shape

    def md(a, b):
        return jnp.dot(a.astype(matmul_dtype), b.astype(matmul_dtype),
                       preferred_element_type=jnp.float32)

    def cell(h, x):
        gi = md(x, w_ih.T) + b_ih
        gh = md(h, w_hh.T) + b_hh
        r = jax.nn.sigmoid(gi[:, :H] + gh[:, :H])
        z = jax.nn.sigmoid(gi[:, H:2 * H] + gh[:, H:2 * H])
        n = jnp.tanh(gi[:, 2 * H:] + r * gh[:, 2 * H:])
        h_new = (1 - z) * n + z * h
        return h_new, h_new

    xs = x_seq[::-1] if reverse else x_seq
    h0 = jnp.zeros((B, H), jnp.float32)
    _, outs = jax.lax.scan(cell, h0, xs)
    return outs[::-1] if reverse else outs


def rnn_forward_ref(text, params, hidden_dim, n_layers, matmul_dtype=jnp.float32):
    x = jnp.take(params["embedding"], text, axis=0)
    inp = x
    h_f = h_b = None
    for l in range(n_layers):
        out_f = _gru_dir_ref(inp, *params[f"gru_l{l}_fwd"], hidden_dim, False, matmul_dtype)
        out_b = _gru_dir_ref(inp, *params[f"gru_l{l}_bwd"], hidden_dim, True, matmul_dtype)
        h_f, h_b = out_f[-1], out_b[0]
        inp = jnp.concatenate([out_f, out_b], axis=-1)
    hidden = jnp.concatenate([h_f, h_b], axis=-1)
    return hidden @ params["fc_w"].T + params["fc_b"]


# ----------------------------------------------------------------------------
# Deterministic parameter init (PyTorch-like shapes)
# ----------------------------------------------------------------------------
def init_params(key, vocab_size, emb_dim, hidden_dim, output_dim, n_layers):
    params = {}
    k_emb, k_fc_w, k_fc_b, k_gru = jax.random.split(key, 4)
    params["embedding"] = jax.random.normal(k_emb, (vocab_size, emb_dim), jnp.float32)

    s = 1.0 / jnp.sqrt(hidden_dim)
    gkeys = jax.random.split(k_gru, n_layers * 2 * 4)
    ki = 0
    for l in range(n_layers):
        in_dim = emb_dim if l == 0 else 2 * hidden_dim
        for name in ["fwd", "bwd"]:
            w_ih = jax.random.uniform(gkeys[ki + 0], (3 * hidden_dim, in_dim),
                                      jnp.float32, -s, s)
            w_hh = jax.random.uniform(gkeys[ki + 1], (3 * hidden_dim, hidden_dim),
                                      jnp.float32, -s, s)
            b_ih = jax.random.uniform(gkeys[ki + 2], (3 * hidden_dim,), jnp.float32, -s, s)
            b_hh = jax.random.uniform(gkeys[ki + 3], (3 * hidden_dim,), jnp.float32, -s, s)
            params[f"gru_l{l}_{name}"] = (w_ih, w_hh, b_ih, b_hh)
            ki += 4

    sf = 1.0 / jnp.sqrt(2 * hidden_dim)
    params["fc_w"] = jax.random.uniform(k_fc_w, (output_dim, 2 * hidden_dim),
                                        jnp.float32, -sf, sf)
    params["fc_b"] = jax.random.uniform(k_fc_b, (output_dim,), jnp.float32, -sf, sf)
    return params


if __name__ == "__main__":
    VOCAB, EMB, HID, OUT, LAYERS = 50, 32, 32, 2, 2
    T, B = 8, 2

    key = jax.random.PRNGKey(0)
    k_text, k_params = jax.random.split(key)
    params = init_params(k_params, VOCAB, EMB, HID, OUT, LAYERS)
    text = jax.random.randint(k_text, (T, B), 0, VOCAB, dtype=jnp.int32)  # (seq, batch)

    prep = prepare_params(params, HID, EMB, LAYERS)
    # time_chunk=4 (=T/2) exercises the cross-chunk hidden-state carry and the
    # reversed chunk order of the backward direction at these small demo shapes;
    # for realistic T this would be auto-sized to keep the chunk within VMEM budget.
    fwd = jax.jit(functools.partial(rnn_forward, hidden_dim=HID, n_layers=LAYERS,
                                    time_chunk=4))
    out = fwd(text, prep)
    jax.block_until_ready(out)
    assert out.shape == (B, OUT), out.shape

    # Tight check vs a reference with the same bf16 matmul-operand quantization
    # (validates gate math / direction handling / chunked carry / indexing).
    ref_bf16 = rnn_forward_ref(text, params, HID, LAYERS, matmul_dtype=jnp.bfloat16)
    assert jnp.allclose(out, ref_bf16, atol=2e-2, rtol=2e-2), (out, ref_bf16)

    # Loose sanity check vs the full-f32 reference (bf16 operands => looser tol).
    ref_f32 = rnn_forward_ref(text, params, HID, LAYERS, matmul_dtype=jnp.float32)
    assert jnp.allclose(out, ref_f32, atol=0.15, rtol=0.15), (out, ref_f32)

    print("KERNEL_OK")
</pallas_src>

<mosaic_0001>
module attributes {stable_mosaic.version = 11 : i64} {
  func.func @gru_layer_kernel(%arg0: i32, %arg1: i32, %arg2: memref<4x8x256xbf16, #tpu.memory_space<vmem>>, %arg3: memref<1x256x384xbf16, #tpu.memory_space<vmem>>, %arg4: memref<1x128x384xbf16, #tpu.memory_space<vmem>>, %arg5: memref<1x1x384xf32, #tpu.memory_space<vmem>>, %arg6: memref<1x1x128xf32, #tpu.memory_space<vmem>>, %arg7: memref<4x8x128xbf16, #tpu.memory_space<vmem>>, %arg8: memref<4x8x384xf32, #tpu.memory_space<vmem>>, %arg9: memref<8x128xf32, #tpu.memory_space<vmem>>) attributes {dimension_semantics = [#tpu.dimension_semantics<parallel>, #tpu.dimension_semantics<arbitrary>], iteration_bounds = array<i64: 2, 2>, scalar_prefetch = 0 : i64, scratch_operands = 2 : i64, tpu.core_type = #tpu.core_type<tc>, window_params = [{transform_indices = @transform_0, window_bounds = array<i64: 4, 8, 256>}, {transform_indices = @transform_1, window_bounds = array<i64: 1, 256, 384>}, {transform_indices = @transform_2, window_bounds = array<i64: 1, 128, 384>}, {transform_indices = @transform_3, window_bounds = array<i64: 1, 1, 384>}, {transform_indices = @transform_4, window_bounds = array<i64: 1, 1, 128>}, {transform_indices = @transform_5, window_bounds = array<i64: 4, 8, 128>}]} {
    %c0 = arith.constant 0 : index
    %c0_0 = arith.constant 0 : index
    %c0_1 = arith.constant 0 : index
    %0 = vector.load %arg2[%c0, %c0_0, %c0_1] : memref<4x8x256xbf16, #tpu.memory_space<vmem>>, vector<4x8x256xbf16>
    %1 = vector.shape_cast %0 : vector<4x8x256xbf16> to vector<32x256xbf16>
    %c0_2 = arith.constant 0 : index
    %c0_3 = arith.constant 0 : index
    %c0_4 = arith.constant 0 : index
    %2 = vector.load %arg3[%c0_2, %c0_3, %c0_4] : memref<1x256x384xbf16, #tpu.memory_space<vmem>>, vector<1x256x384xbf16>
    %3 = vector.shape_cast %2 : vector<1x256x384xbf16> to vector<256x384xbf16>
    %cst = arith.constant dense<0.000000e+00> : vector<32x384xf32>
    %4 = tpu.matmul %1, %3, %cst {dimension_numbers = #tpu.dot_dimension_numbers<[1], [0], [0], [1], [0, 0, 1, 1], [], []>} : vector<32x256xbf16>, vector<256x384xbf16>, vector<32x384xf32> -> vector<32x384xf32>
    %c0_5 = arith.constant 0 : index
    %c0_6 = arith.constant 0 : index
    %c0_7 = arith.constant 0 : index
    %5 = vector.load %arg5[%c0_5, %c0_6, %c0_7] : memref<1x1x384xf32, #tpu.memory_space<vmem>>, vector<1x1x384xf32>
    %6 = vector.shape_cast %5 : vector<1x1x384xf32> to vector<1x384xf32>
    %7 = vector.broadcast %6 : vector<1x384xf32> to vector<32x384xf32>
    %8 = arith.addf %4, %7 : vector<32x384xf32>
    %9 = vector.shape_cast %8 : vector<32x384xf32> to vector<4x8x384xf32>
    %c0_8 = arith.constant 0 : index
    %c0_9 = arith.constant 0 : index
    %c0_10 = arith.constant 0 : index
    %10 = vector.load %arg8[%c0_8, %c0_9, %c0_10] : memref<4x8x384xf32, #tpu.memory_space<vmem>>, vector<4x8x384xf32>
    tpu.vector_store %arg8[%c0_8, %c0_9, %c0_10], %9 {strides = array<i32>} : memref<4x8x384xf32, #tpu.memory_space<vmem>>, vector<4x8x384xf32>,
    %c0_i32 = arith.constant 0 : i32
    %11 = arith.cmpi eq, %arg1, %c0_i32 : i32
    %12 = arith.extui %11 : i1 to i32
    %c0_i32_11 = arith.constant 0 : i32
    %13 = arith.cmpi ne, %12, %c0_i32_11 : i32
    scf.if %13 {
      %cst_75 = arith.constant 0.000000e+00 : f32
      %190 = vector.broadcast %cst_75 : f32 to vector<8x128xf32>
      %c0_76 = arith.constant 0 : index
      %c0_77 = arith.constant 0 : index
      %191 = vector.load %arg9[%c0_76, %c0_77] : memref<8x128xf32, #tpu.memory_space<vmem>>, vector<8x128xf32>
      tpu.vector_store %arg9[%c0_76, %c0_77], %190 {strides = array<i32>} : memref<8x128xf32, #tpu.memory_space<vmem>>, vector<8x128xf32>,
    } else {
    }
    %c0_12 = arith.constant 0 : index
    %c0_13 = arith.constant 0 : index
    %c0_14 = arith.constant 0 : index
    %14 = vector.load %arg4[%c0_12, %c0_13, %c0_14] : memref<1x128x384xbf16, #tpu.memory_space<vmem>>, vector<1x128x384xbf16>
    %15 = vector.shape_cast %14 : vector<1x128x384xbf16> to vector<128x384xbf16>
    %c0_15 = arith.constant 0 : index
    %c0_16 = arith.constant 0 : index
    %c0_17 = arith.constant 0 : index
    %16 = vector.load %arg6[%c0_15, %c0_16, %c0_17] : memref<1x1x128xf32, #tpu.memory_space<vmem>>, vector<1x1x128xf32>
    %17 = vector.shape_cast %16 : vector<1x1x128xf32> to vector<1x128xf32>
    %c0_i32_18 = arith.constant 0 : i32
    %c1_i32 = arith.constant 1 : i32
    %18 = arith.cmpi eq, %arg0, %c1_i32 : i32
    %c3_i32 = arith.constant 3 : i32
    %19 = arith.subi %c3_i32, %c0_i32_18 : i32
    %20 = arith.select %18, %19, %c0_i32_18 : i32
    %21 = arith.index_cast %20 : i32 to index
    %c0_19 = arith.constant 0 : index
    %c0_20 = arith.constant 0 : index
    %22 = vector.load %arg8[%21, %c0_19, %c0_20] : memref<4x8x384xf32, #tpu.memory_space<vmem>>, vector<1x8x384xf32>
    %23 = vector.shape_cast %22 : vector<1x8x384xf32> to vector<8x384xf32>
    %c0_21 = arith.constant 0 : index
    %c0_22 = arith.constant 0 : index
    %24 = vector.load %arg9[%c0_21, %c0_22] : memref<8x128xf32, #tpu.memory_space<vmem>>, vector<8x128xf32>
    %25 = arith.truncf %24 : vector<8x128xf32> to vector<8x128xbf16>
    %cst_23 = arith.constant dense<0.000000e+00> : vector<8x384xf32>
    %26 = tpu.matmul %25, %15, %cst_23 {dimension_numbers = #tpu.dot_dimension_numbers<[1], [0], [0], [1], [0, 0, 1, 1], [], []>} : vector<8x128xbf16>, vector<128x384xbf16>, vector<8x384xf32> -> vector<8x384xf32>
    %27 = vector.extract_strided_slice %23 {offsets = [0, 0], sizes = [8, 128], strides = [1, 1]} : vector<8x384xf32> to vector<8x128xf32>
    %28 = vector.extract_strided_slice %26 {offsets = [0, 0], sizes = [8, 128], strides = [1, 1]} : vector<8x384xf32> to vector<8x128xf32>
    %29 = arith.addf %27, %28 : vector<8x128xf32>
    %30 = arith.negf %29 : vector<8x128xf32>
    %31 = math.exp %30 : vector<8x128xf32>
    %cst_24 = arith.constant 1.000000e+00 : f32
    %32 = vector.broadcast %cst_24 : f32 to vector<8x128xf32>
    %33 = arith.addf %32, %31 : vector<8x128xf32>
    %34 = arith.divf %32, %33 : vector<8x128xf32>
    %35 = vector.extract_strided_slice %23 {offsets = [0, 128], sizes = [8, 128], strides = [1, 1]} : vector<8x384xf32> to vector<8x128xf32>
    %36 = vector.extract_strided_slice %26 {offsets = [0, 128], sizes = [8, 128], strides = [1, 1]} : vector<8x384xf32> to vector<8x128xf32>
    %37 = arith.addf %35, %36 : vector<8x128xf32>
    %38 = arith.negf %37 : vector<8x128xf32>
    %39 = math.exp %38 : vector<8x128xf32>
    %cst_25 = arith.constant 1.000000e+00 : f32
    %40 = vector.broadcast %cst_25 : f32 to vector<8x128xf32>
    %41 = arith.addf %40, %39 : vector<8x128xf32>
    %42 = arith.divf %40, %41 : vector<8x128xf32>
    %43 = vector.extract_strided_slice %23 {offsets = [0, 256], sizes = [8, 128], strides = [1, 1]} : vector<8x384xf32> to vector<8x128xf32>
    %44 = vector.extract_strided_slice %26 {offsets = [0, 256], sizes = [8, 128], strides = [1, 1]} : vector<8x384xf32> to vector<8x128xf32>
    %45 = vector.broadcast %17 : vector<1x128xf32> to vector<8x128xf32>
    %46 = arith.addf %44, %45 : vector<8x128xf32>
    %47 = arith.mulf %34, %46 : vector<8x128xf32>
    %48 = arith.addf %43, %47 : vector<8x128xf32>
    %49 = math.tanh %48 : vector<8x128xf32>
    %cst_26 = arith.constant 1.000000e+00 : f32
    %50 = vector.broadcast %cst_26 : f32 to vector<8x128xf32>
    %51 = arith.subf %50, %42 : vector<8x128xf32>
    %52 = arith.mulf %51, %49 : vector<8x128xf32>
    %53 = arith.mulf %42, %24 : vector<8x128xf32>
    %54 = arith.addf %52, %53 : vector<8x128xf32>
    %c0_27 = arith.constant 0 : index
    %c0_28 = arith.constant 0 : index
    %55 = vector.load %arg9[%c0_27, %c0_28] : memref<8x128xf32, #tpu.memory_space<vmem>>, vector<8x128xf32>
    tpu.vector_store %arg9[%c0_27, %c0_28], %54 {strides = array<i32>} : memref<8x128xf32, #tpu.memory_space<vmem>>, vector<8x128xf32>,
    %56 = arith.truncf %54 : vector<8x128xf32> to vector<8x128xbf16>
    %57 = arith.index_cast %20 : i32 to index
    %c0_29 = arith.constant 0 : index
    %c0_30 = arith.constant 0 : index
    %58 = vector.load %arg7[%57, %c0_29, %c0_30] : memref<4x8x128xbf16, #tpu.memory_space<vmem>>, vector<1x8x128xbf16>
    %59 = vector.shape_cast %58 : vector<1x8x128xbf16> to vector<8x128xbf16>
    %60 = vector.shape_cast %56 : vector<8x128xbf16> to vector<1x8x128xbf16>
    tpu.vector_store %arg7[%57, %c0_29, %c0_30], %60 {strides = array<i32>} : memref<4x8x128xbf16, #tpu.memory_space<vmem>>, vector<1x8x128xbf16>,
    %c1_i32_31 = arith.constant 1 : i32
    %c1_i32_32 = arith.constant 1 : i32
    %61 = arith.cmpi eq, %arg0, %c1_i32_32 : i32
    %c3_i32_33 = arith.constant 3 : i32
    %62 = arith.subi %c3_i32_33, %c1_i32_31 : i32
    %63 = arith.select %61, %62, %c1_i32_31 : i32
    %64 = arith.index_cast %63 : i32 to index
    %c0_34 = arith.constant 0 : index
    %c0_35 = arith.constant 0 : index
    %65 = vector.load %arg8[%64, %c0_34, %c0_35] : memref<4x8x384xf32, #tpu.memory_space<vmem>>, vector<1x8x384xf32>
    %66 = vector.shape_cast %65 : vector<1x8x384xf32> to vector<8x384xf32>
    %c0_36 = arith.constant 0 : index
    %c0_37 = arith.constant 0 : index
    %67 = vector.load %arg9[%c0_36, %c0_37] : memref<8x128xf32, #tpu.memory_space<vmem>>, vector<8x128xf32>
    %68 = arith.truncf %67 : vector<8x128xf32> to vector<8x128xbf16>
    %cst_38 = arith.constant dense<0.000000e+00> : vector<8x384xf32>
    %69 = tpu.matmul %68, %15, %cst_38 {dimension_numbers = #tpu.dot_dimension_numbers<[1], [0], [0], [1], [0, 0, 1, 1], [], []>} : vector<8x128xbf16>, vector<128x384xbf16>, vector<8x384xf32> -> vector<8x384xf32>
    %70 = vector.extract_strided_slice %66 {offsets = [0, 0], sizes = [8, 128], strides = [1, 1]} : vector<8x384xf32> to vector<8x128xf32>
    %71 = vector.extract_strided_slice %69 {offsets = [0, 0], sizes = [8, 128], strides = [1, 1]} : vector<8x384xf32> to vector<8x128xf32>
    %72 = arith.addf %70, %71 : vector<8x128xf32>
    %73 = arith.negf %72 : vector<8x128xf32>
    %74 = math.exp %73 : vector<8x128xf32>
    %cst_39 = arith.constant 1.000000e+00 : f32
    %75 = vector.broadcast %cst_39 : f32 to vector<8x128xf32>
    %76 = arith.addf %75, %74 : vector<8x128xf32>
    %77 = arith.divf %75, %76 : vector<8x128xf32>
    %78 = vector.extract_strided_slice %66 {offsets = [0, 128], sizes = [8, 128], strides = [1, 1]} : vector<8x384xf32> to vector<8x128xf32>
    %79 = vector.extract_strided_slice %69 {offsets = [0, 128], sizes = [8, 128], strides = [1, 1]} : vector<8x384xf32> to vector<8x128xf32>
    %80 = arith.addf %78, %79 : vector<8x128xf32>
    %81 = arith.negf %80 : vector<8x128xf32>
    %82 = math.exp %81 : vector<8x128xf32>
    %cst_40 = arith.constant 1.000000e+00 : f32
    %83 = vector.broadcast %cst_40 : f32 to vector<8x128xf32>
    %84 = arith.addf %83, %82 : vector<8x128xf32>
    %85 = arith.divf %83, %84 : vector<8x128xf32>
    %86 = vector.extract_strided_slice %66 {offsets = [0, 256], sizes = [8, 128], strides = [1, 1]} : vector<8x384xf32> to vector<8x128xf32>
    %87 = vector.extract_strided_slice %69 {offsets = [0, 256], sizes = [8, 128], strides = [1, 1]} : vector<8x384xf32> to vector<8x128xf32>
    %88 = vector.broadcast %17 : vector<1x128xf32> to vector<8x128xf32>
    %89 = arith.addf %87, %88 : vector<8x128xf32>
    %90 = arith.mulf %77, %89 : vector<8x128xf32>
    %91 = arith.addf %86, %90 : vector<8x128xf32>
    %92 = math.tanh %91 : vector<8x128xf32>
    %cst_41 = arith.constant 1.000000e+00 : f32
    %93 = vector.broadcast %cst_41 : f32 to vector<8x128xf32>
    %94 = arith.subf %93, %85 : vector<8x128xf32>
    %95 = arith.mulf %94, %92 : vector<8x128xf32>
    %96 = arith.mulf %85, %67 : vector<8x128xf32>
    %97 = arith.addf %95, %96 : vector<8x128xf32>
    %c0_42 = arith.constant 0 : index
    %c0_43 = arith.constant 0 : index
    %98 = vector.load %arg9[%c0_42, %c0_43] : memref<8x128xf32, #tpu.memory_space<vmem>>, vector<8x128xf32>
    tpu.vector_store %arg9[%c0_42, %c0_43], %97 {strides = array<i32>} : memref<8x128xf32, #tpu.memory_space<vmem>>, vector<8x128xf32>,
    %99 = arith.truncf %97 : vector<8x128xf32> to vector<8x128xbf16>
    %100 = arith.index_cast %63 : i32 to index
    %c0_44 = arith.constant 0 : index
    %c0_45 = arith.constant 0 : index
    %101 = vector.load %arg7[%100, %c0_44, %c0_45] : memref<4x8x128xbf16, #tpu.memory_space<vmem>>, vector<1x8x128xbf16>
    %102 = vector.shape_cast %101 : vector<1x8x128xbf16> to vector<8x128xbf16>
    %103 = vector.shape_cast %99 : vector<8x128xbf16> to vector<1x8x128xbf16>
    tpu.vector_store %arg7[%100, %c0_44, %c0_45], %103 {strides = array<i32>} : memref<4x8x128xbf16, #tpu.memory_space<vmem>>, vector<1x8x128xbf16>,
    %c2_i32 = arith.constant 2 : i32
    %c1_i32_46 = arith.constant 1 : i32
    %104 = arith.cmpi eq, %arg0, %c1_i32_46 : i32
    %c3_i32_47 = arith.constant 3 : i32
    %105 = arith.subi %c3_i32_47, %c2_i32 : i32
    %106 = arith.select %104, %105, %c2_i32 : i32
    %107 = arith.index_cast %106 : i32 to index
    %c0_48 = arith.constant 0 : index
    %c0_49 = arith.constant 0 : index
    %108 = vector.load %arg8[%107, %c0_48, %c0_49] : memref<4x8x384xf32, #tpu.memory_space<vmem>>, vector<1x8x384xf32>
    %109 = vector.shape_cast %108 : vector<1x8x384xf32> to vector<8x384xf32>
    %c0_50 = arith.constant 0 : index
    %c0_51 = arith.constant 0 : index
    %110 = vector.load %arg9[%c0_50, %c0_51] : memref<8x128xf32, #tpu.memory_space<vmem>>, vector<8x128xf32>
    %111 = arith.truncf %110 : vector<8x128xf32> to vector<8x128xbf16>
    %cst_52 = arith.constant dense<0.000000e+00> : vector<8x384xf32>
    %112 = tpu.matmul %111, %15, %cst_52 {dimension_numbers = #tpu.dot_dimension_numbers<[1], [0], [0], [1], [0, 0, 1, 1], [], []>} : vector<8x128xbf16>, vector<128x384xbf16>, vector<8x384xf32> -> vector<8x384xf32>
    %113 = vector.extract_strided_slice %109 {offsets = [0, 0], sizes = [8, 128], strides = [1, 1]} : vector<8x384xf32> to vector<8x128xf32>
    %114 = vector.extract_strided_slice %112 {offsets = [0, 0], sizes = [8, 128], strides = [1, 1]} : vector<8x384xf32> to vector<8x128xf32>
    %115 = arith.addf %113, %114 : vector<8x128xf32>
    %116 = arith.negf %115 : vector<8x128xf32>
    %117 = math.exp %116 : vector<8x128xf32>
    %cst_53 = arith.constant 1.000000e+00 : f32
    %118 = vector.broadcast %cst_53 : f32 to vector<8x128xf32>
    %119 = arith.addf %118, %117 : vector<8x128xf32>
    %120 = arith.divf %118, %119 : vector<8x128xf32>
    %121 = vector.extract_strided_slice %109 {offsets = [0, 128], sizes = [8, 128], strides = [1, 1]} : vector<8x384xf32> to vector<8x128xf32>
    %122 = vector.extract_strided_slice %112 {offsets = [0, 128], sizes = [8, 128], strides = [1, 1]} : vector<8x384xf32> to vector<8x128xf32>
    %123 = arith.addf %121, %122 : vector<8x128xf32>
    %124 = arith.negf %123 : vector<8x128xf32>
    %125 = math.exp %124 : vector<8x128xf32>
    %cst_54 = arith.constant 1.000000e+00 : f32
    %126 = vector.broadcast %cst_54 : f32 to vector<8x128xf32>
    %127 = arith.addf %126, %125 : vector<8x128xf32>
    %128 = arith.divf %126, %127 : vector<8x128xf32>
    %129 = vector.extract_strided_slice %109 {offsets = [0, 256], sizes = [8, 128], strides = [1, 1]} : vector<8x384xf32> to vector<8x128xf32>
    %130 = vector.extract_strided_slice %112 {offsets = [0, 256], sizes = [8, 128], strides = [1, 1]} : vector<8x384xf32> to vector<8x128xf32>
    %131 = vector.broadcast %17 : vector<1x128xf32> to vector<8x128xf32>
    %132 = arith.addf %130, %131 : vector<8x128xf32>
    %133 = arith.mulf %120, %132 : vector<8x128xf32>
    %134 = arith.addf %129, %133 : vector<8x128xf32>
    %135 = math.tanh %134 : vector<8x128xf32>
    %cst_55 = arith.constant 1.000000e+00 : f32
    %136 = vector.broadcast %cst_55 : f32 to vector<8x128xf32>
    %137 = arith.subf %136, %128 : vector<8x128xf32>
    %138 = arith.mulf %137, %135 : vector<8x128xf32>
    %139 = arith.mulf %128, %110 : vector<8x128xf32>
    %140 = arith.addf %138, %139 : vector<8x128xf32>
    %c0_56 = arith.constant 0 : index
    %c0_57 = arith.constant 0 : index
    %141 = vector.load %arg9[%c0_56, %c0_57] : memref<8x128xf32, #tpu.memory_space<vmem>>, vector<8x128xf32>
    tpu.vector_store %arg9[%c0_56, %c0_57], %140 {strides = array<i32>} : memref<8x128xf32, #tpu.memory_space<vmem>>, vector<8x128xf32>,
    %142 = arith.truncf %140 : vector<8x128xf32> to vector<8x128xbf16>
    %143 = arith.index_cast %106 : i32 to index
    %c0_58 = arith.constant 0 : index
    %c0_59 = arith.constant 0 : index
    %144 = vector.load %arg7[%143, %c0_58, %c0_59] : memref<4x8x128xbf16, #tpu.memory_space<vmem>>, vector<1x8x128xbf16>
    %145 = vector.shape_cast %144 : vector<1x8x128xbf16> to vector<8x128xbf16>
    %146 = vector.shape_cast %142 : vector<8x128xbf16> to vector<1x8x128xbf16>
    tpu.vector_store %arg7[%143, %c0_58, %c0_59], %146 {strides = array<i32>} : memref<4x8x128xbf16, #tpu.memory_space<vmem>>, vector<1x8x128xbf16>,
    %c3_i32_60 = arith.constant 3 : i32
    %c1_i32_61 = arith.constant 1 : i32
    %147 = arith.cmpi eq, %arg0, %c1_i32_61 : i32
    %c3_i32_62 = arith.constant 3 : i32
    %148 = arith.subi %c3_i32_62, %c3_i32_60 : i32
    %149 = arith.select %147, %148, %c3_i32_60 : i32
    %150 = arith.index_cast %149 : i32 to index
    %c0_63 = arith.constant 0 : index
    %c0_64 = arith.constant 0 : index
    %151 = vector.load %arg8[%150, %c0_63, %c0_64] : memref<4x8x384xf32, #tpu.memory_space<vmem>>, vector<1x8x384xf32>
    %152 = vector.shape_cast %151 : vector<1x8x384xf32> to vector<8x384xf32>
    %c0_65 = arith.constant 0 : index
    %c0_66 = arith.constant 0 : index
    %153 = vector.load %arg9[%c0_65, %c0_66] : memref<8x128xf32, #tpu.memory_space<vmem>>, vector<8x128xf32>
    %154 = arith.truncf %153 : vector<8x128xf32> to vector<8x128xbf16>
    %cst_67 = arith.constant dense<0.000000e+00> : vector<8x384xf32>
    %155 = tpu.matmul %154, %15, %cst_67 {dimension_numbers = #tpu.dot_dimension_numbers<[1], [0], [0], [1], [0, 0, 1, 1], [], []>} : vector<8x128xbf16>, vector<128x384xbf16>, vector<8x384xf32> -> vector<8x384xf32>
    %156 = vector.extract_strided_slice %152 {offsets = [0, 0], sizes = [8, 128], strides = [1, 1]} : vector<8x384xf32> to vector<8x128xf32>
    %157 = vector.extract_strided_slice %155 {offsets = [0, 0], sizes = [8, 128], strides = [1, 1]} : vector<8x384xf32> to vector<8x128xf32>
    %158 = arith.addf %156, %157 : vector<8x128xf32>
    %159 = arith.negf %158 : vector<8x128xf32>
    %160 = math.exp %159 : vector<8x128xf32>
    %cst_68 = arith.constant 1.000000e+00 : f32
    %161 = vector.broadcast %cst_68 : f32 to vector<8x128xf32>
    %162 = arith.addf %161, %160 : vector<8x128xf32>
    %163 = arith.divf %161, %162 : vector<8x128xf32>
    %164 = vector.extract_strided_slice %152 {offsets = [0, 128], sizes = [8, 128], strides = [1, 1]} : vector<8x384xf32> to vector<8x128xf32>
    %165 = vector.extract_strided_slice %155 {offsets = [0, 128], sizes = [8, 128], strides = [1, 1]} : vector<8x384xf32> to vector<8x128xf32>
    %166 = arith.addf %164, %165 : vector<8x128xf32>
    %167 = arith.negf %166 : vector<8x128xf32>
    %168 = math.exp %167 : vector<8x128xf32>
    %cst_69 = arith.constant 1.000000e+00 : f32
    %169 = vector.broadcast %cst_69 : f32 to vector<8x128xf32>
    %170 = arith.addf %169, %168 : vector<8x128xf32>
    %171 = arith.divf %169, %170 : vector<8x128xf32>
    %172 = vector.extract_strided_slice %152 {offsets = [0, 256], sizes = [8, 128], strides = [1, 1]} : vector<8x384xf32> to vector<8x128xf32>
    %173 = vector.extract_strided_slice %155 {offsets = [0, 256], sizes = [8, 128], strides = [1, 1]} : vector<8x384xf32> to vector<8x128xf32>
    %174 = vector.broadcast %17 : vector<1x128xf32> to vector<8x128xf32>
    %175 = arith.addf %173, %174 : vector<8x128xf32>
    %176 = arith.mulf %163, %175 : vector<8x128xf32>
    %177 = arith.addf %172, %176 : vector<8x128xf32>
    %178 = math.tanh %177 : vector<8x128xf32>
    %cst_70 = arith.constant 1.000000e+00 : f32
    %179 = vector.broadcast %cst_70 : f32 to vector<8x128xf32>
    %180 = arith.subf %179, %171 : vector<8x128xf32>
    %181 = arith.mulf %180, %178 : vector<8x128xf32>
    %182 = arith.mulf %171, %153 : vector<8x128xf32>
    %183 = arith.addf %181, %182 : vector<8x128xf32>
    %c0_71 = arith.constant 0 : index
    %c0_72 = arith.constant 0 : index
    %184 = vector.load %arg9[%c0_71, %c0_72] : memref<8x128xf32, #tpu.memory_space<vmem>>, vector<8x128xf32>
    tpu.vector_store %arg9[%c0_71, %c0_72], %183 {strides = array<i32>} : memref<8x128xf32, #tpu.memory_space<vmem>>, vector<8x128xf32>,
    %185 = arith.truncf %183 : vector<8x128xf32> to vector<8x128xbf16>
    %186 = arith.index_cast %149 : i32 to index
    %c0_73 = arith.constant 0 : index
    %c0_74 = arith.constant 0 : index
    %187 = vector.load %arg7[%186, %c0_73, %c0_74] : memref<4x8x128xbf16, #tpu.memory_space<vmem>>, vector<1x8x128xbf16>
    %188 = vector.shape_cast %187 : vector<1x8x128xbf16> to vector<8x128xbf16>
    %189 = vector.shape_cast %185 : vector<8x128xbf16> to vector<1x8x128xbf16>
    tpu.vector_store %arg7[%186, %c0_73, %c0_74], %189 {strides = array<i32>} : memref<4x8x128xbf16, #tpu.memory_space<vmem>>, vector<1x8x128xbf16>,
    %c4_i32 = arith.constant 4 : i32
    return
  }
  func.func @transform_0(%arg0: i32, %arg1: i32) -> (i32, i32, i32) {
    %c2_i32 = arith.constant 2 : i32
    %0 = arith.muli %c2_i32, %arg1 : i32
    %c1_i32 = arith.constant 1 : i32
    %1 = arith.subi %c1_i32, %0 : i32
    %2 = arith.muli %arg0, %1 : i32
    %3 = arith.addi %arg1, %2 : i32
    %c0_i32 = arith.constant 0 : i32
    %c0_i32_0 = arith.constant 0 : i32
    %c0_i32_1 = arith.constant 0 : i32
    return %3, %c0_i32, %c0_i32_0 : i32, i32, i32
  }
  func.func @transform_1(%arg0: i32, %arg1: i32) -> (i32, i32, i32) {
    %c0_i32 = arith.constant 0 : i32
    %c0_i32_0 = arith.constant 0 : i32
    %c0_i32_1 = arith.constant 0 : i32
    return %arg0, %c0_i32, %c0_i32_0 : i32, i32, i32
  }
  func.func @transform_2(%arg0: i32, %arg1: i32) -> (i32, i32, i32) {
    %c0_i32 = arith.constant 0 : i32
    %c0_i32_0 = arith.constant 0 : i32
    %c0_i32_1 = arith.constant 0 : i32
    return %arg0, %c0_i32, %c0_i32_0 : i32, i32, i32
  }
  func.func @transform_3(%arg0: i32, %arg1: i32) -> (i32, i32, i32) {
    %c0_i32 = arith.constant 0 : i32
    %c0_i32_0 = arith.constant 0 : i32
    %c0_i32_1 = arith.constant 0 : i32
    return %arg0, %c0_i32, %c0_i32_0 : i32, i32, i32
  }
  func.func @transform_4(%arg0: i32, %arg1: i32) -> (i32, i32, i32) {
    %c0_i32 = arith.constant 0 : i32
    %c0_i32_0 = arith.constant 0 : i32
    %c0_i32_1 = arith.constant 0 : i32
    return %arg0, %c0_i32, %c0_i32_0 : i32, i32, i32
  }
  func.func @transform_5(%arg0: i32, %arg1: i32) -> (i32, i32, i32) {
    %c2_i32 = arith.constant 2 : i32
    %0 = arith.muli %c2_i32, %arg1 : i32
    %c1_i32 = arith.constant 1 : i32
    %1 = arith.subi %c1_i32, %0 : i32
    %2 = arith.muli %arg0, %1 : i32
    %3 = arith.addi %arg1, %2 : i32
    %c0_i32 = arith.constant 0 : i32
    %c0_i32_0 = arith.constant 0 : i32
    return %3, %c0_i32, %arg0 : i32, i32, i32
  }
}

module attributes {stable_mosaic.version = 11 : i64} {
  func.func @gru_layer_kernel(%arg0: i32, %arg1: i32, %arg2: memref<4x8x128xbf16, #tpu.memory_space<vmem>>, %arg3: memref<1x128x384xbf16, #tpu.memory_space<vmem>>, %arg4: memref<1x128x384xbf16, #tpu.memory_space<vmem>>, %arg5: memref<1x1x384xf32, #tpu.memory_space<vmem>>, %arg6: memref<1x1x128xf32, #tpu.memory_space<vmem>>, %arg7: memref<4x8x128xbf16, #tpu.memory_space<vmem>>, %arg8: memref<4x8x384xf32, #tpu.memory_space<vmem>>, %arg9: memref<8x128xf32, #tpu.memory_space<vmem>>) attributes {dimension_semantics = [#tpu.dimension_semantics<parallel>, #tpu.dimension_semantics<arbitrary>], iteration_bounds = array<i64: 2, 2>, scalar_prefetch = 0 : i64, scratch_operands = 2 : i64, tpu.core_type = #tpu.core_type<tc>, window_params = [{transform_indices = @transform_0, window_bounds = array<i64: 4, 8, 128>}, {transform_indices = @transform_1, window_bounds = array<i64: 1, 128, 384>}, {transform_indices = @transform_2, window_bounds = array<i64: 1, 128, 384>}, {transform_indices = @transform_3, window_bounds = array<i64: 1, 1, 384>}, {transform_indices = @transform_4, window_bounds = array<i64: 1, 1, 128>}, {transform_indices = @transform_5, window_bounds = array<i64: 4, 8, 128>}]} {
    %c0 = arith.constant 0 : index
    %c0_0 = arith.constant 0 : index
    %c0_1 = arith.constant 0 : index
    %0 = vector.load %arg2[%c0, %c0_0, %c0_1] : memref<4x8x128xbf16, #tpu.memory_space<vmem>>, vector<4x8x128xbf16>
    %1 = vector.shape_cast %0 : vector<4x8x128xbf16> to vector<32x128xbf16>
    %c0_2 = arith.constant 0 : index
    %c0_3 = arith.constant 0 : index
    %c0_4 = arith.constant 0 : index
    %2 = vector.load %arg3[%c0_2, %c0_3, %c0_4] : memref<1x128x384xbf16, #tpu.memory_space<vmem>>, vector<1x128x384xbf16>
    %3 = vector.shape_cast %2 : vector<1x128x384xbf16> to vector<128x384xbf16>
    %cst = arith.constant dense<0.000000e+00> : vector<32x384xf32>
    %4 = tpu.matmul %1, %3, %cst {dimension_numbers = #tpu.dot_dimension_numbers<[1], [0], [0], [1], [0, 0, 1, 1], [], []>} : vector<32x128xbf16>, vector<128x384xbf16>, vector<32x384xf32> -> vector<32x384xf32>
    %c0_5 = arith.constant 0 : index
    %c0_6 = arith.constant 0 : index
    %c0_7 = arith.constant 0 : index
    %5 = vector.load %arg5[%c0_5, %c0_6, %c0_7] : memref<1x1x384xf32, #tpu.memory_space<vmem>>, vector<1x1x384xf32>
    %6 = vector.shape_cast %5 : vector<1x1x384xf32> to vector<1x384xf32>
    %7 = vector.broadcast %6 : vector<1x384xf32> to vector<32x384xf32>
    %8 = arith.addf %4, %7 : vector<32x384xf32>
    %9 = vector.shape_cast %8 : vector<32x384xf32> to vector<4x8x384xf32>
    %c0_8 = arith.constant 0 : index
    %c0_9 = arith.constant 0 : index
    %c0_10 = arith.constant 0 : index
    %10 = vector.load %arg8[%c0_8, %c0_9, %c0_10] : memref<4x8x384xf32, #tpu.memory_space<vmem>>, vector<4x8x384xf32>
    tpu.vector_store %arg8[%c0_8, %c0_9, %c0_10], %9 {strides = array<i32>} : memref<4x8x384xf32, #tpu.memory_space<vmem>>, vector<4x8x384xf32>,
    %c0_i32 = arith.constant 0 : i32
    %11 = arith.cmpi eq, %arg1, %c0_i32 : i32
    %12 = arith.extui %11 : i1 to i32
    %c0_i32_11 = arith.constant 0 : i32
    %13 = arith.cmpi ne, %12, %c0_i32_11 : i32
    scf.if %13 {
      %cst_75 = arith.constant 0.000000e+00 : f32
      %190 = vector.broadcast %cst_75 : f32 to vector<8x128xf32>
      %c0_76 = arith.constant 0 : index
      %c0_77 = arith.constant 0 : index
      %191 = vector.load %arg9[%c0_76, %c0_77] : memref<8x128xf32, #tpu.memory_space<vmem>>, vector<8x128xf32>
      tpu.vector_store %arg9[%c0_76, %c0_77], %190 {strides = array<i32>} : memref<8x128xf32, #tpu.memory_space<vmem>>, vector<8x128xf32>,
    } else {
    }
    %c0_12 = arith.constant 0 : index
    %c0_13 = arith.constant 0 : index
    %c0_14 = arith.constant 0 : index
    %14 = vector.load %arg4[%c0_12, %c0_13, %c0_14] : memref<1x128x384xbf16, #tpu.memory_space<vmem>>, vector<1x128x384xbf16>
    %15 = vector.shape_cast %14 : vector<1x128x384xbf16> to vector<128x384xbf16>
    %c0_15 = arith.constant 0 : index
    %c0_16 = arith.constant 0 : index
    %c0_17 = arith.constant 0 : index
    %16 = vector.load %arg6[%c0_15, %c0_16, %c0_17] : memref<1x1x128xf32, #tpu.memory_space<vmem>>, vector<1x1x128xf32>
    %17 = vector.shape_cast %16 : vector<1x1x128xf32> to vector<1x128xf32>
    %c0_i32_18 = arith.constant 0 : i32
    %c1_i32 = arith.constant 1 : i32
    %18 = arith.cmpi eq, %arg0, %c1_i32 : i32
    %c3_i32 = arith.constant 3 : i32
    %19 = arith.subi %c3_i32, %c0_i32_18 : i32
    %20 = arith.select %18, %19, %c0_i32_18 : i32
    %21 = arith.index_cast %20 : i32 to index
    %c0_19 = arith.constant 0 : index
    %c0_20 = arith.constant 0 : index
    %22 = vector.load %arg8[%21, %c0_19, %c0_20] : memref<4x8x384xf32, #tpu.memory_space<vmem>>, vector<1x8x384xf32>
    %23 = vector.shape_cast %22 : vector<1x8x384xf32> to vector<8x384xf32>
    %c0_21 = arith.constant 0 : index
    %c0_22 = arith.constant 0 : index
    %24 = vector.load %arg9[%c0_21, %c0_22] : memref<8x128xf32, #tpu.memory_space<vmem>>, vector<8x128xf32>
    %25 = arith.truncf %24 : vector<8x128xf32> to vector<8x128xbf16>
    %cst_23 = arith.constant dense<0.000000e+00> : vector<8x384xf32>
    %26 = tpu.matmul %25, %15, %cst_23 {dimension_numbers = #tpu.dot_dimension_numbers<[1], [0], [0], [1], [0, 0, 1, 1], [], []>} : vector<8x128xbf16>, vector<128x384xbf16>, vector<8x384xf32> -> vector<8x384xf32>
    %27 = vector.extract_strided_slice %23 {offsets = [0, 0], sizes = [8, 128], strides = [1, 1]} : vector<8x384xf32> to vector<8x128xf32>
    %28 = vector.extract_strided_slice %26 {offsets = [0, 0], sizes = [8, 128], strides = [1, 1]} : vector<8x384xf32> to vector<8x128xf32>
    %29 = arith.addf %27, %28 : vector<8x128xf32>
    %30 = arith.negf %29 : vector<8x128xf32>
    %31 = math.exp %30 : vector<8x128xf32>
    %cst_24 = arith.constant 1.000000e+00 : f32
    %32 = vector.broadcast %cst_24 : f32 to vector<8x128xf32>
    %33 = arith.addf %32, %31 : vector<8x128xf32>
    %34 = arith.divf %32, %33 : vector<8x128xf32>
    %35 = vector.extract_strided_slice %23 {offsets = [0, 128], sizes = [8, 128], strides = [1, 1]} : vector<8x384xf32> to vector<8x128xf32>
    %36 = vector.extract_strided_slice %26 {offsets = [0, 128], sizes = [8, 128], strides = [1, 1]} : vector<8x384xf32> to vector<8x128xf32>
    %37 = arith.addf %35, %36 : vector<8x128xf32>
    %38 = arith.negf %37 : vector<8x128xf32>
    %39 = math.exp %38 : vector<8x128xf32>
    %cst_25 = arith.constant 1.000000e+00 : f32
    %40 = vector.broadcast %cst_25 : f32 to vector<8x128xf32>
    %41 = arith.addf %40, %39 : vector<8x128xf32>
    %42 = arith.divf %40, %41 : vector<8x128xf32>
    %43 = vector.extract_strided_slice %23 {offsets = [0, 256], sizes = [8, 128], strides = [1, 1]} : vector<8x384xf32> to vector<8x128xf32>
    %44 = vector.extract_strided_slice %26 {offsets = [0, 256], sizes = [8, 128], strides = [1, 1]} : vector<8x384xf32> to vector<8x128xf32>
    %45 = vector.broadcast %17 : vector<1x128xf32> to vector<8x128xf32>
    %46 = arith.addf %44, %45 : vector<8x128xf32>
    %47 = arith.mulf %34, %46 : vector<8x128xf32>
    %48 = arith.addf %43, %47 : vector<8x128xf32>
    %49 = math.tanh %48 : vector<8x128xf32>
    %cst_26 = arith.constant 1.000000e+00 : f32
    %50 = vector.broadcast %cst_26 : f32 to vector<8x128xf32>
    %51 = arith.subf %50, %42 : vector<8x128xf32>
    %52 = arith.mulf %51, %49 : vector<8x128xf32>
    %53 = arith.mulf %42, %24 : vector<8x128xf32>
    %54 = arith.addf %52, %53 : vector<8x128xf32>
    %c0_27 = arith.constant 0 : index
    %c0_28 = arith.constant 0 : index
    %55 = vector.load %arg9[%c0_27, %c0_28] : memref<8x128xf32, #tpu.memory_space<vmem>>, vector<8x128xf32>
    tpu.vector_store %arg9[%c0_27, %c0_28], %54 {strides = array<i32>} : memref<8x128xf32, #tpu.memory_space<vmem>>, vector<8x128xf32>,
    %56 = arith.truncf %54 : vector<8x128xf32> to vector<8x128xbf16>
    %57 = arith.index_cast %20 : i32 to index
    %c0_29 = arith.constant 0 : index
    %c0_30 = arith.constant 0 : index
    %58 = vector.load %arg7[%57, %c0_29, %c0_30] : memref<4x8x128xbf16, #tpu.memory_space<vmem>>, vector<1x8x128xbf16>
    %59 = vector.shape_cast %58 : vector<1x8x128xbf16> to vector<8x128xbf16>
    %60 = vector.shape_cast %56 : vector<8x128xbf16> to vector<1x8x128xbf16>
    tpu.vector_store %arg7[%57, %c0_29, %c0_30], %60 {strides = array<i32>} : memref<4x8x128xbf16, #tpu.memory_space<vmem>>, vector<1x8x128xbf16>,
    %c1_i32_31 = arith.constant 1 : i32
    %c1_i32_32 = arith.constant 1 : i32
    %61 = arith.cmpi eq, %arg0, %c1_i32_32 : i32
    %c3_i32_33 = arith.constant 3 : i32
    %62 = arith.subi %c3_i32_33, %c1_i32_31 : i32
    %63 = arith.select %61, %62, %c1_i32_31 : i32
    %64 = arith.index_cast %63 : i32 to index
    %c0_34 = arith.constant 0 : index
    %c0_35 = arith.constant 0 : index
    %65 = vector.load %arg8[%64, %c0_34, %c0_35] : memref<4x8x384xf32, #tpu.memory_space<vmem>>, vector<1x8x384xf32>
    %66 = vector.shape_cast %65 : vector<1x8x384xf32> to vector<8x384xf32>
    %c0_36 = arith.constant 0 : index
    %c0_37 = arith.constant 0 : index
    %67 = vector.load %arg9[%c0_36, %c0_37] : memref<8x128xf32, #tpu.memory_space<vmem>>, vector<8x128xf32>
    %68 = arith.truncf %67 : vector<8x128xf32> to vector<8x128xbf16>
    %cst_38 = arith.constant dense<0.000000e+00> : vector<8x384xf32>
    %69 = tpu.matmul %68, %15, %cst_38 {dimension_numbers = #tpu.dot_dimension_numbers<[1], [0], [0], [1], [0, 0, 1, 1], [], []>} : vector<8x128xbf16>, vector<128x384xbf16>, vector<8x384xf32> -> vector<8x384xf32>
    %70 = vector.extract_strided_slice %66 {offsets = [0, 0], sizes = [8, 128], strides = [1, 1]} : vector<8x384xf32> to vector<8x128xf32>
    %71 = vector.extract_strided_slice %69 {offsets = [0, 0], sizes = [8, 128], strides = [1, 1]} : vector<8x384xf32> to vector<8x128xf32>
    %72 = arith.addf %70, %71 : vector<8x128xf32>
    %73 = arith.negf %72 : vector<8x128xf32>
    %74 = math.exp %73 : vector<8x128xf32>
    %cst_39 = arith.constant 1.000000e+00 : f32
    %75 = vector.broadcast %cst_39 : f32 to vector<8x128xf32>
    %76 = arith.addf %75, %74 : vector<8x128xf32>
    %77 = arith.divf %75, %76 : vector<8x128xf32>
    %78 = vector.extract_strided_slice %66 {offsets = [0, 128], sizes = [8, 128], strides = [1, 1]} : vector<8x384xf32> to vector<8x128xf32>
    %79 = vector.extract_strided_slice %69 {offsets = [0, 128], sizes = [8, 128], strides = [1, 1]} : vector<8x384xf32> to vector<8x128xf32>
    %80 = arith.addf %78, %79 : vector<8x128xf32>
    %81 = arith.negf %80 : vector<8x128xf32>
    %82 = math.exp %81 : vector<8x128xf32>
    %cst_40 = arith.constant 1.000000e+00 : f32
    %83 = vector.broadcast %cst_40 : f32 to vector<8x128xf32>
    %84 = arith.addf %83, %82 : vector<8x128xf32>
    %85 = arith.divf %83, %84 : vector<8x128xf32>
    %86 = vector.extract_strided_slice %66 {offsets = [0, 256], sizes = [8, 128], strides = [1, 1]} : vector<8x384xf32> to vector<8x128xf32>
    %87 = vector.extract_strided_slice %69 {offsets = [0, 256], sizes = [8, 128], strides = [1, 1]} : vector<8x384xf32> to vector<8x128xf32>
    %88 = vector.broadcast %17 : vector<1x128xf32> to vector<8x128xf32>
    %89 = arith.addf %87, %88 : vector<8x128xf32>
    %90 = arith.mulf %77, %89 : vector<8x128xf32>
    %91 = arith.addf %86, %90 : vector<8x128xf32>
    %92 = math.tanh %91 : vector<8x128xf32>
    %cst_41 = arith.constant 1.000000e+00 : f32
    %93 = vector.broadcast %cst_41 : f32 to vector<8x128xf32>
    %94 = arith.subf %93, %85 : vector<8x128xf32>
    %95 = arith.mulf %94, %92 : vector<8x128xf32>
    %96 = arith.mulf %85, %67 : vector<8x128xf32>
    %97 = arith.addf %95, %96 : vector<8x128xf32>
    %c0_42 = arith.constant 0 : index
    %c0_43 = arith.constant 0 : index
    %98 = vector.load %arg9[%c0_42, %c0_43] : memref<8x128xf32, #tpu.memory_space<vmem>>, vector<8x128xf32>
    tpu.vector_store %arg9[%c0_42, %c0_43], %97 {strides = array<i32>} : memref<8x128xf32, #tpu.memory_space<vmem>>, vector<8x128xf32>,
    %99 = arith.truncf %97 : vector<8x128xf32> to vector<8x128xbf16>
    %100 = arith.index_cast %63 : i32 to index
    %c0_44 = arith.constant 0 : index
    %c0_45 = arith.constant 0 : index
    %101 = vector.load %arg7[%100, %c0_44, %c0_45] : memref<4x8x128xbf16, #tpu.memory_space<vmem>>, vector<1x8x128xbf16>
    %102 = vector.shape_cast %101 : vector<1x8x128xbf16> to vector<8x128xbf16>
    %103 = vector.shape_cast %99 : vector<8x128xbf16> to vector<1x8x128xbf16>
    tpu.vector_store %arg7[%100, %c0_44, %c0_45], %103 {strides = array<i32>} : memref<4x8x128xbf16, #tpu.memory_space<vmem>>, vector<1x8x128xbf16>,
    %c2_i32 = arith.constant 2 : i32
    %c1_i32_46 = arith.constant 1 : i32
    %104 = arith.cmpi eq, %arg0, %c1_i32_46 : i32
    %c3_i32_47 = arith.constant 3 : i32
    %105 = arith.subi %c3_i32_47, %c2_i32 : i32
    %106 = arith.select %104, %105, %c2_i32 : i32
    %107 = arith.index_cast %106 : i32 to index
    %c0_48 = arith.constant 0 : index
    %c0_49 = arith.constant 0 : index
    %108 = vector.load %arg8[%107, %c0_48, %c0_49] : memref<4x8x384xf32, #tpu.memory_space<vmem>>, vector<1x8x384xf32>
    %109 = vector.shape_cast %108 : vector<1x8x384xf32> to vector<8x384xf32>
    %c0_50 = arith.constant 0 : index
    %c0_51 = arith.constant 0 : index
    %110 = vector.load %arg9[%c0_50, %c0_51] : memref<8x128xf32, #tpu.memory_space<vmem>>, vector<8x128xf32>
    %111 = arith.truncf %110 : vector<8x128xf32> to vector<8x128xbf16>
    %cst_52 = arith.constant dense<0.000000e+00> : vector<8x384xf32>
    %112 = tpu.matmul %111, %15, %cst_52 {dimension_numbers = #tpu.dot_dimension_numbers<[1], [0], [0], [1], [0, 0, 1, 1], [], []>} : vector<8x128xbf16>, vector<128x384xbf16>, vector<8x384xf32> -> vector<8x384xf32>
    %113 = vector.extract_strided_slice %109 {offsets = [0, 0], sizes = [8, 128], strides = [1, 1]} : vector<8x384xf32> to vector<8x128xf32>
    %114 = vector.extract_strided_slice %112 {offsets = [0, 0], sizes = [8, 128], strides = [1, 1]} : vector<8x384xf32> to vector<8x128xf32>
    %115 = arith.addf %113, %114 : vector<8x128xf32>
    %116 = arith.negf %115 : vector<8x128xf32>
    %117 = math.exp %116 : vector<8x128xf32>
    %cst_53 = arith.constant 1.000000e+00 : f32
    %118 = vector.broadcast %cst_53 : f32 to vector<8x128xf32>
    %119 = arith.addf %118, %117 : vector<8x128xf32>
    %120 = arith.divf %118, %119 : vector<8x128xf32>
    %121 = vector.extract_strided_slice %109 {offsets = [0, 128], sizes = [8, 128], strides = [1, 1]} : vector<8x384xf32> to vector<8x128xf32>
    %122 = vector.extract_strided_slice %112 {offsets = [0, 128], sizes = [8, 128], strides = [1, 1]} : vector<8x384xf32> to vector<8x128xf32>
    %123 = arith.addf %121, %122 : vector<8x128xf32>
    %124 = arith.negf %123 : vector<8x128xf32>
    %125 = math.exp %124 : vector<8x128xf32>
    %cst_54 = arith.constant 1.000000e+00 : f32
    %126 = vector.broadcast %cst_54 : f32 to vector<8x128xf32>
    %127 = arith.addf %126, %125 : vector<8x128xf32>
    %128 = arith.divf %126, %127 : vector<8x128xf32>
    %129 = vector.extract_strided_slice %109 {offsets = [0, 256], sizes = [8, 128], strides = [1, 1]} : vector<8x384xf32> to vector<8x128xf32>
    %130 = vector.extract_strided_slice %112 {offsets = [0, 256], sizes = [8, 128], strides = [1, 1]} : vector<8x384xf32> to vector<8x128xf32>
    %131 = vector.broadcast %17 : vector<1x128xf32> to vector<8x128xf32>
    %132 = arith.addf %130, %131 : vector<8x128xf32>
    %133 = arith.mulf %120, %132 : vector<8x128xf32>
    %134 = arith.addf %129, %133 : vector<8x128xf32>
    %135 = math.tanh %134 : vector<8x128xf32>
    %cst_55 = arith.constant 1.000000e+00 : f32
    %136 = vector.broadcast %cst_55 : f32 to vector<8x128xf32>
    %137 = arith.subf %136, %128 : vector<8x128xf32>
    %138 = arith.mulf %137, %135 : vector<8x128xf32>
    %139 = arith.mulf %128, %110 : vector<8x128xf32>
    %140 = arith.addf %138, %139 : vector<8x128xf32>
    %c0_56 = arith.constant 0 : index
    %c0_57 = arith.constant 0 : index
    %141 = vector.load %arg9[%c0_56, %c0_57] : memref<8x128xf32, #tpu.memory_space<vmem>>, vector<8x128xf32>
    tpu.vector_store %arg9[%c0_56, %c0_57], %140 {strides = array<i32>} : memref<8x128xf32, #tpu.memory_space<vmem>>, vector<8x128xf32>,
    %142 = arith.truncf %140 : vector<8x128xf32> to vector<8x128xbf16>
    %143 = arith.index_cast %106 : i32 to index
    %c0_58 = arith.constant 0 : index
    %c0_59 = arith.constant 0 : index
    %144 = vector.load %arg7[%143, %c0_58, %c0_59] : memref<4x8x128xbf16, #tpu.memory_space<vmem>>, vector<1x8x128xbf16>
    %145 = vector.shape_cast %144 : vector<1x8x128xbf16> to vector<8x128xbf16>
    %146 = vector.shape_cast %142 : vector<8x128xbf16> to vector<1x8x128xbf16>
    tpu.vector_store %arg7[%143, %c0_58, %c0_59], %146 {strides = array<i32>} : memref<4x8x128xbf16, #tpu.memory_space<vmem>>, vector<1x8x128xbf16>,
    %c3_i32_60 = arith.constant 3 : i32
    %c1_i32_61 = arith.constant 1 : i32
    %147 = arith.cmpi eq, %arg0, %c1_i32_61 : i32
    %c3_i32_62 = arith.constant 3 : i32
    %148 = arith.subi %c3_i32_62, %c3_i32_60 : i32
    %149 = arith.select %147, %148, %c3_i32_60 : i32
    %150 = arith.index_cast %149 : i32 to index
    %c0_63 = arith.constant 0 : index
    %c0_64 = arith.constant 0 : index
    %151 = vector.load %arg8[%150, %c0_63, %c0_64] : memref<4x8x384xf32, #tpu.memory_space<vmem>>, vector<1x8x384xf32>
    %152 = vector.shape_cast %151 : vector<1x8x384xf32> to vector<8x384xf32>
    %c0_65 = arith.constant 0 : index
    %c0_66 = arith.constant 0 : index
    %153 = vector.load %arg9[%c0_65, %c0_66] : memref<8x128xf32, #tpu.memory_space<vmem>>, vector<8x128xf32>
    %154 = arith.truncf %153 : vector<8x128xf32> to vector<8x128xbf16>
    %cst_67 = arith.constant dense<0.000000e+00> : vector<8x384xf32>
    %155 = tpu.matmul %154, %15, %cst_67 {dimension_numbers = #tpu.dot_dimension_numbers<[1], [0], [0], [1], [0, 0, 1, 1], [], []>} : vector<8x128xbf16>, vector<128x384xbf16>, vector<8x384xf32> -> vector<8x384xf32>
    %156 = vector.extract_strided_slice %152 {offsets = [0, 0], sizes = [8, 128], strides = [1, 1]} : vector<8x384xf32> to vector<8x128xf32>
    %157 = vector.extract_strided_slice %155 {offsets = [0, 0], sizes = [8, 128], strides = [1, 1]} : vector<8x384xf32> to vector<8x128xf32>
    %158 = arith.addf %156, %157 : vector<8x128xf32>
    %159 = arith.negf %158 : vector<8x128xf32>
    %160 = math.exp %159 : vector<8x128xf32>
    %cst_68 = arith.constant 1.000000e+00 : f32
    %161 = vector.broadcast %cst_68 : f32 to vector<8x128xf32>
    %162 = arith.addf %161, %160 : vector<8x128xf32>
    %163 = arith.divf %161, %162 : vector<8x128xf32>
    %164 = vector.extract_strided_slice %152 {offsets = [0, 128], sizes = [8, 128], strides = [1, 1]} : vector<8x384xf32> to vector<8x128xf32>
    %165 = vector.extract_strided_slice %155 {offsets = [0, 128], sizes = [8, 128], strides = [1, 1]} : vector<8x384xf32> to vector<8x128xf32>
    %166 = arith.addf %164, %165 : vector<8x128xf32>
    %167 = arith.negf %166 : vector<8x128xf32>
    %168 = math.exp %167 : vector<8x128xf32>
    %cst_69 = arith.constant 1.000000e+00 : f32
    %169 = vector.broadcast %cst_69 : f32 to vector<8x128xf32>
    %170 = arith.addf %169, %168 : vector<8x128xf32>
    %171 = arith.divf %169, %170 : vector<8x128xf32>
    %172 = vector.extract_strided_slice %152 {offsets = [0, 256], sizes = [8, 128], strides = [1, 1]} : vector<8x384xf32> to vector<8x128xf32>
    %173 = vector.extract_strided_slice %155 {offsets = [0, 256], sizes = [8, 128], strides = [1, 1]} : vector<8x384xf32> to vector<8x128xf32>
    %174 = vector.broadcast %17 : vector<1x128xf32> to vector<8x128xf32>
    %175 = arith.addf %173, %174 : vector<8x128xf32>
    %176 = arith.mulf %163, %175 : vector<8x128xf32>
    %177 = arith.addf %172, %176 : vector<8x128xf32>
    %178 = math.tanh %177 : vector<8x128xf32>
    %cst_70 = arith.constant 1.000000e+00 : f32
    %179 = vector.broadcast %cst_70 : f32 to vector<8x128xf32>
    %180 = arith.subf %179, %171 : vector<8x128xf32>
    %181 = arith.mulf %180, %178 : vector<8x128xf32>
    %182 = arith.mulf %171, %153 : vector<8x128xf32>
    %183 = arith.addf %181, %182 : vector<8x128xf32>
    %c0_71 = arith.constant 0 : index
    %c0_72 = arith.constant 0 : index
    %184 = vector.load %arg9[%c0_71, %c0_72] : memref<8x128xf32, #tpu.memory_space<vmem>>, vector<8x128xf32>
    tpu.vector_store %arg9[%c0_71, %c0_72], %183 {strides = array<i32>} : memref<8x128xf32, #tpu.memory_space<vmem>>, vector<8x128xf32>,
    %185 = arith.truncf %183 : vector<8x128xf32> to vector<8x128xbf16>
    %186 = arith.index_cast %149 : i32 to index
    %c0_73 = arith.constant 0 : index
    %c0_74 = arith.constant 0 : index
    %187 = vector.load %arg7[%186, %c0_73, %c0_74] : memref<4x8x128xbf16, #tpu.memory_space<vmem>>, vector<1x8x128xbf16>
    %188 = vector.shape_cast %187 : vector<1x8x128xbf16> to vector<8x128xbf16>
    %189 = vector.shape_cast %185 : vector<8x128xbf16> to vector<1x8x128xbf16>
    tpu.vector_store %arg7[%186, %c0_73, %c0_74], %189 {strides = array<i32>} : memref<4x8x128xbf16, #tpu.memory_space<vmem>>, vector<1x8x128xbf16>,
    %c4_i32 = arith.constant 4 : i32
    return
  }
  func.func @transform_0(%arg0: i32, %arg1: i32) -> (i32, i32, i32) {
    %c2_i32 = arith.constant 2 : i32
    %0 = arith.muli %c2_i32, %arg1 : i32
    %c1_i32 = arith.constant 1 : i32
    %1 = arith.subi %c1_i32, %0 : i32
    %2 = arith.muli %arg0, %1 : i32
    %3 = arith.addi %arg1, %2 : i32
    %c0_i32 = arith.constant 0 : i32
    %c0_i32_0 = arith.constant 0 : i32
    %c0_i32_1 = arith.constant 0 : i32
    return %3, %c0_i32, %c0_i32_0 : i32, i32, i32
  }
  func.func @transform_1(%arg0: i32, %arg1: i32) -> (i32, i32, i32) {
    %c0_i32 = arith.constant 0 : i32
    %c0_i32_0 = arith.constant 0 : i32
    %c0_i32_1 = arith.constant 0 : i32
    return %arg0, %c0_i32, %c0_i32_0 : i32, i32, i32
  }
  func.func @transform_2(%arg0: i32, %arg1: i32) -> (i32, i32, i32) {
    %c0_i32 = arith.constant 0 : i32
    %c0_i32_0 = arith.constant 0 : i32
    %c0_i32_1 = arith.constant 0 : i32
    return %arg0, %c0_i32, %c0_i32_0 : i32, i32, i32
  }
  func.func @transform_3(%arg0: i32, %arg1: i32) -> (i32, i32, i32) {
    %c0_i32 = arith.constant 0 : i32
    %c0_i32_0 = arith.constant 0 : i32
    %c0_i32_1 = arith.constant 0 : i32
    return %arg0, %c0_i32, %c0_i32_0 : i32, i32, i32
  }
  func.func @transform_4(%arg0: i32, %arg1: i32) -> (i32, i32, i32) {
    %c0_i32 = arith.constant 0 : i32
    %c0_i32_0 = arith.constant 0 : i32
    %c0_i32_1 = arith.constant 0 : i32
    return %arg0, %c0_i32, %c0_i32_0 : i32, i32, i32
  }
  func.func @transform_5(%arg0: i32, %arg1: i32) -> (i32, i32, i32) {
    %c2_i32 = arith.constant 2 : i32
    %0 = arith.muli %c2_i32, %arg1 : i32
    %c1_i32 = arith.constant 1 : i32
    %1 = arith.subi %c1_i32, %0 : i32
    %2 = arith.muli %arg0, %1 : i32
    %3 = arith.addi %arg1, %2 : i32
    %c0_i32 = arith.constant 0 : i32
    %c0_i32_0 = arith.constant 0 : i32
    return %3, %c0_i32, %arg0 : i32, i32, i32
  }
}

</mosaic_0001>

<bundles_post_ra>
// kernel: rnn_forward.2
= control target key start
LH: loop header
LB: loop body
LE: loop exit
PB: predicated region body
PF: predicated region fallthrough
CT: control target
= control target key end

     0   :  { %s2955_s0 = inlined_call_operand.vmem [shape: bf16[8,8,128], index: 0, kind: input, shape index: {}]   ;;  %s2956_s1 = inlined_call_operand.hbm [shape: bf16[2,128,384], index: 1, kind: input, shape index: {}]   ;;  %s2957_s2 = inlined_call_operand.hbm [shape: bf16[2,128,384], index: 2, kind: input, shape index: {}]   ;;  %s2958_s3 = inlined_call_operand.hbm [shape: f32[2,1,384], index: 3, kind: input, shape index: {}]   ;;  %s2959_s4 = inlined_call_operand.hbm [shape: f32[2,1,128], index: 4, kind: input, shape index: {}]   ;;  %s2960_s5 = inlined_call_operand.vmem [shape: bf16[8,8,256], index: 5, kind: output, shape index: {}]  }
   0x1   :  { %2973 = sst [smem:[#allocation22_spill]] %s2957_s2 }
   0x2   :  { %2974 = sst [smem:[#allocation23_spill]] %s2960_s5 }
   0x3   :  { %10 = vsyncpa [#allocation5], 0 }
   0x4   :  { %12 = vsyncpa [#allocation5 + $0x1], 0 }
   0x5   :  { %13 = vsyncpa [#allocation7], 0 }
   0x6   :  { %15 = vsyncpa [#allocation7 + $0x1], 0 }
   0x7   :  { %16 = vsyncpa [#allocation10], 0 }
   0x8   :  { %18 = vsyncpa [#allocation10 + $0x1], 0  ;;  %s2325_s18 = smov 0   ;;  %s2327_s19 = smov 0  }
   0x9   :  { %s2329_s20 = smov 0   ;;  %s2331_s21 = smov 0  }
   0xa   :  { %s2333_s22 = smov 0   ;;  %s2335_s23 = smov 0  }
   0xb   :  { %s2337_s24 = smov 0   ;;  %s2339_s25 = smov 0  }
   0xc   :  { %s2341_s26 = smov 0   ;;  %s2343_s27 = smov 0  }
   0xd LB: > { %2975 = sst [smem:[#allocation15_spill]] %s2251_s19  ;;  %s2374_s28 = sadd.s32 4294967295, %s2283_s27   ;;  %s2283_s27 = sphi %s2343_s27, %s24_s27   ;;  %s2279_s26 = sphi %s2341_s26, %s3011_s26   ;;  %s2275_s25 = sphi %s2339_s25, %s3006_s25   ;;  %s2271_s24 = sphi %s2337_s24, %s3010_s24   ;;  %s2267_s23 = sphi %s2335_s23, %s3005_s23   ;;  %s2263_s22 = sphi %s2333_s22, %s3004_s22   ;;  %s2259_s21 = sphi %s2331_s21, %s3009_s21   ;;  %s2255_s20 = sphi %s2329_s20, %s3008_s20   ;;  %s2251_s19 = sphi %s2327_s19, %s3002_s19   ;;  %s2247_s18 = sphi %s2325_s18, %s3001_s18  }
   0xe   : > { %2976 = sst [smem:[#allocation16_spill]] %s2263_s22  ;;  %s33_s29 = sadd.s32 1, %s2275_s25 }
   0xf   : > { %2977 = sst [smem:[#allocation17_spill]] %s2275_s25  ;;  %p34_p0 = scmp.ge.s32.totalorder %s33_s29, 2 }
  0x10   : > { %s36_s30 = sadd.s32 1, %s2279_s26  ;;  %s77_s6 = sadd.s32 1, %s2263_s22 }
  0x11   : > { %p84_p1 = scmp.ne.s32.totalorder %s2263_s22, %s2259_s21  ;;  %s3013_s29 = smov (%p34_p0, %s33_s29), 0 }
  0x12   : > { %2978 = sst [smem:[#allocation18_spill]] %s3013_s29  ;;  %s3015_s30 = smov (!%p34_p0, %s36_s30), %s2279_s26 }
  0x13   : > { %p85_p2 = scmp.eq.s32.totalorder %s2283_s27, 0  ;;  %p90_p3 = scmp.ne.s32.totalorder %s2259_s21, %s2255_s20 }
  0x14   : > { %p38_p4 = scmp.ge.s32.totalorder %s3015_s30, 2  ;;  %p91_p5 = scmp.eq.s32.totalorder %s2374_s28, 0 }
  0x15   : > { %p2387_p6 = por %p85_p2, %p84_p1  ;;  %s1612_s8 = sshll.u32 %s2275_s25, 1 }
  0x16   : > { %s3017_s30 = smov (%p38_p4, %s3015_s30), 0  ;;  %p2394_p7 = por %p91_p5, %p90_p3 }
  0x17   : > { %2980 = sst [smem:[#allocation19_spill]] %s3017_s30  ;;  %s179_s10 = ssub.s32 1, %s1612_s8 }
  0x18   : > { %s2981_s9 = scalar_select %p2394_p7, 1, 0 }
  0x19   : > { %s74_s11 = ssub.s32 %s2279_s26, %s3017_s30  ;;  %s180_s12 = smul.u32 %s2279_s26, %s179_s10 }
  0x1a   : > { %p75_p8 = scmp.eq.s32.totalorder %s74_s11, 0  ;;  %s1613_s13 = sshll.u32 %s3013_s29, 1 }
  0x1b   : > { %s181_s14 = sadd.s32 %s2275_s25, %s180_s12  ;;  %s183_s15 = ssub.s32 1, %s1613_s13 }
  0x1c   : > { %s2404_s16 = scalar_select %p75_p8, %s2263_s22, %s77_s6  }
  0x1d   : > { %s184_s17 = smul.u32 %s183_s15, %s3017_s30  ;;  %s191_s20 = sadd.s32 1, %s2251_s19 }
  0x1e   : > { %2982 = sst [smem:[#allocation20_spill]] %s2404_s16  ;;  %p201_p9 = scmp.ne.s32.totalorder %s2251_s19, %s2247_s18 }
  0x1f   : > { %p202_p10 = scmp.eq.s32.totalorder %s2374_s28, 3  ;;  %s185_s8 = sadd.s32 %s184_s17, %s3013_s29 }
  0x20   : > { %s186_s5 = ssub.s32 %s181_s14, %s185_s8  ;;  %p1880_p12 = scmp.lt.s32.totalorder %s2283_s27, 4 }
  0x21   : > { %p2412_p11 = por %p202_p10, %p201_p9  ;;  %s188_s12 = sor.u32 %s186_s5, %s74_s11 }
  0x22   : > { %p189_p13 = scmp.eq.s32.totalorder %s188_s12, 0  ;;  %s2418_s13 = sand.u32 1, %s2263_s22  }
  0x23   : > { %s2983_s10 = scalar_select %p2412_p11, 1, 0 }
  0x24   : > { %s2963_s6 = smul.u32 192, %s2418_s13  ;;  %p2423_p0 = pnand %p1880_p12, %p2387_p6 }
  0x25   : > { %s2428_s14 = scalar_select %p189_p13, %s2251_s19, %s191_s20  }
  0x26   : > { %s2984_s15 = scalar_select %p2423_p0, 1, 0 }
  0x27   : > { %2985 = sst [smem:[#allocation21_spill]] %s2428_s14  ;;  %s2964_s17 = smul.u32 3072, %s2279_s26 }
  0x28   : > { %s266_s8 = sand.u32 1, %s2283_s27   ;;  %s2986_s2 = sld [smem:[#allocation22_spill]] }
  0x29   : > { %s270_s7 = scalar_lea.vmem [#allocation6], %s2963_s6  ;;  %s2445_s20 = scalar_lea.sflag [#allocation7], %s266_s8 }
  0x2a   : > { %s277_s12 = sshll.u32 %s270_s7, 4  ;;  %p2451_p4 = pneg %p2423_p0  ;;  %s2442_s12 = int_to_ptr.vmem [resolvable:$true] %s277_s12 }
  0x2e   : > { %s2437_s11 = scalar_lea.hbm %s2986_s2, %s2964_s17  ;;  %s2078_s7 = scalar_lea.hbm %s2986_s2, 6144 }
  0x2f   : > { %s2073_s29 = scalar_lea.hbm %s2437_s11, 3072  ;;  %p2079_p8 = scmp.lt.u32.totalorder %s2437_s11, %s2986_s2 }
  0x30   : > { %p2074_p3 = scmp.ne.s32.totalorder %s2437_s11, %s2073_s29  ;;  %p2080_p9 = scmp.lt.u32.totalorder %s2078_s7, %s2073_s29 }
  0x31   : > { %p2082_p12 = scmp.lt.u32.totalorder %s2073_s29, %s2437_s11 }
  0x32   : > { %p2076_p5 = pnand %p2451_p4, %p2074_p3  ;;  %p2081_p10 = por %p2080_p9, %p2079_p8 }
  0x34   : > { %p2077_p6 = pneg %p2076_p5  ;;  %p2083_p13 = por %p2082_p12, %p2081_p10 }
  0x36   : > { %p2084_p1 = pnand %p2083_p13, %p2077_p6 }
  0x38   : > { %2087 = shalt.err (!%p2084_p1)
}
  0x39   : > { %s2088_s8 = scalar_lea.vmem %s2442_s12, 3072  ;;  %s2285_s6 = smov [#allocation6]  }
  0x3a   : > { %p2089_p3 = scmp.ne.s32.totalorder %s2442_s12, %s2088_s8  ;;  %s2093_s5 = sshll.u32 %s2285_s6, 4  ;;  %s2094_s5 = int_to_ptr.vmem [resolvable:$false] %s2093_s5 }
  0x3b   : > { %s2095_s25 = scalar_lea.vmem %s2094_s5, 6144  ;;  %p2096_p11 = scmp.lt.s32.totalorder %s2442_s12, %s2094_s5 }
  0x3c   : > { %p2091_p5 = pnand %p2089_p3, %p2451_p4  ;;  %p2097_p7 = scmp.lt.s32.totalorder %s2095_s25, %s2088_s8 }
  0x3e   : > { %p2092_p2 = pneg %p2091_p5  ;;  %p2098_p8 = por %p2097_p7, %p2096_p11 }
  0x40   : > { %p2099_p9 = pnand %p2098_p8, %p2092_p2 }
  0x42   : > { %2102 = shalt.err (!%p2099_p9)
}
  0x43   : > { %s2968_s29 = smov 192   ;;  %s2969_s17 = smov 12  }
  0x44   : > { %1873 = dma.hbm_to_vmem [thread:$0]  (!%p2423_p0), %s2437_s11, 3072, %s2442_s12, %s2445_s20, %s2968_s29, %s2968_s29, %s2969_s17  }
  0x45   : > { %p2988_p7 = scmp.lt.s32.totalorder %s2283_s27, 5  ;;  %p2989_p11 = scmp.ge.s32.totalorder %s2283_s27, 1 }
  0x46   : > { %s2991_s8 = smul.u32 3072, %s2279_s26  ;;  %s246_s29 = scalar_lea.sflag [#allocation5], %s2418_s13 }
  0x47   : > { %p2482_p1 = pnand %p2989_p11, %p2988_p7  ;;  %s2992_s2 = smul.u32 192, %s2418_s13 }
  0x48   : > { %s2491_s25 = scalar_lea.hbm %s2956_s1, %s2991_s8  ;;  %s1855_s11 = smul.u32 3, %s2418_s13 }
  0x49   : > { %s2990_s7 = scalar_select %p2482_p1, 1, 0 }
  0x4a   : > { %s249_s16 = scalar_lea.vmem [#allocation4], %s2992_s2  ;;  %s1856_s12 = smul.u32 48, %s2279_s26 }
  0x4b   : > { %s256_s22 = sshll.u32 %s249_s16, 4  ;;  %s2103_s17 = scalar_lea.hbm %s2491_s25, 3072  ;;  %s2496_s22 = int_to_ptr.vmem [resolvable:$true] %s256_s22 }
  0x4c   : > { %p2104_p2 = scmp.ne.s32.totalorder %s2491_s25, %s2103_s17  ;;  %s2108_s5 = scalar_lea.hbm %s2956_s1, 6144 }
  0x4d   : > { %p2109_p12 = scmp.lt.u32.totalorder %s2491_s25, %s2956_s1  ;;  %p2110_p13 = scmp.lt.u32.totalorder %s2108_s5, %s2103_s17 }
  0x4e   : > { %p2106_p6 = pnand %p2104_p2, %p2451_p4  ;;  %p2112_p5 = scmp.lt.u32.totalorder %s2103_s17, %s2491_s25 }
  0x4f   : > { %p2111_p3 = por %p2110_p13, %p2109_p12 }
  0x50   : > { %p2107_p10 = pneg %p2106_p6 }
  0x51   : > { %p2113_p8 = por %p2112_p5, %p2111_p3 }
  0x53   : > { %p2114_p9 = pnand %p2113_p8, %p2107_p10 }
  0x55   : > { %2117 = shalt.err (!%p2114_p9)
}
  0x56   : > { %s2118_s2 = scalar_lea.vmem %s2496_s22, 3072  ;;  %s2288_s16 = smov [#allocation4]  }
  0x57   : > { %p2119_p7 = scmp.ne.s32.totalorder %s2496_s22, %s2118_s2  ;;  %s2123_s6 = sshll.u32 %s2288_s16, 4  ;;  %s2124_s6 = int_to_ptr.vmem [resolvable:$false] %s2123_s6 }
  0x58   : > { %s2125_s19 = scalar_lea.vmem %s2124_s6, 6144  ;;  %p2126_p6 = scmp.lt.s32.totalorder %s2496_s22, %s2124_s6 }
  0x59   : > { %p2121_p11 = pnand %p2119_p7, %p2451_p4  ;;  %p2127_p1 = scmp.lt.s32.totalorder %s2125_s19, %s2118_s2 }
  0x5b   : > { %p2122_p2 = pneg %p2121_p11  ;;  %p2128_p12 = por %p2127_p1, %p2126_p6 }
  0x5d   : > { %p2129_p13 = pnand %p2128_p12, %p2122_p2 }
  0x5f   : > { %2132 = shalt.err (!%p2129_p13)
}
  0x60   : > { %s2993_s14 = smov 12   ;;  %s2994_s17 = smov 192  }
  0x61   : > { %1870 = dma.hbm_to_vmem [thread:$0]  (!%p2423_p0), %s2491_s25, 3072, %s2496_s22, %s246_s29, %s2994_s17, %s2994_s17, %s2993_s14  }
  0x62   : > { %s2531_s2 = scalar_lea.hbm %s2958_s3, %s1856_s12  ;;  %s291_s16 = scalar_lea.vmem [#allocation8], %s1855_s11 }
  0x63   : > { %s299_s6 = sshll.u32 %s291_s16, 4  ;;  %s2133_s19 = scalar_lea.hbm %s2531_s2, 48  ;;  %s300_s6 = int_to_ptr.vmem [resolvable:$true] %s299_s6 }
  0x64   : > { %p2134_p1 = scmp.ne.s32.totalorder %s2531_s2, %s2133_s19  ;;  %s2138_s25 = scalar_lea.hbm %s2958_s3, 96 }
  0x65   : > { %p2139_p5 = scmp.lt.u32.totalorder %s2531_s2, %s2958_s3  ;;  %p2140_p8 = scmp.lt.u32.totalorder %s2138_s25, %s2133_s19 }
  0x66   : > { %p2136_p10 = pnand %p2134_p1, %p2451_p4  ;;  %p2142_p7 = scmp.lt.u32.totalorder %s2133_s19, %s2531_s2 }
  0x67   : > { %p2141_p9 = por %p2140_p8, %p2139_p5 }
  0x68   : > { %p2137_p3 = pneg %p2136_p10 }
  0x69   : > { %p2143_p11 = por %p2142_p7, %p2141_p9 }
  0x6b   : > { %p2144_p2 = pnand %p2143_p11, %p2137_p3 }
  0x6d   : > { %2147 = shalt.err (!%p2144_p2)
}
  0x6e   : > { %s2148_s11 = scalar_lea.vmem %s300_s6, 48  ;;  %s2289_s17 = smov [#allocation8]  }
  0x6f   : > { %p2149_p6 = scmp.ne.s32.totalorder %s300_s6, %s2148_s11  ;;  %s2153_s8 = sshll.u32 %s2289_s17, 4  ;;  %s2154_s8 = int_to_ptr.vmem [resolvable:$false] %s2153_s8 }
  0x70   : > { %s2155_s5 = scalar_lea.vmem %s2154_s8, 96  ;;  %p2156_p1 = scmp.lt.s32.totalorder %s300_s6, %s2154_s8 }
  0x71   : > { %p2151_p12 = pnand %p2149_p6, %p2451_p4  ;;  %p2157_p10 = scmp.lt.s32.totalorder %s2155_s5, %s2148_s11 }
  0x73   : > { %p2152_p13 = pneg %p2151_p12  ;;  %p2158_p0 = por %p2157_p10, %p2156_p1 }
  0x75   : > { %p2159_p5 = pnand %p2158_p0, %p2152_p13 }
  0x77   : > { %2162 = shalt.err (!%p2159_p5)
}
  0x78   : > { %p2995_p8 = scmp.ne.s32.totalorder %s2984_s15, 0  ;;  %s1619_s16 = sshll.u32 %s2279_s26, 4 }
  0x79   : > { %s309_s19 = scalar_lea.vmem [#allocation9], %s2418_s13  ;;  %s2558_s14 = scalar_lea.hbm %s2959_s4, %s1619_s16 }
  0x7a   : > { %1876 = dma.hbm_to_vmem [thread:$0]  (!%p2995_p8), %s2531_s2, 48, %s300_s6, %s2445_s20  }
  0x7b   : > { %s316_s22 = sshll.u32 %s309_s19, 4  ;;  %s307_s12 = scalar_lea.sflag [#allocation10], %s2418_s13  ;;  %s317_s22 = int_to_ptr.vmem [resolvable:$true] %s316_s22 }
  0x7c   : > { %s2163_s11 = scalar_lea.hbm %s2558_s14, 16  ;;  %s2168_s6 = scalar_lea.hbm %s2959_s4, 32 }
  0x7d   : > { %p2164_p0 = scmp.ne.s32.totalorder %s2558_s14, %s2163_s11  ;;  %p2169_p7 = scmp.lt.u32.totalorder %s2558_s14, %s2959_s4 }
  0x7e   : > { %p2170_p11 = scmp.lt.u32.totalorder %s2168_s6, %s2163_s11  ;;  %p2172_p6 = scmp.lt.u32.totalorder %s2163_s11, %s2558_s14 }
  0x7f   : > { %p2166_p3 = pnand %p2164_p0, %p2451_p4 }
  0x80   : > { %p2171_p2 = por %p2170_p11, %p2169_p7 }
  0x81   : > { %p2167_p9 = pneg %p2166_p3 }
  0x82   : > { %p2173_p12 = por %p2172_p6, %p2171_p2 }
  0x84   : > { %p2174_p13 = pnand %p2173_p12, %p2167_p9 }
  0x86   : > { %2177 = shalt.err (!%p2174_p13)
}
  0x87   : > { %s2178_s13 = scalar_lea.vmem %s317_s22, 16  ;;  %s2290_s5 = smov [#allocation9]  }
  0x88   : > { %p2179_p1 = scmp.ne.s32.totalorder %s317_s22, %s2178_s13  ;;  %s2183_s16 = sshll.u32 %s2290_s5, 4  ;;  %s2184_s16 = int_to_ptr.vmem [resolvable:$false] %s2183_s16 }
  0x89   : > { %s2185_s19 = scalar_lea.vmem %s2184_s16, 32  ;;  %p2186_p0 = scmp.lt.s32.totalorder %s317_s22, %s2184_s16 }
  0x8a   : > { %p2181_p10 = pnand %p2179_p1, %p2451_p4  ;;  %p2187_p3 = scmp.lt.s32.totalorder %s2185_s19, %s2178_s13 }
  0x8c   : > { %p2182_p5 = pneg %p2181_p10  ;;  %p2188_p8 = por %p2187_p3, %p2186_p0 }
  0x8e   : > { %p2189_p7 = pnand %p2188_p8, %p2182_p5 }
  0x90   : > { %2192 = shalt.err (!%p2189_p7)
}
  0x91   : > { %p2996_p11 = scmp.ne.s32.totalorder %s2984_s15, 0  ;;  %p2997_p9 = scmp.ne.s32.totalorder %s2990_s7, 0 }
  0x92   : > { %s2581_s30 = sand.u32 (!%p2997_p9), 1, %s2259_s21   ;;  %p2998_p4 = scmp.ne.s32.totalorder (!%p2997_p9), %s2981_s9, 0 }
  0x93   : > { %1879 = dma.hbm_to_vmem [thread:$0]  (!%p2996_p11), %s2558_s14, 16, %s317_s22, %s307_s12  }
  0x94   : > { %325 = sbr.rel (%p2997_p9) target bundleno = 1510 (0x5e6), region = 40  ;;  %s328_s25 = scalar_lea.sflag (!%p2997_p9), [#allocation5], %s2581_s30 }
  0x95   : > { %s1857_s29 = smul.u32 (!%p2997_p9), 192, %s2581_s30 }
  0x97   : > { %s2585_s11 = scalar_lea.vmem (!%p2997_p9), [#allocation4], %s1857_s29 }
  0x9b   : > { %2234 = dma.done.wait (%p2998_p4), %s328_s25, 3072  }
  0x9c   : > { %2236 = vsyncadd (%p2998_p4), %s328_s25, 4294964224  ;;  %s336_s15 = sand.u32 1, %s2374_s28   ;;  %s2592_s22 = scalar_lea.vmem [#allocation6], %s1857_s29 }
  0x9d   : > { %s337_s7 = scalar_lea.sflag [#allocation7], %s336_s15 }
  0x9e   : > { %2238 = dma.done.wait (%p2998_p4), %s337_s7, 3120  }
  0x9f   : > { %2240 = vsyncadd (%p2998_p4), %s337_s7, 4294964176  ;;  %s1858_s14 = smul.u32 3, %s2581_s30  ;;  %s355_s20 = scalar_lea.sflag [#allocation10], %s2581_s30 }
  0xa0   : > { %s357_s2 = scalar_lea.vmem [#allocation9], %s2581_s30 }
  0xa1   : > { %s2599_s12 = scalar_lea.vmem [#allocation8], %s1858_s14 }
  0xa2   : > { %2242 = dma.done.wait (%p2998_p4), %s355_s20, 16  }
  0xa3   : > { %2244 = vsyncadd (%p2998_p4), %s355_s20, 4294967280  ;;  %s403_s28 = sand.u32 1, %s2247_s18   ;;  %s1622_s6 = sshll.u32 %s2267_s23, 1  ;;  %v2291_v0 = vmov 0   ;;  %v1967_v1 = vld [vmem:[%s2585_s11 + $0x4] ss:$12 sps:$4 sm:$0xff]   ;;  %v464_v27 = vlaneseq }
  0xa4   : > { %s2609_s17 = sshll.u32 %s403_s28, 4  ;;  %651 = vmatprep.mubr.bf16.mxu0 %v2291_v0  ;;  %s407_s9 = ssub.s32 1, %s1622_s6  ;;  %v1969_v2 = vld [vmem:[%s2585_s11] ss:$12 sps:$4 sm:$0xff]   ;;  %619 = vmatprep.subr.bf16.mxu0 %v1967_v1  ;;  %v1970_v3 = vld [vmem:[%s2585_s11 + $0x1c] ss:$12 sps:$4 sm:$0xff]  }
  0xa5   : > { %s408_s8 = smul.u32 %s2271_s24, %s407_s9  ;;  %v1972_v4 = vld [vmem:[%s2585_s11 + $0x18] ss:$12 sps:$4 sm:$0xff]   ;;  %620 = vmatpush1.bf16.msra.mxu0 %v1969_v2  ;;  %v1973_v5 = vld [vmem:[%s2585_s11 + $0x8] ss:$12 sps:$4 sm:$0xff]   ;;  %v1977_v7 = vld [vmem:[%s2585_s11 + $0x20] ss:$12 sps:$4 sm:$0xff]  }
  0xa6   : > { %621 = vmatprep.subr.bf16.mxu0 %v1970_v3  ;;  %v1974_v6 = vld [vmem:[%s2585_s11 + $0x34] ss:$12 sps:$4 sm:$0xff]   ;;  %1751 = vmatprep.subr.bf16.mxu1 %v1973_v5  ;;  %v1976_v8 = vld [vmem:[%s2585_s11 + $0x30] ss:$12 sps:$4 sm:$0xff]   ;;  %v1978_v9 = vld [vmem:[%s2585_s11 + $0x4c] ss:$12 sps:$4 sm:$0xff]  }
  0xa7   : > { %s2614_s13 = sadd.s32 %s2267_s23, %s408_s8  ;;  %1752 = vmatpush3.bf16.msra.mxu1 %v1973_v5  ;;  %v1981_v10 = vld [vmem:[%s2585_s11 + $0x38] ss:$12 sps:$4 sm:$0xff]   ;;  %v1980_v11 = vld [vmem:[%s2585_s11 + $0x48] ss:$12 sps:$4 sm:$0xff]   ;;  %v1985_v12 = vld [vmem:[%s2585_s11 + $0x50] ss:$12 sps:$4 sm:$0xff]  }
  0xa8   : > { %s1623_s5 = sshll.u32 %s2614_s13, 2  ;;  %1753 = vmatprep.subr.bf16.mxu1 %v1977_v7  ;;  %v1982_v13 = vld [vmem:[%s2585_s11 + $0x64] ss:$12 sps:$4 sm:$0xff]   ;;  %v1984_v14 = vld [vmem:[%s2585_s11 + $0x60] ss:$12 sps:$4 sm:$0xff]   ;;  %v465_v28 = vshrl.u32 %v464_v27, 7 }
  0xa9   : > { %p411_p8 = scmp.lt.s32.totalorder %s1623_s5, 7  ;;  %622 = vmatpush1.bf16.msra.mxu0 %v1972_v4  ;;  %v1989_v15 = vld [vmem:[%s2585_s11 + $0x68] ss:$12 sps:$4 sm:$0xff]   ;;  %v1988_v17 = vld [vmem:[%s2585_s11 + $0x78] ss:$12 sps:$4 sm:$0xff]   ;;  %s2647_s25 = scalar_lea.vmem [#allocation11], %s2609_s17 }
  0xaa   : > { %623 = vmatprep.subr.bf16.mxu0 %v1974_v6  ;;  %v1986_v16 = vld [vmem:[%s2585_s11 + $0x7c] ss:$12 sps:$4 sm:$0xff]   ;;  %v1993_v19 = vld [vmem:[%s2585_s11 + $0x80] ss:$12 sps:$4 sm:$0xff]   ;;  %v1997_v22 = vld [vmem:[%s2585_s11 + $0x98] ss:$12 sps:$4 sm:$0xff]  }
  0xab   : > { %s3019_s5 = smov (!%p411_p8, %s1623_s5), 7  ;;  %1754 = vmatpush3.bf16.msra.mxu1 %v1977_v7  ;;  %v1990_v20 = vld [vmem:[%s2585_s11 + $0x94] ss:$12 sps:$4 sm:$0xff]   ;;  %v1992_v21 = vld [vmem:[%s2585_s11 + $0x90] ss:$12 sps:$4 sm:$0xff]   ;;  %v466_v29 = vsub.s32 0, %v465_v28 }
  0xac   : > { %1755 = vmatprep.subr.bf16.mxu1 %v1981_v10  ;;  %s1624_s18 = sshll.u32 %s3019_s5, 2  ;;  %v1994_v23 = vld [vmem:[%s2585_s11 + $0xac] ss:$12 sps:$4 sm:$0xff]   ;;  %v1996_v24 = vld [vmem:[%s2585_s11 + $0xa8] ss:$12 sps:$4 sm:$0xff]   ;;  %v470_v31 = vsub.s32 1, %v465_v28 }
  0xad   : > { %624 = vmatpush1.bf16.msra.mxu0 %v1976_v8  ;;  %s414_s29 = scalar_lea.vmem %s2955_s0, %s1624_s18  ;;  %v1999_v25 = vld [vmem:[%s2585_s11 + $0xb0] ss:$12 sps:$4 sm:$0xff]   ;;  %v462_v30 = vld [vmem:[%s2599_s12] sm:$0x7]  ;;  %v474_v32 = vsub.s32 2, %v465_v28  ;;  %p1651_p2 = scmp.ne.s32.totalorder %s2267_s23, 0 }
  0xae   : > { %625 = vmatprep.subr.bf16.mxu0 %v1978_v9  ;;  %v1998_v18 = vld [vmem:[%s414_s29] sm:$0xff]   ;;  %v2000_v26 = vld [vmem:[%s414_s29 + $0x8] sm:$0xff]   ;;  %v467_v33 = vrot.slane %v462_v30, %v466_v29  ;;  %v471_v34 = vrot.slane %v462_v30, %v470_v31  ;;  %v2292_v60 = vmov (!%p1651_p2), 0.0  }
  0xaf   : > { %1756 = vmatpush3.bf16.msra.mxu1 %v1981_v10  ;;  %1767 = vmatprep.mubr.bf16.mxu1 %v1998_v18  ;;  %v475_v36 = vrot.slane %v462_v30, %v474_v32  ;;  %737 = vst [vmem:[#allocation3] sm:$0xff] (!%p1651_p2), %v2292_v60 }
  0xb0   : > { %1757 = vmatprep.subr.bf16.mxu1 %v1985_v12 }
  0xb1   : > { %626 = vmatpush1.bf16.msra.mxu0 %v1980_v11 }
  0xb2   : > { %627 = vmatprep.subr.bf16.mxu0 %v1982_v13 }
  0xb3   : > { %1758 = vmatpush3.bf16.msra.mxu1 %v1985_v12 }
  0xb4   : > { %1759 = vmatprep.subr.bf16.mxu1 %v1989_v15 }
  0xb5   : > { %628 = vmatpush1.bf16.msra.mxu0 %v1984_v14 }
  0xb6   : > { %629 = vmatprep.subr.bf16.mxu0 %v1986_v16 }
  0xb7   : > { %1760 = vmatpush3.bf16.msra.mxu1 %v1989_v15 }
  0xb8   : > { %1761 = vmatprep.subr.bf16.mxu1 %v1993_v19 }
  0xb9   : > { %630 = vmatpush1.bf16.msra.mxu0 %v1988_v17 }
  0xba   : > { %631 = vmatprep.subr.bf16.mxu0 %v1990_v20 }
  0xbb   : > { %1762 = vmatpush3.bf16.msra.mxu1 %v1993_v19 }
  0xbc   : > { %1763 = vmatprep.subr.bf16.mxu1 %v1997_v22 }
  0xbd   : > { %632 = vmatpush1.bf16.msra.mxu0 %v1992_v21 }
  0xbe   : > { %633 = vmatprep.subr.bf16.mxu0 %v1994_v23 }
  0xbf   : > { %1764 = vmatpush3.bf16.msra.mxu1 %v1997_v22 }
  0xc0   : > { %1765 = vmatprep.subr.bf16.mxu1 %v1999_v25 }
  0xc1   : > { %634 = vmatpush1.bf16.msra.mxu0 %v1996_v24 }
  0xc3   : > { %1766 = vmatpush3.bf16.msra.mxu1 %v1999_v25 }
  0xc4   : > { %652 = vmatmul.mubr.bf16.vlgmr.msra.gmra.mrb[0].mxu0 %v1998_v18 }
  0xc5   : > { %661 = vmatprep.mubr.bf16.mxu0 %v2291_v0 }
  0xc6   : > { %1768 = vmatmul.mubr.bf16.vlgmr.msra.gmra.mrb[0].mxu1 %v2000_v26 }
  0xcc   : > { %662 = vmatmul.mubr.bf16.gmra.mrb[4].mxu0 %v2000_v26 }
 0x197   : > { %v653_v35 = vpop.f32.mrb[0].mxu0 }
 0x198   : > { %v654_v37 = vadd.f32 %v653_v35, %v467_v33  ;;  %v655_v38 = vpop.f32.mrb[1].mxu0 }
 0x199   : > { %v656_v39 = vadd.f32 %v655_v38, %v471_v34  ;;  %v657_v40 = vpop.f32.mrb[2].mxu0  ;;  %v1769_v43 = vpop.f32.mrb[0].mxu1 }
 0x19a   : > { %721 = vst [vmem:[#allocation2] sm:$0xff] %v654_v37  ;;  %v658_v41 = vadd.f32 %v657_v40, %v467_v33  ;;  %v659_v42 = vpop.f32.mrb[3].mxu0  ;;  %v715_v45 = vadd.f32 %v1769_v43, %v475_v36  ;;  %v706_v46 = vpop.f32.mrb[1].mxu1 }
 0x19b   : > { %722 = vst [vmem:[#allocation2 + $0x8] sm:$0xff] %v656_v39  ;;  %v660_v44 = vadd.f32 %v659_v42, %v471_v34  ;;  %v707_v47 = vadd.f32 %v706_v46, %v475_v36  ;;  %v1770_v48 = vpop.f32.mrb[2].mxu1 }
 0x19c   : > { %724 = vst [vmem:[#allocation2 + $0x18] sm:$0xff] %v658_v41  ;;  %729 = vst [vmem:[#allocation2 + $0x40] sm:$0xff] %v715_v45  ;;  %v718_v49 = vadd.f32 %v1770_v48, %v475_v36  ;;  %v709_v50 = vpop.f32.mrb[3].mxu1 }
 0x19d   : > { %725 = vst [vmem:[#allocation2 + $0x20] sm:$0xff] %v660_v44  ;;  %723 = vst [vmem:[#allocation2 + $0x10] sm:$0xff] %v707_v47  ;;  %v710_v51 = vadd.f32 %v709_v50, %v475_v36 }
 0x19e   : > { %732 = vst [vmem:[#allocation2 + $0x58] sm:$0xff] %v718_v49 }
 0x19f   : > { %v663_v52 = vpop.f32.mrb[4].mxu0  ;;  %726 = vst [vmem:[#allocation2 + $0x28] sm:$0xff] %v710_v51  ;;  %736 = sbr.rel (%p1651_p2) target bundleno = 422 (0x1a6), region = 60 }
 0x1a0   : > { %v664_v53 = vadd.f32 %v663_v52, %v467_v33  ;;  %v665_v54 = vpop.f32.mrb[5].mxu0 }
 0x1a1   : > { %v666_v55 = vadd.f32 %v665_v54, %v471_v34  ;;  %v667_v56 = vpop.f32.mrb[6].mxu0 }
 0x1a2   : > { %727 = vst [vmem:[#allocation2 + $0x30] sm:$0xff] %v664_v53  ;;  %v668_v57 = vadd.f32 %v667_v56, %v467_v33  ;;  %v669_v58 = vpop.f32.mrb[7].mxu0 }
 0x1a3   : > { %728 = vst [vmem:[#allocation2 + $0x38] sm:$0xff] %v666_v55  ;;  %v670_v59 = vadd.f32 %v669_v58, %v471_v34 }
 0x1a4   : > { %730 = vst [vmem:[#allocation2 + $0x48] sm:$0xff] %v668_v57 }
 0x1a5   : > { %731 = vst [vmem:[#allocation2 + $0x50] sm:$0xff] %v670_v59 }
 0x1a6 PF: > { %v2651_v61 = vld [vmem:[%s2592_s22 + $0x4] ss:$12 sps:$4 sm:$0xff]   ;;  %941 = vmatprep.mubr.bf16.mxu0 %v2291_v0  ;;  %v2655_v62 = vld [vmem:[%s2592_s22] ss:$12 sps:$4 sm:$0xff]   ;;  %v2293_v63 = vmov 0.0   ;;  %vm2294_vm0 = vmmov 0  }
 0x1a7   : > { %1771 = vmatprep.subr.bf16.mxu1 %v2293_v63  ;;  %1787 = vmatprep.mubr.msk.bf16.mxu1 %vm2294_vm0, %v2293_v63  ;;  %v2662_v1 = vld [vmem:[%s2592_s22 + $0x1c] ss:$12 sps:$4 sm:$0xff]   ;;  %v2666_v2 = vld [vmem:[%s2592_s22 + $0x18] ss:$12 sps:$4 sm:$0xff]   ;;  %v2670_v3 = vld [vmem:[%s2592_s22 + $0x34] ss:$12 sps:$4 sm:$0xff]  }
 0x1a8   : > { %909 = vmatprep.subr.bf16.mxu0 %v2651_v61  ;;  %v2674_v4 = vld [vmem:[%s2592_s22 + $0x30] ss:$12 sps:$4 sm:$0xff]   ;;  %v2678_v5 = vld [vmem:[%s2592_s22 + $0x4c] ss:$12 sps:$4 sm:$0xff]   ;;  %v2681_v6 = vld [vmem:[%s2592_s22 + $0x8] ss:$12 sps:$4 sm:$0xff]  }
 0x1a9   : > { %910 = vmatpush1.bf16.msra.mxu0 %v2655_v62  ;;  %v2685_v7 = vld [vmem:[%s2592_s22 + $0x48] ss:$12 sps:$4 sm:$0xff]   ;;  %1772 = vmatpush3.bf16.msra.mxu1 %v2681_v6  ;;  %v2690_v8 = vld [vmem:[%s2592_s22 + $0x64] ss:$12 sps:$4 sm:$0xff]   ;;  %v2694_v9 = vld [vmem:[%s2592_s22 + $0x20] ss:$12 sps:$4 sm:$0xff]  }
 0x1aa   : > { %911 = vmatprep.subr.bf16.mxu0 %v2662_v1  ;;  %1773 = vmatprep.subr.bf16.mxu1 %v2293_v63  ;;  %v2697_v10 = vld [vmem:[%s2592_s22 + $0x60] ss:$12 sps:$4 sm:$0xff]   ;;  %v2702_v11 = vld [vmem:[%s2592_s22 + $0x38] ss:$12 sps:$4 sm:$0xff]   ;;  %v2706_v12 = vld [vmem:[%s2592_s22 + $0x7c] ss:$12 sps:$4 sm:$0xff]  }
 0x1ab   : > { %v2711_v13 = vld [vmem:[%s2592_s22 + $0x78] ss:$12 sps:$4 sm:$0xff]   ;;  %v2715_v14 = vld [vmem:[%s2592_s22 + $0x50] ss:$12 sps:$4 sm:$0xff]   ;;  %v2719_v15 = vld [vmem:[%s2592_s22 + $0x94] ss:$12 sps:$4 sm:$0xff]  }
 0x1ac   : > { %v2724_v16 = vld [vmem:[%s2592_s22 + $0x90] ss:$12 sps:$4 sm:$0xff]   ;;  %v2728_v17 = vld [vmem:[%s2592_s22 + $0x68] ss:$12 sps:$4 sm:$0xff]   ;;  %v2732_v18 = vld [vmem:[%s2592_s22 + $0xac] ss:$12 sps:$4 sm:$0xff]  }
 0x1ad   : > { %912 = vmatpush1.bf16.msra.mxu0 %v2666_v2  ;;  %1774 = vmatpush3.bf16.msra.mxu1 %v2694_v9  ;;  %v2737_v19 = vld [vmem:[%s2592_s22 + $0xa8] ss:$12 sps:$4 sm:$0xff]   ;;  %v2739_v20 = vld [vmem:[#allocation3] sm:$0xff]  ;;  %v2743_v21 = vld [vmem:[%s2592_s22 + $0x80] ss:$12 sps:$4 sm:$0xff]   ;;  %p771_p6 = scmp.eq.s32.totalorder %s2271_s24, 1 }
 0x1ae   : > { %913 = vmatprep.subr.bf16.mxu0 %v2670_v3  ;;  %1775 = vmatprep.subr.bf16.mxu1 %v2293_v63  ;;  %v780_v22 = vpack.c.bf16 %v2739_v20, %v2739_v20  ;;  %v2752_v23 = vld [vmem:[%s2592_s22 + $0x98] ss:$12 sps:$4 sm:$0xff]   ;;  %v2758_v24 = vld [vmem:[%s2592_s22 + $0xb0] ss:$12 sps:$4 sm:$0xff]   ;;  %p2999_p12 = scmp.ne.s32.totalorder %s2983_s10, 0 }
 0x1af   : > { %s2801_s23 = scalar_select %p771_p6, 3, 0  ;;  %v2806_v42 = vld [vmem:[%s357_s2] ss:$0 sm:$0xff] }
 0x1b0   : > { %s2853_s22 = scalar_select %p771_p6, 2, 1 }
 0x1b1   : > { %914 = vmatpush1.bf16.msra.mxu0 %v2674_v4  ;;  %1776 = vmatpush3.bf16.msra.mxu1 %v2702_v11  ;;  %s1700_s11 = smul.u32 24, %s2801_s23  ;;  %s1680_s7 = sshll.u32 %s2801_s23, 2 }
 0x1b2   : > { %915 = vmatprep.subr.bf16.mxu0 %v2678_v5  ;;  %1777 = vmatprep.subr.bf16.mxu1 %v2293_v63  ;;  %s1021_s30 = scalar_lea.vmem %s2647_s25, %s1680_s7 [#allocation11]  ;;  %s1701_s14 = smul.u32 24, %s2853_s22 }
 0x1b3   : > { %s775_s15 = scalar_lea.vmem [#allocation2], %s1700_s11  ;;  %s1684_s20 = sshll.u32 %s2853_s22, 2 }
 0x1b4   : > { %v776_v25 = vld [vmem:[%s775_s15] sm:$0xff]  ;;  %v777_v28 = vld [vmem:[%s775_s15 + $0x8] sm:$0xff]  ;;  %v778_v46 = vld [vmem:[%s775_s15 + $0x10] sm:$0xff]  ;;  %s1026_s12 = scalar_lea.vmem [#allocation2], %s1701_s14  ;;  %s1138_s2 = scalar_lea.vmem %s2647_s25, %s1684_s20 [#allocation11] }
 0x1b5   : > { %916 = vmatpush1.bf16.msra.mxu0 %v2685_v7  ;;  %1778 = vmatpush3.bf16.msra.mxu1 %v2715_v14  ;;  %v1027_v56 = vld [vmem:[%s1026_s12] sm:$0xff]  ;;  %v1028_v60 = vld [vmem:[%s1026_s12 + $0x8] sm:$0xff]  ;;  %s2899_s28 = scalar_select %p771_p6, 1, 2 }
 0x1b6   : > { %917 = vmatprep.subr.bf16.mxu0 %v2690_v8  ;;  %1779 = vmatprep.subr.bf16.mxu1 %v2293_v63  ;;  %s2908_s5 = scalar_select %p771_p6, 0, 3 }
 0x1b7   : > { %s1702_s6 = smul.u32 24, %s2899_s28  ;;  %s1688_s9 = sshll.u32 %s2899_s28, 2 }
 0x1b8   : > { %s1255_s8 = scalar_lea.vmem %s2647_s25, %s1688_s9 [#allocation11]  ;;  %s1703_s18 = smul.u32 24, %s2908_s5 }
 0x1b9   : > { %918 = vmatpush1.bf16.msra.mxu0 %v2697_v10  ;;  %1780 = vmatpush3.bf16.msra.mxu1 %v2728_v17  ;;  %s1143_s17 = scalar_lea.vmem [#allocation2], %s1702_s6  ;;  %s1692_s19 = sshll.u32 %s2908_s5, 2 }
 0x1ba   : > { %919 = vmatprep.subr.bf16.mxu0 %v2706_v12  ;;  %1781 = vmatprep.subr.bf16.mxu1 %v2293_v63  ;;  %s1260_s16 = scalar_lea.vmem [#allocation2], %s1703_s18  ;;  %s1372_s29 = scalar_lea.vmem %s2647_s25, %s1692_s19 [#allocation11] }
 0x1bb   : > { %s1704_s23 = sshll.u32 (%p2999_p12), %s2614_s13, 3  ;;  %s3000_s22 = sld [smem:[#allocation23_spill]] (%p2999_p12) }
 0x1bc   : > { %s1387_s11 = sadd.s32 (%p2999_p12), %s2271_s24, %s1704_s23 }
 0x1bd   : > { %920 = vmatpush1.bf16.msra.mxu0 %v2711_v13  ;;  %1782 = vmatpush3.bf16.msra.mxu1 %v2743_v21  ;;  %s1697_s15 = sshll.u32 (%p2999_p12), %s1387_s11, 2 }
 0x1be   : > { %921 = vmatprep.subr.bf16.mxu0 %v2719_v15  ;;  %1783 = vmatprep.subr.bf16.mxu1 %v2293_v63 }
 0x1c1   : > { %922 = vmatpush1.bf16.msra.mxu0 %v2724_v16  ;;  %1784 = vmatpush3.bf16.msra.mxu1 %v2752_v23  ;;  %s1389_s14 = scalar_lea.vmem (%p2999_p12), %s3000_s22, %s1697_s15 }
 0x1c2   : > { %923 = vmatprep.subr.bf16.mxu0 %v2732_v18  ;;  %1785 = vmatprep.subr.bf16.mxu1 %v2293_v63 }
 0x1c5   : > { %924 = vmatpush1.bf16.msra.mxu0 %v2737_v19  ;;  %1786 = vmatpush3.bf16.msra.mxu1 %v2758_v24 }
 0x1c6   : > { %1032 = vmatprep.subr.bf16.mxu0 %v2651_v61  ;;  %1791 = vmatprep.subr.bf16.mxu1 %v2293_v63 }
 0x1c8   : > { %942 = vmatmul.mubr.bf16.vlgmr.msra.gmra.mrb[8].mxu0 %v780_v22  ;;  %1788 = vmatmul.mubr.bf16.vlgmr.msra.gmra.mrb[4].mxu1 %v780_v22 }
 0x1c9   : > { %1033 = vmatpush1.bf16.msra.mxu0 %v2655_v62  ;;  %1064 = vmatprep.mubr.bf16.mxu0 %v2291_v0 }
 0x1ca   : > { %1034 = vmatprep.subr.bf16.mxu0 %v2662_v1  ;;  %1792 = vmatpush3.bf16.msra.mxu1 %v2681_v6 }
 0x1cb   : > { %1793 = vmatprep.subr.bf16.mxu1 %v2293_v63  ;;  %1807 = vmatprep.mubr.msk.bf16.mxu1 %vm2294_vm0, %v2293_v63 }
 0x1cd   : > { %1035 = vmatpush1.bf16.msra.mxu0 %v2666_v2 }
 0x1ce   : > { %1036 = vmatprep.subr.bf16.mxu0 %v2670_v3  ;;  %1794 = vmatpush3.bf16.msra.mxu1 %v2694_v9 }
 0x1cf   : > { %1795 = vmatprep.subr.bf16.mxu1 %v2293_v63 }
 0x1d1   : > { %1037 = vmatpush1.bf16.msra.mxu0 %v2674_v4 }
 0x1d2   : > { %1038 = vmatprep.subr.bf16.mxu0 %v2678_v5  ;;  %1796 = vmatpush3.bf16.msra.mxu1 %v2702_v11 }
 0x1d3   : > { %1797 = vmatprep.subr.bf16.mxu1 %v2293_v63 }
 0x1d5   : > { %1039 = vmatpush1.bf16.msra.mxu0 %v2685_v7 }
 0x1d6   : > { %1040 = vmatprep.subr.bf16.mxu0 %v2690_v8  ;;  %1798 = vmatpush3.bf16.msra.mxu1 %v2715_v14 }
 0x1d7   : > { %1799 = vmatprep.subr.bf16.mxu1 %v2293_v63 }
 0x1d9   : > { %1041 = vmatpush1.bf16.msra.mxu0 %v2697_v10 }
 0x1da   : > { %1042 = vmatprep.subr.bf16.mxu0 %v2706_v12  ;;  %1800 = vmatpush3.bf16.msra.mxu1 %v2728_v17 }
 0x1db   : > { %1801 = vmatprep.subr.bf16.mxu1 %v2293_v63 }
 0x1dd   : > { %1043 = vmatpush1.bf16.msra.mxu0 %v2711_v13 }
 0x1de   : > { %1044 = vmatprep.subr.bf16.mxu0 %v2719_v15  ;;  %1802 = vmatpush3.bf16.msra.mxu1 %v2743_v21 }
 0x1df   : > { %1803 = vmatprep.subr.bf16.mxu1 %v2293_v63 }
 0x1e1   : > { %1045 = vmatpush1.bf16.msra.mxu0 %v2724_v16 }
 0x1e2   : > { %1046 = vmatprep.subr.bf16.mxu0 %v2732_v18  ;;  %1804 = vmatpush3.bf16.msra.mxu1 %v2752_v23 }
 0x1e3   : > { %1805 = vmatprep.subr.bf16.mxu1 %v2293_v63 }
 0x1e5   : > { %1047 = vmatpush1.bf16.msra.mxu0 %v2737_v19 }
 0x1e6   : > { %1149 = vmatprep.subr.bf16.mxu0 %v2651_v61  ;;  %1806 = vmatpush3.bf16.msra.mxu1 %v2758_v24 }
 0x1e7   : > { %1811 = vmatprep.subr.bf16.mxu1 %v2293_v63 }
 0x29b   : > { %v943_v26 = vpop.f32.mrb[8].mxu0  ;;  %v984_v35 = vpop.f32.mrb[4].mxu1 }
 0x29c   : > { %v990_v27 = vadd.f32 %v943_v26, %v776_v25  ;;  %v945_v29 = vpop.f32.mrb[9].mxu0  ;;  %v1789_v36 = vpop.f32.mrb[5].mxu1  ;;  %v1010_v44 = vadd.f32 %v2806_v42, %v984_v35 }
 0x29d   : > { %v947_v30 = vpop.f32.mrb[10].mxu0  ;;  %v997_v33 = vadd.f32 %v945_v29, %v777_v28  ;;  %v987_v37 = vpop.f32.mrb[6].mxu1 }
 0x29e   : > { %v1677_v31 = vmul.f32 -1.442695, %v990_v27  ;;  %v948_v32 = vpop.f32.mrb[11].mxu0  ;;  %v1790_v38 = vpop.f32.mrb[7].mxu1  ;;  %v1029_v37 = vld [vmem:[%s1026_s12 + $0x10] sm:$0xff] }
 0x29f   : > { %v1678_v34 = vmul.f32 -1.442695, %v997_v33 }
 0x2a0   : > { %2033 = vpow2.f32 %v1677_v31 }
 0x2a1   : > { %2035 = vpow2.f32 %v1678_v34 }
 0x2aa   : > { %v2034_v39 = vpop.eup %2033 }
 0x2ab   : > { %v994_v40 = vadd.f32 1.0, %v2034_v39  ;;  %v2036_v41 = vpop.eup %2035 }
 0x2ac   : > { %v1001_v43 = vadd.f32 1.0, %v2036_v41 }
 0x2ad   : > { %2037 = vrcp.f32 %v994_v40 }
 0x2ae   : > { %2039 = vrcp.f32 %v1001_v43 }
 0x2b7   : > { %v2038_v45 = vpop.eup %2037 }
 0x2b8   : > { %v1011_v47 = vmul.f32 %v2038_v45, %v1010_v44  ;;  %v2040_v49 = vpop.eup %2039 }
 0x2b9   : > { %v1014_v50 = vsub.f32 1.0, %v2040_v49  ;;  %v1016_v52 = vmul.f32 %v2040_v49, %v2739_v20 }
 0x2ba   : > { %v1012_v48 = vadd.f32 %v1011_v47, %v778_v46 }
 0x2bc   : > { %2041 = vtanh.f32 %v1012_v48 }
 0x2c6   : > { %v2042_v51 = vpop.eup %2041 }
 0x2c7   : > { %v1015_v53 = vmul.f32 %v2042_v51, %v1014_v50 }
 0x2c9   : > { %v2811_v54 = vadd.f32 %v1016_v52, %v1015_v53  ;;  %v1261_v53 = vld [vmem:[%s1260_s16] sm:$0xff] }
 0x2cb   : > { %v1019_v55 = vpack.c.bf16 %v2811_v54, %v2811_v54 }
 0x2cd   : > { %1022 = vst [vmem:[%s1021_s30] sm:$0xf] %v1019_v55  ;;  %1065 = vmatmul.mubr.bf16.vlgmr.msra.gmra.mrb[12].mxu0 %v1019_v55  ;;  %1808 = vmatmul.mubr.bf16.vlgmr.msra.gmra.mrb[8].mxu1 %v1019_v55 }
 0x2ce   : > { %1150 = vmatpush1.bf16.msra.mxu0 %v2655_v62  ;;  %1812 = vmatpush3.bf16.msra.mxu1 %v2681_v6 }
 0x2cf   : > { %1151 = vmatprep.subr.bf16.mxu0 %v2662_v1  ;;  %1813 = vmatprep.subr.bf16.mxu1 %v2293_v63 }
 0x2d0   : > { %1181 = vmatprep.mubr.bf16.mxu0 %v2291_v0  ;;  %1827 = vmatprep.mubr.msk.bf16.mxu1 %vm2294_vm0, %v2293_v63 }
 0x2d2   : > { %1152 = vmatpush1.bf16.msra.mxu0 %v2666_v2  ;;  %1814 = vmatpush3.bf16.msra.mxu1 %v2694_v9 }
 0x2d3   : > { %1153 = vmatprep.subr.bf16.mxu0 %v2670_v3  ;;  %1815 = vmatprep.subr.bf16.mxu1 %v2293_v63 }
 0x2d6   : > { %1154 = vmatpush1.bf16.msra.mxu0 %v2674_v4  ;;  %1816 = vmatpush3.bf16.msra.mxu1 %v2702_v11 }
 0x2d7   : > { %1155 = vmatprep.subr.bf16.mxu0 %v2678_v5  ;;  %1817 = vmatprep.subr.bf16.mxu1 %v2293_v63 }
 0x2da   : > { %1156 = vmatpush1.bf16.msra.mxu0 %v2685_v7  ;;  %1818 = vmatpush3.bf16.msra.mxu1 %v2715_v14 }
 0x2db   : > { %1157 = vmatprep.subr.bf16.mxu0 %v2690_v8  ;;  %1819 = vmatprep.subr.bf16.mxu1 %v2293_v63 }
 0x2de   : > { %1158 = vmatpush1.bf16.msra.mxu0 %v2697_v10  ;;  %1820 = vmatpush3.bf16.msra.mxu1 %v2728_v17 }
 0x2df   : > { %1159 = vmatprep.subr.bf16.mxu0 %v2706_v12  ;;  %1821 = vmatprep.subr.bf16.mxu1 %v2293_v63 }
 0x2e2   : > { %1160 = vmatpush1.bf16.msra.mxu0 %v2711_v13  ;;  %1822 = vmatpush3.bf16.msra.mxu1 %v2743_v21 }
 0x2e3   : > { %1161 = vmatprep.subr.bf16.mxu0 %v2719_v15  ;;  %1823 = vmatprep.subr.bf16.mxu1 %v2293_v63 }
 0x2e6   : > { %1162 = vmatpush1.bf16.msra.mxu0 %v2724_v16  ;;  %1824 = vmatpush3.bf16.msra.mxu1 %v2752_v23 }
 0x2e7   : > { %1163 = vmatprep.subr.bf16.mxu0 %v2732_v18  ;;  %1825 = vmatprep.subr.bf16.mxu1 %v2293_v63 }
 0x2ea   : > { %1164 = vmatpush1.bf16.msra.mxu0 %v2737_v19  ;;  %1826 = vmatpush3.bf16.msra.mxu1 %v2758_v24 }
 0x2eb   : > { %1266 = vmatprep.subr.bf16.mxu0 %v2651_v61  ;;  %1831 = vmatprep.subr.bf16.mxu1 %v2293_v63 }
 0x3a0   : > { %v1066_v57 = vpop.f32.mrb[12].mxu0  ;;  %v1107_v58 = vpop.f32.mrb[8].mxu1 }
 0x3a1   : > { %v1113_v59 = vadd.f32 %v1066_v57, %v1027_v56  ;;  %v1068_v20 = vpop.f32.mrb[13].mxu0  ;;  %v1809_v22 = vpop.f32.mrb[9].mxu1  ;;  %v1127_v35 = vadd.f32 %v2806_v42, %v1107_v58  ;;  %v1262_v57 = vld [vmem:[%s1260_s16 + $0x8] sm:$0xff] }
 0x3a2   : > { %v1070_v25 = vpop.f32.mrb[14].mxu0  ;;  %v1110_v26 = vpop.f32.mrb[10].mxu1  ;;  %v1120_v29 = vadd.f32 %v1068_v20, %v1028_v60 }
 0x3a3   : > { %v1682_v27 = vmul.f32 -1.442695, %v1113_v59  ;;  %v1071_v28 = vpop.f32.mrb[15].mxu0  ;;  %v1810_v61 = vpop.f32.mrb[11].mxu1 }
 0x3a4   : > { %v1683_v30 = vmul.f32 -1.442695, %v1120_v29 }
 0x3a5   : > { %2043 = vpow2.f32 %v1682_v27 }
 0x3a6   : > { %2045 = vpow2.f32 %v1683_v30 }
 0x3af   : > { %v2044_v31 = vpop.eup %2043 }
 0x3b0   : > { %v1117_v32 = vadd.f32 1.0, %v2044_v31  ;;  %v2046_v33 = vpop.eup %2045 }
 0x3b1   : > { %v1124_v34 = vadd.f32 1.0, %v2046_v33 }
 0x3b2   : > { %2047 = vrcp.f32 %v1117_v32 }
 0x3b3   : > { %2049 = vrcp.f32 %v1124_v34  ;;  %v1263_v34 = vld [vmem:[%s1260_s16 + $0x10] sm:$0xff] }
 0x3bc   : > { %v2048_v36 = vpop.eup %2047 }
 0x3bd   : > { %v1128_v38 = vmul.f32 %v2048_v36, %v1127_v35  ;;  %v2050_v40 = vpop.eup %2049 }
 0x3be   : > { %v1131_v41 = vsub.f32 1.0, %v2050_v40  ;;  %v1133_v45 = vmul.f32 %v2050_v40, %v2811_v54 }
 0x3bf   : > { %v1129_v39 = vadd.f32 %v1128_v38, %v1029_v37 }
 0x3c1   : > { %2051 = vtanh.f32 %v1129_v39 }
 0x3cb   : > { %v2052_v43 = vpop.eup %2051 }
 0x3cc   : > { %v1132_v44 = vmul.f32 %v2052_v43, %v1131_v41 }
 0x3ce   : > { %v2859_v46 = vadd.f32 %v1133_v45, %v1132_v44 }
 0x3d0   : > { %v1136_v47 = vpack.c.bf16 %v2859_v46, %v2859_v46 }
 0x3d2   : > { %1139 = vst [vmem:[%s1138_s2] sm:$0xf] %v1136_v47  ;;  %1182 = vmatmul.mubr.bf16.vlgmr.msra.gmra.mrb[16].mxu0 %v1136_v47  ;;  %1828 = vmatmul.mubr.bf16.vlgmr.msra.gmra.mrb[12].mxu1 %v1136_v47 }
 0x3d3   : > { %1267 = vmatpush1.bf16.msra.mxu0 %v2655_v62  ;;  %1832 = vmatpush3.bf16.msra.mxu1 %v2681_v6 }
 0x3d4   : > { %1268 = vmatprep.subr.bf16.mxu0 %v2662_v1  ;;  %1833 = vmatprep.subr.bf16.mxu1 %v2293_v63 }
 0x3d5   : > { %1298 = vmatprep.mubr.bf16.mxu0 %v2291_v0  ;;  %1847 = vmatprep.mubr.msk.bf16.mxu1 %vm2294_vm0, %v2293_v63  ;;  %v1144_v0 = vld [vmem:[%s1143_s17] sm:$0xff] }
 0x3d7   : > { %1269 = vmatpush1.bf16.msra.mxu0 %v2666_v2  ;;  %1834 = vmatpush3.bf16.msra.mxu1 %v2694_v9 }
 0x3d8   : > { %1270 = vmatprep.subr.bf16.mxu0 %v2670_v3  ;;  %1835 = vmatprep.subr.bf16.mxu1 %v2293_v63  ;;  %v1145_v3 = vld [vmem:[%s1143_s17 + $0x8] sm:$0xff] }
 0x3db   : > { %1271 = vmatpush1.bf16.msra.mxu0 %v2674_v4  ;;  %1836 = vmatpush3.bf16.msra.mxu1 %v2702_v11 }
 0x3dc   : > { %1272 = vmatprep.subr.bf16.mxu0 %v2678_v5  ;;  %1837 = vmatprep.subr.bf16.mxu1 %v2293_v63 }
 0x3df   : > { %1273 = vmatpush1.bf16.msra.mxu0 %v2685_v7  ;;  %1838 = vmatpush3.bf16.msra.mxu1 %v2715_v14 }
 0x3e0   : > { %1274 = vmatprep.subr.bf16.mxu0 %v2690_v8  ;;  %1839 = vmatprep.subr.bf16.mxu1 %v2293_v63 }
 0x3e3   : > { %1275 = vmatpush1.bf16.msra.mxu0 %v2697_v10  ;;  %1840 = vmatpush3.bf16.msra.mxu1 %v2728_v17 }
 0x3e4   : > { %1276 = vmatprep.subr.bf16.mxu0 %v2706_v12  ;;  %1841 = vmatprep.subr.bf16.mxu1 %v2293_v63 }
 0x3e7   : > { %1277 = vmatpush1.bf16.msra.mxu0 %v2711_v13  ;;  %1842 = vmatpush3.bf16.msra.mxu1 %v2743_v21 }
 0x3e8   : > { %1278 = vmatprep.subr.bf16.mxu0 %v2719_v15  ;;  %1843 = vmatprep.subr.bf16.mxu1 %v2293_v63 }
 0x3eb   : > { %1279 = vmatpush1.bf16.msra.mxu0 %v2724_v16  ;;  %1844 = vmatpush3.bf16.msra.mxu1 %v2752_v23 }
 0x3ec   : > { %1280 = vmatprep.subr.bf16.mxu0 %v2732_v18  ;;  %1845 = vmatprep.subr.bf16.mxu1 %v2293_v63  ;;  %v1146_v18 = vld [vmem:[%s1143_s17 + $0x10] sm:$0xff] }
 0x3ef   : > { %1281 = vmatpush1.bf16.msra.mxu0 %v2737_v19  ;;  %1846 = vmatpush3.bf16.msra.mxu1 %v2758_v24 }
 0x4a5   : > { %v1183_v62 = vpop.f32.mrb[16].mxu0  ;;  %v1224_v1 = vpop.f32.mrb[12].mxu1 }
 0x4a6   : > { %v1230_v2 = vadd.f32 %v1183_v62, %v1144_v0  ;;  %v1185_v4 = vpop.f32.mrb[17].mxu0  ;;  %v1829_v5 = vpop.f32.mrb[13].mxu1  ;;  %v1244_v16 = vadd.f32 %v2806_v42, %v1224_v1 }
 0x4a7   : > { %v1187_v6 = vpop.f32.mrb[18].mxu0  ;;  %v1227_v7 = vpop.f32.mrb[14].mxu1  ;;  %v1237_v10 = vadd.f32 %v1185_v4, %v1145_v3 }
 0x4a8   : > { %v1686_v63 = vmul.f32 -1.442695, %v1230_v2  ;;  %v1188_v8 = vpop.f32.mrb[19].mxu0  ;;  %v1830_v9 = vpop.f32.mrb[15].mxu1 }
 0x4a9   : > { %v1687_v11 = vmul.f32 -1.442695, %v1237_v10 }
 0x4aa   : > { %2053 = vpow2.f32 %v1686_v63 }
 0x4ab   : > { %2055 = vpow2.f32 %v1687_v11 }
 0x4b4   : > { %v2054_v12 = vpop.eup %2053 }
 0x4b5   : > { %v1234_v13 = vadd.f32 1.0, %v2054_v12  ;;  %v2056_v14 = vpop.eup %2055 }
 0x4b6   : > { %v1241_v15 = vadd.f32 1.0, %v2056_v14 }
 0x4b7   : > { %2057 = vrcp.f32 %v1234_v13 }
 0x4b8   : > { %2059 = vrcp.f32 %v1241_v15 }
 0x4c1   : > { %v2058_v17 = vpop.eup %2057 }
 0x4c2   : > { %v1245_v19 = vmul.f32 %v2058_v17, %v1244_v16  ;;  %v2060_v23 = vpop.eup %2059 }
 0x4c3   : > { %v1248_v24 = vsub.f32 1.0, %v2060_v23  ;;  %v1250_v50 = vmul.f32 %v2060_v23, %v2859_v46 }
 0x4c4   : > { %v1246_v21 = vadd.f32 %v1245_v19, %v1146_v18 }
 0x4c6   : > { %2061 = vtanh.f32 %v1246_v21 }
 0x4d0   : > { %v2062_v48 = vpop.eup %2061 }
 0x4d1   : > { %v1249_v49 = vmul.f32 %v2062_v48, %v1248_v24 }
 0x4d3   : > { %v1251_v51 = vadd.f32 %v1250_v50, %v1249_v49 }
 0x4d5   : > { %v1253_v52 = vpack.c.bf16 %v1251_v51, %v1251_v51 }
 0x4d7   : > { %1256 = vst [vmem:[%s1255_s8] sm:$0xf] %v1253_v52  ;;  %1299 = vmatmul.mubr.bf16.vlgmr.msra.gmra.mrb[20].mxu0 %v1253_v52  ;;  %1848 = vmatmul.mubr.bf16.vlgmr.msra.gmra.mrb[16].mxu1 %v1253_v52 }
 0x5aa   : > { %v1300_v54 = vpop.f32.mrb[20].mxu0  ;;  %v1341_v55 = vpop.f32.mrb[16].mxu1 }
 0x5ab   : > { %v1347_v56 = vadd.f32 %v1300_v54, %v1261_v53  ;;  %v1302_v58 = vpop.f32.mrb[21].mxu0  ;;  %v1849_v59 = vpop.f32.mrb[17].mxu1  ;;  %v1361_v32 = vadd.f32 %v2806_v42, %v1341_v55 }
 0x5ac   : > { %v1304_v60 = vpop.f32.mrb[22].mxu0  ;;  %v1344_v20 = vpop.f32.mrb[18].mxu1  ;;  %v1354_v27 = vadd.f32 %v1302_v58, %v1262_v57 }
 0x5ad   : > { %v1690_v22 = vmul.f32 -1.442695, %v1347_v56  ;;  %v1305_v25 = vpop.f32.mrb[23].mxu0  ;;  %v1850_v26 = vpop.f32.mrb[19].mxu1 }
 0x5ae   : > { %v1691_v28 = vmul.f32 -1.442695, %v1354_v27 }
 0x5af   : > { %2063 = vpow2.f32 %v1690_v22 }
 0x5b0   : > { %2065 = vpow2.f32 %v1691_v28 }
 0x5b9   : > { %v2064_v61 = vpop.eup %2063 }
 0x5ba   : > { %v1351_v29 = vadd.f32 1.0, %v2064_v61  ;;  %v2066_v30 = vpop.eup %2065 }
 0x5bb   : > { %v1358_v31 = vadd.f32 1.0, %v2066_v30 }
 0x5bc   : > { %2067 = vrcp.f32 %v1351_v29 }
 0x5bd   : > { %2069 = vrcp.f32 %v1358_v31 }
 0x5c6   : > { %v2068_v33 = vpop.eup %2067 }
 0x5c7   : > { %v1362_v35 = vmul.f32 %v2068_v33, %v1361_v32  ;;  %v2070_v37 = vpop.eup %2069 }
 0x5c8   : > { %v1365_v38 = vsub.f32 1.0, %v2070_v37  ;;  %v1367_v41 = vmul.f32 %v2070_v37, %v1251_v51 }
 0x5c9   : > { %v1363_v36 = vadd.f32 %v1362_v35, %v1263_v34 }
 0x5cb   : > { %2071 = vtanh.f32 %v1363_v36 }
 0x5d5   : > { %v2072_v39 = vpop.eup %2071 }
 0x5d6   : > { %v1366_v40 = vmul.f32 %v2072_v39, %v1365_v38  ;;  %1380 = sbr.rel (!%p2999_p12) target bundleno = 1510 (0x5e6), region = 64 }
 0x5d8   : > { %v1368_v43 = vadd.f32 %v1367_v41, %v1366_v40 }
 0x5da   : > { %1369 = vst [vmem:[#allocation3] sm:$0xff] %v1368_v43  ;;  %v1370_v44 = vpack.c.bf16 %v1368_v43, %v1368_v43 }
 0x5dc   : > { %1373 = vst [vmem:[%s1372_s29] sm:$0xf] %v1370_v44 }
 0x5e3   : > { %v1405_v42 = vld [vmem:[%s2647_s25] sm:$0xf]  ;;  %v1407_v45 = vld [vmem:[%s2647_s25 + $0x4] sm:$0xf]  ;;  %v1409_v46 = vld [vmem:[%s2647_s25 + $0x8] sm:$0xf] }
 0x5e4   : > { %v1411_v47 = vld [vmem:[%s2647_s25 + $0xc] sm:$0xf]  ;;  %1406 = vst [vmem:[%s1389_s14] sm:$0xf] %v1405_v42  ;;  %1408 = vst [vmem:[%s1389_s14 + $0x8] sm:$0xf] %v1407_v45 }
 0x5e5   : > { %1410 = vst [vmem:[%s1389_s14 + $0x10] sm:$0xf] %v1409_v46  ;;  %1412 = vst [vmem:[%s1389_s14 + $0x18] sm:$0xf] %v1411_v47 }
 0x5e6 PF: > { %s24_s27 = sadd.s32 1, %s2283_s27   ;;  %s3001_s18 = sld [smem:[#allocation15_spill]] }
 0x5e7   : > { %p21_p13 = scmp.ge.s32.totalorder %s24_s27, 6   ;;  %s3002_s19 = sld [smem:[#allocation21_spill]] }
 0x5e8   : > { %s3003_s24 = sld [smem:[#allocation16_spill]]  ;;  %s3004_s22 = sld [smem:[#allocation20_spill]] }
 0x5e9   : > { %s3005_s23 = sld [smem:[#allocation17_spill]]  ;;  %s3006_s25 = sld [smem:[#allocation18_spill]] }
 0x5ea   : > { %s3007_s10 = sld [smem:[#allocation19_spill]]  ;;  %s3008_s20 = smov %s2259_s21 }
 0x5eb   :  { %23 = sbr.rel (!%p21_p13) target bundleno = 13 (0xd), region = 173 }
 0x5ee   : > { %s3009_s21 = smov %s3003_s24  ;;  %s3010_s24 = smov %s2279_s26 }
 0x5f0   : > { %s3011_s26 = smov %s3007_s10 }
 0x5f2   :  { %1453 = vsyncpa [#allocation5], 1 }
 0x5f3   :  { %1455 = vsyncpa [#allocation5 + $0x1], 1 }
 0x5f4   :  { %1456 = vsyncpa [#allocation7], 1 }
 0x5f5   :  { %1458 = vsyncpa [#allocation7 + $0x1], 1 }
 0x5f6   :  { %1459 = vsyncpa [#allocation10], 1 }
 0x5f7   :  { %1461 = vsyncpa [#allocation10 + $0x1], 1 }

// kernel: rnn_forward.3
= control target key start
LH: loop header
LB: loop body
LE: loop exit
PB: predicated region body
PF: predicated region fallthrough
CT: control target
= control target key end

     0   :  { %s2996_s0 = inlined_call_operand.vmem [shape: bf16[8,8,256], index: 0, kind: input, shape index: {}]   ;;  %s2997_s1 = inlined_call_operand.vmem [shape: bf16[2,256,384], index: 1, kind: input, shape index: {}]   ;;  %s2998_s2 = inlined_call_operand.vmem [shape: bf16[2,128,384], index: 2, kind: input, shape index: {}]   ;;  %s2999_s3 = inlined_call_operand.hbm [shape: f32[2,1,384], index: 3, kind: input, shape index: {}]   ;;  %s3000_s4 = inlined_call_operand.hbm [shape: f32[2,1,128], index: 4, kind: input, shape index: {}]   ;;  %s3001_s5 = inlined_call_operand.vmem [shape: bf16[8,8,256], index: 5, kind: output, shape index: {}]  }
   0x1   :  { %3004 = sst [smem:[#allocation12_spill]] %s2996_s0 }
   0x2   :  { %3005 = sst [smem:[#allocation13_spill]] %s3001_s5 }
   0x3   :  { %10 = vsyncpa [#allocation5], 0 }
   0x4   :  { %12 = vsyncpa [#allocation5 + $0x1], 0 }
   0x5   :  { %13 = vsyncpa [#allocation7], 0 }
   0x6   :  { %15 = vsyncpa [#allocation7 + $0x1], 0  ;;  %s2419_s18 = smov 0   ;;  %s2421_s19 = smov 0  }
   0x7   :  { %s2423_s20 = smov 0   ;;  %s2425_s21 = smov 0  }
   0x8   :  { %s2427_s22 = smov 0   ;;  %s2429_s23 = smov 0  }
   0x9   :  { %s2431_s24 = smov 0   ;;  %s2433_s25 = smov 0  }
   0xa   :  { %s2435_s26 = smov 0   ;;  %s2437_s27 = smov 0  }
   0xb LB: > { %s1723_s28 = sadd.s32 4294967295, %s2381_s27   ;;  %s30_s29 = sadd.s32 1, %s2373_s25  ;;  %s2381_s27 = sphi %s2437_s27, %s21_s27   ;;  %s2377_s26 = sphi %s2435_s26, %s3028_s26   ;;  %s2373_s25 = sphi %s2433_s25, %s3027_s25   ;;  %s2369_s24 = sphi %s2431_s24, %s3026_s24   ;;  %s2365_s23 = sphi %s2429_s23, %s3025_s23   ;;  %s2361_s22 = sphi %s2427_s22, %s3024_s22   ;;  %s2357_s21 = sphi %s2425_s21, %s3023_s21   ;;  %s2353_s20 = sphi %s2423_s20, %s3022_s20   ;;  %s2349_s19 = sphi %s2421_s19, %s3021_s19   ;;  %s2345_s18 = sphi %s2419_s18, %s3020_s18  }
   0xc   : > { %p31_p0 = scmp.ge.s32.totalorder %s30_s29, 2  ;;  %s33_s30 = sadd.s32 1, %s2377_s26 }
   0xd   : > { %s126_s6 = sadd.s32 1, %s2361_s22  ;;  %p133_p1 = scmp.ne.s32.totalorder %s2361_s22, %s2357_s21 }
   0xe   : > { %s3030_s29 = smov (%p31_p0, %s30_s29), 0  ;;  %s3032_s30 = smov (!%p31_p0, %s33_s30), %s2377_s26 }
   0xf   : > { %p134_p2 = scmp.eq.s32.totalorder %s2381_s27, 0  ;;  %p139_p3 = scmp.ne.s32.totalorder %s2357_s21, %s2353_s20 }
  0x10   : > { %p35_p4 = scmp.ge.s32.totalorder %s3032_s30, 2  ;;  %p140_p5 = scmp.eq.s32.totalorder %s1723_s28, 0 }
  0x11   : > { %p2478_p6 = por %p134_p2, %p133_p1  ;;  %s1727_s8 = sshll.u32 %s2373_s25, 1 }
  0x12   : > { %s3034_s30 = smov (%p35_p4, %s3032_s30), 0  ;;  %p2485_p7 = por %p140_p5, %p139_p3 }
  0x13   : > { %3007 = sst [smem:[#allocation11_spill]] %s3034_s30  ;;  %s176_s10 = ssub.s32 1, %s1727_s8 }
  0x14   : > { %s3008_s9 = scalar_select %p2485_p7, 1, 0 }
  0x15   : > { %s123_s11 = ssub.s32 %s2377_s26, %s3034_s30  ;;  %s177_s12 = smul.u32 %s2377_s26, %s176_s10 }
  0x16   : > { %p124_p8 = scmp.eq.s32.totalorder %s123_s11, 0  ;;  %s1728_s13 = sshll.u32 %s3030_s29, 1 }
  0x17   : > { %s178_s14 = sadd.s32 %s2373_s25, %s177_s12  ;;  %s180_s15 = ssub.s32 1, %s1728_s13 }
  0x18   : > { %s2495_s16 = scalar_select %p124_p8, %s2361_s22, %s126_s6  }
  0x19   : > { %s181_s17 = smul.u32 %s180_s15, %s3034_s30  ;;  %s188_s20 = sadd.s32 1, %s2349_s19 }
  0x1a   : > { %p198_p9 = scmp.ne.s32.totalorder %s2349_s19, %s2345_s18  ;;  %p199_p10 = scmp.eq.s32.totalorder %s1723_s28, 3 }
  0x1b   : > { %s182_s5 = sadd.s32 %s181_s17, %s3030_s29  ;;  %p2008_p12 = scmp.lt.s32.totalorder %s2381_s27, 4 }
  0x1c   : > { %s183_s8 = ssub.s32 %s178_s14, %s182_s5  ;;  %p2502_p11 = por %p199_p10, %p198_p9 }
  0x1d   : > { %s185_s10 = sor.u32 %s183_s8, %s123_s11  ;;  %s2508_s12 = sand.u32 1, %s2361_s22  }
  0x1e   : > { %s3009_s0 = scalar_select %p2502_p11, 1, 0 }
  0x1f   : > { %p186_p13 = scmp.eq.s32.totalorder %s185_s10, 0  ;;  %s1992_s6 = smul.u32 3, %s2508_s12 }
  0x20   : > { %s1993_s15 = smul.u32 48, %s2377_s26  ;;  %p2517_p0 = pnand %p2008_p12, %p2478_p6 }
  0x21   : > { %s2512_s13 = scalar_select %p186_p13, %s2349_s19, %s188_s20  }
  0x22   : > { %s263_s30 = scalar_lea.vmem [#allocation4], %s1992_s6  ;;  %s2524_s11 = scalar_lea.hbm %s2999_s3, %s1993_s15 }
  0x23   : > { %s271_s28 = sshll.u32 %s263_s30, 4  ;;  %s260_s30 = scalar_lea.sflag [#allocation5], %s2508_s12  ;;  %s2526_s28 = int_to_ptr.vmem [resolvable:$true] %s271_s28 }
  0x24   : > { %s2235_s7 = scalar_lea.hbm %s2524_s11, 48  ;;  %p2237_p3 = pneg %p2517_p0 }
  0x25   : > { %p2236_p2 = scmp.ne.s32.totalorder %s2524_s11, %s2235_s7  ;;  %s2240_s10 = scalar_lea.hbm %s2999_s3, 96 }
  0x26   : > { %p2241_p6 = scmp.lt.u32.totalorder %s2524_s11, %s2999_s3  ;;  %p2242_p8 = scmp.lt.u32.totalorder %s2240_s10, %s2235_s7 }
  0x27   : > { %p2238_p4 = pnand %p2237_p3, %p2236_p2  ;;  %p2244_p10 = scmp.lt.u32.totalorder %s2235_s7, %s2524_s11 }
  0x28   : > { %p2243_p9 = por %p2242_p8, %p2241_p6 }
  0x29   : > { %p2239_p5 = pneg %p2238_p4 }
  0x2a   : > { %p2245_p12 = por %p2244_p10, %p2243_p9 }
  0x2c   : > { %p2246_p13 = pnand %p2245_p12, %p2239_p5 }
  0x2e   : > { %2249 = shalt.err (!%p2246_p13)
}
  0x2f   : > { %s2250_s14 = scalar_lea.vmem %s2526_s28, 48  ;;  %s2383_s17 = smov [#allocation4]  }
  0x30   : > { %p2251_p2 = scmp.ne.s32.totalorder %s2526_s28, %s2250_s14  ;;  %s2255_s20 = sshll.u32 %s2383_s17, 4  ;;  %s2256_s20 = int_to_ptr.vmem [resolvable:$false] %s2255_s20 }
  0x31   : > { %s2257_s8 = scalar_lea.vmem %s2256_s20, 96  ;;  %p2258_p11 = scmp.lt.s32.totalorder %s2526_s28, %s2256_s20 }
  0x32   : > { %p2253_p4 = pnand %p2251_p2, %p2237_p3  ;;  %p2259_p6 = scmp.lt.s32.totalorder %s2257_s8, %s2250_s14 }
  0x34   : > { %p2254_p1 = pneg %p2253_p4  ;;  %p2260_p8 = por %p2259_p6, %p2258_p11 }
  0x36   : > { %p2261_p9 = pnand %p2260_p8, %p2254_p1 }
  0x38   : > { %2264 = shalt.err (!%p2261_p9)
}
  0x39   : > { %2004 = dma.hbm_to_vmem [thread:$0]  (!%p2517_p0), %s2524_s11, 48, %s2526_s28, %s260_s30  }
  0x3a   : > { %p293_p5 = scmp.lt.s32.totalorder %s2381_s27, 5  ;;  %s1732_s7 = sshll.u32 %s2377_s26, 4 }
  0x3b   : > { %p3011_p10 = scmp.ge.s32.totalorder %s2381_s27, 1  ;;  %s2566_s14 = scalar_lea.hbm %s3000_s4, %s1732_s7 }
  0x3c   : > { %s281_s17 = scalar_lea.vmem [#allocation6], %s2508_s12  ;;  %s279_s28 = scalar_lea.sflag [#allocation7], %s2508_s12 }
  0x3d   : > { %p2559_p12 = pnand %p3011_p10, %p293_p5  ;;  %s288_s20 = sshll.u32 %s281_s17, 4  ;;  %s289_s20 = int_to_ptr.vmem [resolvable:$true] %s288_s20 }
  0x3e   : > { %s2265_s11 = scalar_lea.hbm %s2566_s14, 16  ;;  %s2270_s6 = scalar_lea.hbm %s3000_s4, 32 }
  0x3f   : > { %s3012_s10 = scalar_select %p2559_p12, 1, 0 }
  0x40   : > { %p2266_p11 = scmp.ne.s32.totalorder %s2566_s14, %s2265_s11  ;;  %p2271_p2 = scmp.lt.u32.totalorder %s2566_s14, %s3000_s4 }
  0x41   : > { %p2272_p4 = scmp.lt.u32.totalorder %s2270_s6, %s2265_s11  ;;  %p2274_p8 = scmp.lt.u32.totalorder %s2265_s11, %s2566_s14 }
  0x42   : > { %p2268_p1 = pnand %p2266_p11, %p2237_p3 }
  0x43   : > { %p2273_p6 = por %p2272_p4, %p2271_p2 }
  0x44   : > { %p2269_p13 = pneg %p2268_p1 }
  0x45   : > { %p2275_p9 = por %p2274_p8, %p2273_p6 }
  0x47   : > { %p2276_p5 = pnand %p2275_p9, %p2269_p13 }
  0x49   : > { %2279 = shalt.err (!%p2276_p5)
}
  0x4a   : > { %s2280_s12 = scalar_lea.vmem %s289_s20, 16  ;;  %s2384_s17 = smov [#allocation6]  }
  0x4b   : > { %p2281_p10 = scmp.ne.s32.totalorder %s289_s20, %s2280_s12  ;;  %s2285_s30 = sshll.u32 %s2384_s17, 4  ;;  %s2286_s30 = int_to_ptr.vmem [resolvable:$false] %s2285_s30 }
  0x4c   : > { %s2287_s8 = scalar_lea.vmem %s2286_s30, 32  ;;  %p2288_p7 = scmp.lt.s32.totalorder %s289_s20, %s2286_s30 }
  0x4d   : > { %p2283_p11 = pnand %p2281_p10, %p2237_p3  ;;  %p2289_p12 = scmp.lt.s32.totalorder %s2287_s8, %s2280_s12 }
  0x4f   : > { %p2284_p1 = pneg %p2283_p11  ;;  %p2290_p2 = por %p2289_p12, %p2288_p7 }
  0x51   : > { %p2291_p4 = pnand %p2290_p2, %p2284_p1 }
  0x53   : > { %2294 = shalt.err (!%p2291_p4)
}
  0x54   : > { %2007 = dma.hbm_to_vmem [thread:$0]  (!%p2517_p0), %s2566_s14, 16, %s289_s20, %s279_s28  }
  0x55   : > { %p3013_p13 = scmp.ne.s32.totalorder %s3012_s10, 0 }
  0x56   : > { %s2592_s11 = sand.u32 (!%p3013_p13), 1, %s2357_s21   ;;  %p3014_p7 = scmp.ne.s32.totalorder (!%p3013_p13), %s3008_s9, 0 }
  0x57   : > { %297 = sbr.rel (%p3013_p13) target bundleno = 1483 (0x5cb), region = 40  ;;  %s300_s7 = scalar_lea.sflag (!%p3013_p13), [#allocation5], %s2592_s11 }
  0x58   : > { %s1994_s6 = smul.u32 (!%p3013_p13), 3, %s2592_s11 }
  0x5a   : > { %s2596_s15 = scalar_lea.vmem (!%p3013_p13), [#allocation4], %s1994_s6 }
  0x5e   : > { %2336 = dma.done.wait (%p3014_p7), %s300_s7, 48  }
  0x5f   : > { %2338 = vsyncadd (%p3014_p7), %s300_s7, 4294967248  ;;  %s309_s5 = scalar_lea.sflag [#allocation7], %s2592_s11 }
  0x60   : > { %2340 = dma.done.wait (%p3014_p7), %s309_s5, 16  }
  0x61   : > { %2342 = vsyncadd (%p3014_p7), %s309_s5, 4294967280  ;;  %s358_s14 = sand.u32 1, %s2345_s18   ;;  %p376_p0 = scmp.lt.s32.totalorder %s2369_s24, 1  ;;  %v462_v52 = vlaneseq  ;;  %v460_v55 = vld [vmem:[%s2596_s15] sm:$0x7] }
  0x62   : > { %s2610_s20 = sshll.u32 %s358_s14, 4  ;;  %s1735_s9 = sshll.u32 %s2365_s23, 1 }
  0x63   : > { %s377_s28 = scalar_select %p376_p0, %s2369_s24, 1  ;;  %v463_v53 = vshrl.u32 %v462_v52, 7 }
  0x64   : > { %s362_s5 = ssub.s32 1, %s1735_s9  ;;  %s3015_s8 = sld [smem:[#allocation12_spill]] }
  0x65   : > { %s1995_s12 = smul.u32 384, %s377_s28  ;;  %v472_v54 = vsub.s32 2, %v463_v53  ;;  %s2688_s15 = scalar_lea.vmem [#allocation8], %s2610_s20 }
  0x66   : > { %s1996_s17 = smul.u32 192, %s377_s28  ;;  %p1793_p12 = scmp.ne.s32.totalorder %s2365_s23, 0 }
  0x67   : > { %s2616_s6 = scalar_lea.vmem %s2997_s1, %s1995_s12  ;;  %s363_s10 = smul.u32 %s2369_s24, %s362_s5  ;;  %v473_v57 = vrot.slane %v460_v55, %v472_v54 }
  0x68   : > { %s2621_s18 = scalar_lea.vmem %s2998_s2, %s1996_s17  ;;  %v2093_v0 = vld [vmem:[%s2616_s6 + $0x4] ss:$12 sps:$4 sm:$0xff]   ;;  %v2095_v1 = vld [vmem:[%s2616_s6] ss:$12 sps:$4 sm:$0xff]   ;;  %v2096_v2 = vld [vmem:[%s2616_s6 + $0x1c] ss:$12 sps:$4 sm:$0xff]  }
  0x69   : > { %753 = vmatprep.subr.bf16.mxu0 %v2093_v0  ;;  %v2098_v3 = vld [vmem:[%s2616_s6 + $0x18] ss:$12 sps:$4 sm:$0xff]   ;;  %v2099_v4 = vld [vmem:[%s2616_s6 + $0x34] ss:$12 sps:$4 sm:$0xff]   ;;  %v2101_v5 = vld [vmem:[%s2616_s6 + $0x30] ss:$12 sps:$4 sm:$0xff]   ;;  %s2639_s14 = sadd.s32 %s2365_s23, %s363_s10 }
  0x6a   : > { %754 = vmatpush1.bf16.msra.mxu0 %v2095_v1  ;;  %v2102_v6 = vld [vmem:[%s2616_s6 + $0x4c] ss:$12 sps:$4 sm:$0xff]   ;;  %v2114_v7 = vld [vmem:[%s2616_s6 + $0xc8] ss:$12 sps:$4 sm:$0xff]   ;;  %v2105_v9 = vld [vmem:[%s2616_s6 + $0x64] ss:$12 sps:$4 sm:$0xff]  }
  0x6b   : > { %755 = vmatprep.subr.bf16.mxu0 %v2096_v2  ;;  %v2104_v8 = vld [vmem:[%s2616_s6 + $0x48] ss:$12 sps:$4 sm:$0xff]   ;;  %1848 = vmatprep.subr.bf16.mxu1 %v2114_v7  ;;  %v2119_v11 = vld [vmem:[%s2616_s6 + $0xe0] ss:$12 sps:$4 sm:$0xff]   ;;  %v2124_v15 = vld [vmem:[%s2616_s6 + $0xf8] ss:$12 sps:$4 sm:$0xff]  }
  0x6c   : > { %v2117_v10 = vld [vmem:[%s2616_s6 + $0x8] ss:$12 sps:$4 sm:$0xff]   ;;  %v2107_v12 = vld [vmem:[%s2616_s6 + $0x60] ss:$12 sps:$4 sm:$0xff]   ;;  %v2110_v16 = vld [vmem:[%s2616_s6 + $0x78] ss:$12 sps:$4 sm:$0xff]  }
  0x6d   : > { %1849 = vmatpush3.bf16.msra.mxu1 %v2117_v10  ;;  %v2108_v13 = vld [vmem:[%s2616_s6 + $0x7c] ss:$12 sps:$4 sm:$0xff]   ;;  %v2122_v14 = vld [vmem:[%s2616_s6 + $0x20] ss:$12 sps:$4 sm:$0xff]   ;;  %s1736_s28 = sshll.u32 %s2639_s14, 2  ;;  %v468_v10 = vsub.s32 1, %v463_v53 }
  0x6e   : > { %756 = vmatpush1.bf16.msra.mxu0 %v2098_v3  ;;  %1850 = vmatprep.subr.bf16.mxu1 %v2119_v11  ;;  %v2127_v17 = vld [vmem:[%s2616_s6 + $0x38] ss:$12 sps:$4 sm:$0xff]   ;;  %v2111_v18 = vld [vmem:[%s2616_s6 + $0x94] ss:$12 sps:$4 sm:$0xff]   ;;  %v2129_v19 = vld [vmem:[%s2616_s6 + $0x110] ss:$12 sps:$4 sm:$0xff]  }
  0x6f   : > { %757 = vmatprep.subr.bf16.mxu0 %v2099_v4  ;;  %p366_p3 = scmp.lt.s32.totalorder %s1736_s28, 7  ;;  %v2113_v20 = vld [vmem:[%s2616_s6 + $0x90] ss:$12 sps:$4 sm:$0xff]   ;;  %v2134_v22 = vld [vmem:[%s2616_s6 + $0x128] ss:$12 sps:$4 sm:$0xff]  }
  0x70   : > { %v2132_v21 = vld [vmem:[%s2616_s6 + $0x50] ss:$12 sps:$4 sm:$0xff]   ;;  %v2115_v23 = vld [vmem:[%s2616_s6 + $0xac] ss:$12 sps:$4 sm:$0xff]   ;;  %v2118_v24 = vld [vmem:[%s2616_s6 + $0xa8] ss:$12 sps:$4 sm:$0xff]  }
  0x71   : > { %1851 = vmatpush3.bf16.msra.mxu1 %v2122_v14  ;;  %s3036_s28 = smov (!%p366_p3, %s1736_s28), 7  ;;  %v2137_v25 = vld [vmem:[%s2616_s6 + $0x68] ss:$12 sps:$4 sm:$0xff]   ;;  %v2139_v26 = vld [vmem:[%s2616_s6 + $0x140] ss:$12 sps:$4 sm:$0xff]  }
  0x72   : > { %758 = vmatpush1.bf16.msra.mxu0 %v2101_v5  ;;  %1852 = vmatprep.subr.bf16.mxu1 %v2124_v15  ;;  %v2120_v27 = vld [vmem:[%s2616_s6 + $0xc4] ss:$12 sps:$4 sm:$0xff]   ;;  %v2123_v28 = vld [vmem:[%s2616_s6 + $0xc0] ss:$12 sps:$4 sm:$0xff]   ;;  %s1842_s12 = sshll.u32 %s3036_s28, 3 }
  0x73   : > { %759 = vmatprep.subr.bf16.mxu0 %v2102_v6  ;;  %v2142_v29 = vld [vmem:[%s2616_s6 + $0x80] ss:$12 sps:$4 sm:$0xff]   ;;  %v2144_v30 = vld [vmem:[%s2616_s6 + $0x158] ss:$12 sps:$4 sm:$0xff]   ;;  %v2125_v31 = vld [vmem:[%s2616_s6 + $0xdc] ss:$12 sps:$4 sm:$0xff]   ;;  %s2665_s7 = scalar_lea.vmem %s3015_s8, %s1842_s12 }
  0x74   : > { %v2147_v32 = vld [vmem:[%s2616_s6 + $0x98] ss:$12 sps:$4 sm:$0xff]   ;;  %v2149_v34 = vld [vmem:[%s2616_s6 + $0x170] ss:$12 sps:$4 sm:$0xff]   ;;  %v2130_v35 = vld [vmem:[%s2616_s6 + $0xf4] ss:$12 sps:$4 sm:$0xff]  }
  0x75   : > { %1853 = vmatpush3.bf16.msra.mxu1 %v2127_v17  ;;  %v2128_v33 = vld [vmem:[%s2616_s6 + $0xd8] ss:$12 sps:$4 sm:$0xff]   ;;  %v2152_v37 = vld [vmem:[%s2616_s6 + $0xb0] ss:$12 sps:$4 sm:$0xff]   ;;  %v2154_v40 = vld [vmem:[%s2665_s7] ss:$8 sps:$4 sm:$0xff]  }
  0x76   : > { %760 = vmatpush1.bf16.msra.mxu0 %v2104_v8  ;;  %1854 = vmatprep.subr.bf16.mxu1 %v2129_v19  ;;  %v2156_v36 = vld [vmem:[%s2665_s7 + $0x4] ss:$8 sps:$4 sm:$0xff]   ;;  %v2133_v38 = vld [vmem:[%s2616_s6 + $0xf0] ss:$12 sps:$4 sm:$0xff]   ;;  %v2138_v42 = vld [vmem:[%s2616_s6 + $0x108] ss:$12 sps:$4 sm:$0xff]  }
  0x77   : > { %761 = vmatprep.subr.bf16.mxu0 %v2105_v9  ;;  %v2135_v39 = vld [vmem:[%s2616_s6 + $0x10c] ss:$12 sps:$4 sm:$0xff]   ;;  %838 = vmatprep.mubr.bf16.mxu1 %v2156_v36  ;;  %v2160_v41 = vld [vmem:[%s2665_s7 + $0x14] ss:$8 sps:$4 sm:$0xff]   ;;  %v2140_v43 = vld [vmem:[%s2616_s6 + $0x124] ss:$12 sps:$4 sm:$0xff]  }
  0x78   : > { %785 = vmatprep.mubr.bf16.mxu0 %v2156_v36  ;;  %v2143_v44 = vld [vmem:[%s2616_s6 + $0x120] ss:$12 sps:$4 sm:$0xff]   ;;  %v2145_v45 = vld [vmem:[%s2616_s6 + $0x13c] ss:$12 sps:$4 sm:$0xff]   ;;  %v2162_v46 = vld [vmem:[%s2665_s7 + $0x10] ss:$8 sps:$4 sm:$0xff]  }
  0x79   : > { %1855 = vmatpush3.bf16.msra.mxu1 %v2132_v21  ;;  %v2148_v47 = vld [vmem:[%s2616_s6 + $0x138] ss:$12 sps:$4 sm:$0xff]   ;;  %v2150_v48 = vld [vmem:[%s2616_s6 + $0x154] ss:$12 sps:$4 sm:$0xff]   ;;  %v2153_v49 = vld [vmem:[%s2616_s6 + $0x150] ss:$12 sps:$4 sm:$0xff]  }
  0x7a   : > { %762 = vmatpush1.bf16.msra.mxu0 %v2107_v12  ;;  %1856 = vmatprep.subr.bf16.mxu1 %v2134_v22  ;;  %v2157_v50 = vld [vmem:[%s2616_s6 + $0x16c] ss:$12 sps:$4 sm:$0xff]   ;;  %v2159_v51 = vld [vmem:[%s2616_s6 + $0x168] ss:$12 sps:$4 sm:$0xff]   ;;  %v464_v8 = vsub.s32 0, %v463_v53  ;;  %v469_v12 = vrot.slane %v460_v55, %v468_v10 }
  0x7b   : > { %763 = vmatprep.subr.bf16.mxu0 %v2108_v13 }
  0x7c   : > { %v465_v11 = vrot.slane %v460_v55, %v464_v8 }
  0x7d   : > { %1857 = vmatpush3.bf16.msra.mxu1 %v2137_v25 }
  0x7e   : > { %764 = vmatpush1.bf16.msra.mxu0 %v2110_v16  ;;  %1858 = vmatprep.subr.bf16.mxu1 %v2139_v26 }
  0x7f   : > { %765 = vmatprep.subr.bf16.mxu0 %v2111_v18 }
  0x81   : > { %1859 = vmatpush3.bf16.msra.mxu1 %v2142_v29  ;;  %v2385_v29 = vmov (!%p1793_p12), 0.0  }
  0x82   : > { %766 = vmatpush1.bf16.msra.mxu0 %v2113_v20  ;;  %1860 = vmatprep.subr.bf16.mxu1 %v2144_v30  ;;  %871 = vst [vmem:[#allocation3] sm:$0xff] (!%p1793_p12), %v2385_v29 }
  0x83   : > { %767 = vmatprep.subr.bf16.mxu0 %v2115_v23 }
  0x85   : > { %1861 = vmatpush3.bf16.msra.mxu1 %v2147_v32 }
  0x86   : > { %768 = vmatpush1.bf16.msra.mxu0 %v2118_v24  ;;  %1862 = vmatprep.subr.bf16.mxu1 %v2149_v34 }
  0x87   : > { %769 = vmatprep.subr.bf16.mxu0 %v2120_v27 }
  0x89   : > { %1863 = vmatpush3.bf16.msra.mxu1 %v2152_v37 }
  0x8a   : > { %770 = vmatpush1.bf16.msra.mxu0 %v2123_v28 }
  0x8b   : > { %771 = vmatprep.subr.bf16.mxu0 %v2125_v31 }
  0x8c   : > { %839 = vmatmul.mubr.bf16.vlgmr.msra.gmra.mrb[0].mxu1 %v2154_v40 }
  0x8d   : > { %846 = vmatprep.mubr.bf16.mxu1 %v2160_v41 }
  0x8e   : > { %772 = vmatpush1.bf16.msra.mxu0 %v2128_v33 }
  0x8f   : > { %773 = vmatprep.subr.bf16.mxu0 %v2130_v35 }
  0x92   : > { %774 = vmatpush1.bf16.msra.mxu0 %v2133_v38 }
  0x93   : > { %775 = vmatprep.subr.bf16.mxu0 %v2135_v39 }
  0x94   : > { %847 = vmatmul.mubr.bf16.gmra.mrb[4].mxu1 %v2162_v46 }
  0x96   : > { %776 = vmatpush1.bf16.msra.mxu0 %v2138_v42 }
  0x97   : > { %777 = vmatprep.subr.bf16.mxu0 %v2140_v43 }
  0x9a   : > { %778 = vmatpush1.bf16.msra.mxu0 %v2143_v44 }
  0x9b   : > { %779 = vmatprep.subr.bf16.mxu0 %v2145_v45 }
  0x9e   : > { %780 = vmatpush1.bf16.msra.mxu0 %v2148_v47 }
  0x9f   : > { %781 = vmatprep.subr.bf16.mxu0 %v2150_v48 }
  0xa2   : > { %782 = vmatpush1.bf16.msra.mxu0 %v2153_v49 }
  0xa3   : > { %783 = vmatprep.subr.bf16.mxu0 %v2157_v50 }
  0xa6   : > { %784 = vmatpush1.bf16.msra.mxu0 %v2159_v51 }
  0xa9   : > { %786 = vmatmul.mubr.bf16.vlgmr.msra.gmra.mrb[0].mxu0 %v2154_v40 }
  0xaa   : > { %795 = vmatprep.mubr.bf16.mxu0 %v2160_v41 }
  0xb1   : > { %796 = vmatmul.mubr.bf16.gmra.mrb[4].mxu0 %v2162_v46 }
 0x15f   : > { %v1864_v56 = vpop.f32.mrb[0].mxu1 }
 0x160   : > { %v1865_v58 = vpop.f32.mrb[1].mxu1 }
 0x161   : > { %v1866_v59 = vadd.f32 %v1865_v58, %v1864_v56  ;;  %v1867_v60 = vpop.f32.mrb[2].mxu1 }
 0x162   : > { %v1868_v61 = vpop.f32.mrb[3].mxu1 }
 0x163   : > { %v841_v62 = vadd.f32 %v1866_v59, %v473_v57  ;;  %v1869_v63 = vadd.f32 %v1868_v61, %v1867_v60 }
 0x165   : > { %857 = vst [vmem:[#allocation2 + $0x10] sm:$0xff] %v841_v62  ;;  %v844_v0 = vadd.f32 %v1869_v63, %v473_v57 }
 0x167   : > { %860 = vst [vmem:[#allocation2 + $0x28] sm:$0xff] %v844_v0  ;;  %v1870_v1 = vpop.f32.mrb[4].mxu1 }
 0x168   : > { %v1871_v2 = vpop.f32.mrb[5].mxu1 }
 0x169   : > { %v1872_v3 = vadd.f32 %v1871_v2, %v1870_v1  ;;  %v1873_v4 = vpop.f32.mrb[6].mxu1 }
 0x16a   : > { %v1874_v5 = vpop.f32.mrb[7].mxu1 }
 0x16b   : > { %v849_v6 = vadd.f32 %v1872_v3, %v473_v57  ;;  %v1875_v7 = vadd.f32 %v1874_v5, %v1873_v4 }
 0x16d   : > { %863 = vst [vmem:[#allocation2 + $0x40] sm:$0xff] %v849_v6  ;;  %v852_v9 = vadd.f32 %v1875_v7, %v473_v57 }
 0x16f   : > { %866 = vst [vmem:[#allocation2 + $0x58] sm:$0xff] %v852_v9 }
 0x17c   : > { %v787_v13 = vpop.f32.mrb[0].mxu0 }
 0x17d   : > { %v788_v14 = vadd.f32 %v787_v13, %v465_v11  ;;  %v789_v15 = vpop.f32.mrb[1].mxu0 }
 0x17e   : > { %v790_v16 = vadd.f32 %v789_v15, %v469_v12  ;;  %v791_v17 = vpop.f32.mrb[2].mxu0 }
 0x17f   : > { %855 = vst [vmem:[#allocation2] sm:$0xff] %v788_v14  ;;  %v792_v18 = vadd.f32 %v791_v17, %v465_v11  ;;  %v793_v19 = vpop.f32.mrb[3].mxu0 }
 0x180   : > { %856 = vst [vmem:[#allocation2 + $0x8] sm:$0xff] %v790_v16  ;;  %v794_v20 = vadd.f32 %v793_v19, %v469_v12 }
 0x181   : > { %858 = vst [vmem:[#allocation2 + $0x18] sm:$0xff] %v792_v18 }
 0x182   : > { %859 = vst [vmem:[#allocation2 + $0x20] sm:$0xff] %v794_v20 }
 0x184   : > { %v797_v21 = vpop.f32.mrb[4].mxu0  ;;  %870 = sbr.rel (%p1793_p12) target bundleno = 395 (0x18b), region = 52 }
 0x185   : > { %v798_v22 = vadd.f32 %v797_v21, %v465_v11  ;;  %v799_v23 = vpop.f32.mrb[5].mxu0 }
 0x186   : > { %v800_v24 = vadd.f32 %v799_v23, %v469_v12  ;;  %v801_v25 = vpop.f32.mrb[6].mxu0 }
 0x187   : > { %861 = vst [vmem:[#allocation2 + $0x30] sm:$0xff] %v798_v22  ;;  %v802_v26 = vadd.f32 %v801_v25, %v465_v11  ;;  %v803_v27 = vpop.f32.mrb[7].mxu0 }
 0x188   : > { %862 = vst [vmem:[#allocation2 + $0x38] sm:$0xff] %v800_v24  ;;  %v804_v28 = vadd.f32 %v803_v27, %v469_v12 }
 0x189   : > { %864 = vst [vmem:[#allocation2 + $0x48] sm:$0xff] %v802_v26 }
 0x18a   : > { %865 = vst [vmem:[#allocation2 + $0x50] sm:$0xff] %v804_v28 }
 0x18b PF: > { %v2692_v30 = vld [vmem:[%s2621_s18 + $0x4] ss:$12 sps:$4 sm:$0xff]   ;;  %v2695_v31 = vld [vmem:[%s2621_s18] ss:$12 sps:$4 sm:$0xff]   ;;  %v2386_v32 = vmov 0.0   ;;  %v2387_v33 = vmov 0  }
 0x18c   : > { %1912 = vmatprep.subr.bf16.mxu0 %v2386_v32  ;;  %1075 = vmatprep.mubr.bf16.mxu1 %v2387_v33  ;;  %v2701_v34 = vld [vmem:[%s2621_s18 + $0x1c] ss:$12 sps:$4 sm:$0xff]   ;;  %vm2388_vm0 = vmmov 0   ;;  %v2707_v35 = vld [vmem:[%s2621_s18 + $0x18] ss:$12 sps:$4 sm:$0xff]   ;;  %p905_p6 = scmp.eq.s32.totalorder %s2369_s24, 1 }
 0x18d   : > { %1043 = vmatprep.subr.bf16.mxu1 %v2692_v30  ;;  %1928 = vmatprep.mubr.msk.bf16.mxu0 %vm2388_vm0, %v2386_v32  ;;  %v2711_v36 = vld [vmem:[%s2621_s18 + $0x34] ss:$12 sps:$4 sm:$0xff]   ;;  %v2715_v37 = vld [vmem:[%s2621_s18 + $0x30] ss:$12 sps:$4 sm:$0xff]   ;;  %v2719_v38 = vld [vmem:[%s2621_s18 + $0x4c] ss:$12 sps:$4 sm:$0xff]  }
 0x18e   : > { %1044 = vmatpush1.bf16.msra.mxu1 %v2695_v31  ;;  %v2722_v39 = vld [vmem:[%s2621_s18 + $0x8] ss:$12 sps:$4 sm:$0xff]   ;;  %v2731_v41 = vld [vmem:[%s2621_s18 + $0x64] ss:$12 sps:$4 sm:$0xff]   ;;  %v2735_v42 = vld [vmem:[%s2621_s18 + $0x20] ss:$12 sps:$4 sm:$0xff]  }
 0x18f   : > { %1045 = vmatprep.subr.bf16.mxu1 %v2701_v34  ;;  %v2726_v40 = vld [vmem:[%s2621_s18 + $0x48] ss:$12 sps:$4 sm:$0xff]   ;;  %1913 = vmatpush3.bf16.msra.mxu0 %v2722_v39  ;;  %v2738_v43 = vld [vmem:[%s2621_s18 + $0x60] ss:$12 sps:$4 sm:$0xff]   ;;  %v2743_v44 = vld [vmem:[%s2621_s18 + $0x38] ss:$12 sps:$4 sm:$0xff]  }
 0x190   : > { %1914 = vmatprep.subr.bf16.mxu0 %v2386_v32  ;;  %v2747_v45 = vld [vmem:[%s2621_s18 + $0x7c] ss:$12 sps:$4 sm:$0xff]   ;;  %v2752_v46 = vld [vmem:[%s2621_s18 + $0x78] ss:$12 sps:$4 sm:$0xff]   ;;  %v2760_v48 = vld [vmem:[%s2621_s18 + $0x94] ss:$12 sps:$4 sm:$0xff]  }
 0x191   : > { %v2756_v47 = vld [vmem:[%s2621_s18 + $0x50] ss:$12 sps:$4 sm:$0xff]   ;;  %v2769_v50 = vld [vmem:[%s2621_s18 + $0x68] ss:$12 sps:$4 sm:$0xff]   ;;  %v2773_v51 = vld [vmem:[%s2621_s18 + $0xac] ss:$12 sps:$4 sm:$0xff]  }
 0x192   : > { %1046 = vmatpush1.bf16.msra.mxu1 %v2707_v35  ;;  %v2765_v49 = vld [vmem:[%s2621_s18 + $0x90] ss:$12 sps:$4 sm:$0xff]   ;;  %v2778_v52 = vld [vmem:[%s2621_s18 + $0xa8] ss:$12 sps:$4 sm:$0xff]   ;;  %v2780_v53 = vld [vmem:[#allocation3] sm:$0xff]  ;;  %p3017_p8 = scmp.ne.s32.totalorder %s3009_s0, 0 }
 0x193   : > { %1047 = vmatprep.subr.bf16.mxu1 %v2711_v36  ;;  %1915 = vmatpush3.bf16.msra.mxu0 %v2735_v42  ;;  %v2784_v54 = vld [vmem:[%s2621_s18 + $0x80] ss:$12 sps:$4 sm:$0xff]   ;;  %v914_v55 = vpack.c.bf16 %v2780_v53, %v2780_v53  ;;  %v2793_v56 = vld [vmem:[%s2621_s18 + $0x98] ss:$12 sps:$4 sm:$0xff]   ;;  %v2799_v57 = vld [vmem:[%s2621_s18 + $0xb0] ss:$12 sps:$4 sm:$0xff]  }
 0x194   : > { %1916 = vmatprep.subr.bf16.mxu0 %v2386_v32  ;;  %s2842_s23 = scalar_select %p905_p6, 3, 0 }
 0x195   : > { %s3016_s18 = scalar_lea.vmem [#allocation6], %s2592_s11 }
 0x196   : > { %1048 = vmatpush1.bf16.msra.mxu1 %v2715_v37  ;;  %s1843_s20 = smul.u32 24, %s2842_s23  ;;  %v2847_v11 = vld [vmem:[%s3016_s18] ss:$0 sm:$0xff]  ;;  %s1822_s9 = sshll.u32 %s2842_s23, 2 }
 0x197   : > { %1049 = vmatprep.subr.bf16.mxu1 %v2719_v38  ;;  %1917 = vmatpush3.bf16.msra.mxu0 %v2743_v44  ;;  %s1155_s11 = scalar_lea.vmem %s2688_s15, %s1822_s9 [#allocation8] }
 0x198   : > { %1918 = vmatprep.subr.bf16.mxu0 %v2386_v32  ;;  %s909_s6 = scalar_lea.vmem [#allocation2], %s1843_s20 }
 0x199   : > { %v910_v58 = vld [vmem:[%s909_s6] sm:$0xff]  ;;  %v911_v61 = vld [vmem:[%s909_s6 + $0x8] sm:$0xff]  ;;  %v912_v15 = vld [vmem:[%s909_s6 + $0x10] sm:$0xff]  ;;  %s2894_s5 = scalar_select %p905_p6, 2, 1 }
 0x19a   : > { %1050 = vmatpush1.bf16.msra.mxu1 %v2726_v40  ;;  %s2940_s30 = scalar_select %p905_p6, 1, 2 }
 0x19b   : > { %1051 = vmatprep.subr.bf16.mxu1 %v2731_v41  ;;  %1919 = vmatpush3.bf16.msra.mxu0 %v2756_v47  ;;  %s1844_s10 = smul.u32 24, %s2894_s5  ;;  %s1826_s12 = sshll.u32 %s2894_s5, 2 }
 0x19c   : > { %1920 = vmatprep.subr.bf16.mxu0 %v2386_v32  ;;  %s1272_s17 = scalar_lea.vmem %s2688_s15, %s1826_s12 [#allocation8]  ;;  %s1845_s8 = smul.u32 24, %s2940_s30 }
 0x19d   : > { %s1160_s28 = scalar_lea.vmem [#allocation2], %s1844_s10  ;;  %s1830_s23 = sshll.u32 %s2940_s30, 2 }
 0x19e   : > { %1052 = vmatpush1.bf16.msra.mxu1 %v2738_v43  ;;  %v1161_v25 = vld [vmem:[%s1160_s28] sm:$0xff]  ;;  %v1162_v29 = vld [vmem:[%s1160_s28 + $0x8] sm:$0xff]  ;;  %s1277_s7 = scalar_lea.vmem [#allocation2], %s1845_s8  ;;  %s1389_s20 = scalar_lea.vmem %s2688_s15, %s1830_s23 [#allocation8] }
 0x19f   : > { %1053 = vmatprep.subr.bf16.mxu1 %v2747_v45  ;;  %1921 = vmatpush3.bf16.msra.mxu0 %v2769_v50  ;;  %s2949_s6 = scalar_select %p905_p6, 0, 3 }
 0x1a0   : > { %1922 = vmatprep.subr.bf16.mxu0 %v2386_v32  ;;  %s1847_s10 = sshll.u32 (%p3017_p8), %s2639_s14, 3  ;;  %s3018_s8 = sld [smem:[#allocation13_spill]] (%p3017_p8) }
 0x1a1   : > { %s1846_s18 = smul.u32 24, %s2949_s6 }
 0x1a2   : > { %1054 = vmatpush1.bf16.msra.mxu1 %v2752_v46 }
 0x1a3   : > { %1055 = vmatprep.subr.bf16.mxu1 %v2760_v48  ;;  %1923 = vmatpush3.bf16.msra.mxu0 %v2784_v54  ;;  %s1394_s9 = scalar_lea.vmem [#allocation2], %s1846_s18 }
 0x1a4   : > { %1924 = vmatprep.subr.bf16.mxu0 %v2386_v32 }
 0x1a6   : > { %1056 = vmatpush1.bf16.msra.mxu1 %v2765_v49 }
 0x1a7   : > { %1057 = vmatprep.subr.bf16.mxu1 %v2773_v51  ;;  %1925 = vmatpush3.bf16.msra.mxu0 %v2793_v56 }
 0x1a8   : > { %1926 = vmatprep.subr.bf16.mxu0 %v2386_v32 }
 0x1aa   : > { %1058 = vmatpush1.bf16.msra.mxu1 %v2778_v52 }
 0x1ab   : > { %1166 = vmatprep.subr.bf16.mxu1 %v2692_v30  ;;  %1927 = vmatpush3.bf16.msra.mxu0 %v2799_v57 }
 0x1ac   : > { %1932 = vmatprep.subr.bf16.mxu0 %v2386_v32 }
 0x1ad   : > { %1076 = vmatmul.mubr.bf16.vlgmr.msra.gmra.mrb[8].mxu1 %v914_v55 }
 0x1ae   : > { %1167 = vmatpush1.bf16.msra.mxu1 %v2695_v31  ;;  %1198 = vmatprep.mubr.bf16.mxu1 %v2387_v33 }
 0x1af   : > { %1168 = vmatprep.subr.bf16.mxu1 %v2701_v34  ;;  %1929 = vmatmul.mubr.bf16.vlgmr.msra.gmra.mrb[8].mxu0 %v914_v55 }
 0x1b0   : > { %1933 = vmatpush3.bf16.msra.mxu0 %v2722_v39  ;;  %1948 = vmatprep.mubr.msk.bf16.mxu0 %vm2388_vm0, %v2386_v32 }
 0x1b1   : > { %1934 = vmatprep.subr.bf16.mxu0 %v2386_v32 }
 0x1b2   : > { %1169 = vmatpush1.bf16.msra.mxu1 %v2707_v35 }
 0x1b3   : > { %1170 = vmatprep.subr.bf16.mxu1 %v2711_v36 }
 0x1b4   : > { %1935 = vmatpush3.bf16.msra.mxu0 %v2735_v42 }
 0x1b5   : > { %1936 = vmatprep.subr.bf16.mxu0 %v2386_v32 }
 0x1b6   : > { %1171 = vmatpush1.bf16.msra.mxu1 %v2715_v37 }
 0x1b7   : > { %1172 = vmatprep.subr.bf16.mxu1 %v2719_v38 }
 0x1b8   : > { %1937 = vmatpush3.bf16.msra.mxu0 %v2743_v44 }
 0x1b9   : > { %1938 = vmatprep.subr.bf16.mxu0 %v2386_v32 }
 0x1ba   : > { %1173 = vmatpush1.bf16.msra.mxu1 %v2726_v40 }
 0x1bb   : > { %1174 = vmatprep.subr.bf16.mxu1 %v2731_v41 }
 0x1bc   : > { %1939 = vmatpush3.bf16.msra.mxu0 %v2756_v47 }
 0x1bd   : > { %1940 = vmatprep.subr.bf16.mxu0 %v2386_v32 }
 0x1be   : > { %1175 = vmatpush1.bf16.msra.mxu1 %v2738_v43 }
 0x1bf   : > { %1176 = vmatprep.subr.bf16.mxu1 %v2747_v45 }
 0x1c0   : > { %1941 = vmatpush3.bf16.msra.mxu0 %v2769_v50 }
 0x1c1   : > { %1942 = vmatprep.subr.bf16.mxu0 %v2386_v32 }
 0x1c2   : > { %1177 = vmatpush1.bf16.msra.mxu1 %v2752_v46 }
 0x1c3   : > { %1178 = vmatprep.subr.bf16.mxu1 %v2760_v48 }
 0x1c4   : > { %1943 = vmatpush3.bf16.msra.mxu0 %v2784_v54 }
 0x1c5   : > { %1944 = vmatprep.subr.bf16.mxu0 %v2386_v32 }
 0x1c6   : > { %1179 = vmatpush1.bf16.msra.mxu1 %v2765_v49 }
 0x1c7   : > { %1180 = vmatprep.subr.bf16.mxu1 %v2773_v51 }
 0x1c8   : > { %1945 = vmatpush3.bf16.msra.mxu0 %v2793_v56 }
 0x1c9   : > { %1946 = vmatprep.subr.bf16.mxu0 %v2386_v32 }
 0x1ca   : > { %1181 = vmatpush1.bf16.msra.mxu1 %v2778_v52 }
 0x1cb   : > { %1283 = vmatprep.subr.bf16.mxu1 %v2692_v30 }
 0x1cc   : > { %1947 = vmatpush3.bf16.msra.mxu0 %v2799_v57 }
 0x1cd   : > { %1952 = vmatprep.subr.bf16.mxu0 %v2386_v32 }
 0x280   : > { %v1077_v59 = vpop.f32.mrb[8].mxu1 }
 0x281   : > { %v1124_v60 = vadd.f32 %v1077_v59, %v910_v58  ;;  %v1079_v62 = vpop.f32.mrb[9].mxu1 }
 0x282   : > { %v1081_v63 = vpop.f32.mrb[10].mxu1  ;;  %v1131_v2 = vadd.f32 %v1079_v62, %v911_v61  ;;  %v1118_v4 = vpop.f32.mrb[8].mxu0 }
 0x283   : > { %v1819_v0 = vmul.f32 -1.442695, %v1124_v60  ;;  %v1082_v1 = vpop.f32.mrb[11].mxu1  ;;  %v1930_v5 = vpop.f32.mrb[9].mxu0  ;;  %v1144_v13 = vadd.f32 %v2847_v11, %v1118_v4 }
 0x284   : > { %v1820_v3 = vmul.f32 -1.442695, %v1131_v2  ;;  %v1121_v6 = vpop.f32.mrb[10].mxu0 }
 0x285   : > { %2195 = vpow2.f32 %v1819_v0  ;;  %v1931_v7 = vpop.f32.mrb[11].mxu0  ;;  %v1163_v6 = vld [vmem:[%s1160_s28 + $0x10] sm:$0xff]  ;;  %s1521_s28 = sadd.s32 (%p3017_p8), %s2369_s24, %s1847_s10 }
 0x286   : > { %2197 = vpow2.f32 %v1820_v3  ;;  %s1839_s12 = sshll.u32 (%p3017_p8), %s1521_s28, 2 }
 0x28f   : > { %v2196_v8 = vpop.eup %2195 }
 0x290   : > { %v1128_v9 = vadd.f32 1.0, %v2196_v8  ;;  %v2198_v10 = vpop.eup %2197 }
 0x291   : > { %v1135_v12 = vadd.f32 1.0, %v2198_v10 }
 0x292   : > { %2199 = vrcp.f32 %v1128_v9 }
 0x293   : > { %2201 = vrcp.f32 %v1135_v12 }
 0x29c   : > { %v2200_v14 = vpop.eup %2199 }
 0x29d   : > { %v1145_v16 = vmul.f32 %v2200_v14, %v1144_v13  ;;  %v2202_v18 = vpop.eup %2201 }
 0x29e   : > { %v1148_v19 = vsub.f32 1.0, %v2202_v18  ;;  %v1150_v21 = vmul.f32 %v2202_v18, %v2780_v53 }
 0x29f   : > { %v1146_v17 = vadd.f32 %v1145_v16, %v912_v15 }
 0x2a1   : > { %2203 = vtanh.f32 %v1146_v17 }
 0x2ab   : > { %v2204_v20 = vpop.eup %2203 }
 0x2ac   : > { %v1149_v22 = vmul.f32 %v2204_v20, %v1148_v19 }
 0x2ae   : > { %v2852_v23 = vadd.f32 %v1150_v21, %v1149_v22  ;;  %v1395_v22 = vld [vmem:[%s1394_s9] sm:$0xff] }
 0x2b0   : > { %v1153_v24 = vpack.c.bf16 %v2852_v23, %v2852_v23 }
 0x2b2   : > { %1156 = vst [vmem:[%s1155_s11] sm:$0xf] %v1153_v24  ;;  %1199 = vmatmul.mubr.bf16.vlgmr.msra.gmra.mrb[12].mxu1 %v1153_v24  ;;  %1949 = vmatmul.mubr.bf16.vlgmr.msra.gmra.mrb[12].mxu0 %v1153_v24  ;;  %s1834_s11 = sshll.u32 %s2949_s6, 2 }
 0x2b3   : > { %1284 = vmatpush1.bf16.msra.mxu1 %v2695_v31  ;;  %1953 = vmatpush3.bf16.msra.mxu0 %v2722_v39  ;;  %s1506_s5 = scalar_lea.vmem %s2688_s15, %s1834_s11 [#allocation8] }
 0x2b4   : > { %1285 = vmatprep.subr.bf16.mxu1 %v2701_v34  ;;  %1954 = vmatprep.subr.bf16.mxu0 %v2386_v32 }
 0x2b5   : > { %1315 = vmatprep.mubr.bf16.mxu1 %v2387_v33  ;;  %1968 = vmatprep.mubr.msk.bf16.mxu0 %vm2388_vm0, %v2386_v32 }
 0x2b7   : > { %1286 = vmatpush1.bf16.msra.mxu1 %v2707_v35  ;;  %1955 = vmatpush3.bf16.msra.mxu0 %v2735_v42 }
 0x2b8   : > { %1287 = vmatprep.subr.bf16.mxu1 %v2711_v36  ;;  %1956 = vmatprep.subr.bf16.mxu0 %v2386_v32 }
 0x2bb   : > { %1288 = vmatpush1.bf16.msra.mxu1 %v2715_v37  ;;  %1957 = vmatpush3.bf16.msra.mxu0 %v2743_v44 }
 0x2bc   : > { %1289 = vmatprep.subr.bf16.mxu1 %v2719_v38  ;;  %1958 = vmatprep.subr.bf16.mxu0 %v2386_v32 }
 0x2bf   : > { %1290 = vmatpush1.bf16.msra.mxu1 %v2726_v40  ;;  %1959 = vmatpush3.bf16.msra.mxu0 %v2756_v47 }
 0x2c0   : > { %1291 = vmatprep.subr.bf16.mxu1 %v2731_v41  ;;  %1960 = vmatprep.subr.bf16.mxu0 %v2386_v32 }
 0x2c3   : > { %1292 = vmatpush1.bf16.msra.mxu1 %v2738_v43  ;;  %1961 = vmatpush3.bf16.msra.mxu0 %v2769_v50 }
 0x2c4   : > { %1293 = vmatprep.subr.bf16.mxu1 %v2747_v45  ;;  %1962 = vmatprep.subr.bf16.mxu0 %v2386_v32 }
 0x2c7   : > { %1294 = vmatpush1.bf16.msra.mxu1 %v2752_v46  ;;  %1963 = vmatpush3.bf16.msra.mxu0 %v2784_v54 }
 0x2c8   : > { %1295 = vmatprep.subr.bf16.mxu1 %v2760_v48  ;;  %1964 = vmatprep.subr.bf16.mxu0 %v2386_v32 }
 0x2cb   : > { %1296 = vmatpush1.bf16.msra.mxu1 %v2765_v49  ;;  %1965 = vmatpush3.bf16.msra.mxu0 %v2793_v56 }
 0x2cc   : > { %1297 = vmatprep.subr.bf16.mxu1 %v2773_v51  ;;  %1966 = vmatprep.subr.bf16.mxu0 %v2386_v32 }
 0x2cf   : > { %1298 = vmatpush1.bf16.msra.mxu1 %v2778_v52  ;;  %1967 = vmatpush3.bf16.msra.mxu0 %v2799_v57 }
 0x2d0   : > { %1400 = vmatprep.subr.bf16.mxu1 %v2692_v30  ;;  %1972 = vmatprep.subr.bf16.mxu0 %v2386_v32 }
 0x385   : > { %v1200_v26 = vpop.f32.mrb[12].mxu1  ;;  %v1241_v27 = vpop.f32.mrb[12].mxu0 }
 0x386   : > { %v1247_v28 = vadd.f32 %v1200_v26, %v1161_v25  ;;  %v1202_v53 = vpop.f32.mrb[13].mxu1  ;;  %v1950_v55 = vpop.f32.mrb[13].mxu0  ;;  %v1261_v4 = vadd.f32 %v2847_v11, %v1241_v27  ;;  %v1396_v26 = vld [vmem:[%s1394_s9 + $0x8] sm:$0xff] }
 0x387   : > { %v1204_v58 = vpop.f32.mrb[14].mxu1  ;;  %v1244_v59 = vpop.f32.mrb[14].mxu0  ;;  %v1254_v62 = vadd.f32 %v1202_v53, %v1162_v29 }
 0x388   : > { %v1824_v60 = vmul.f32 -1.442695, %v1247_v28  ;;  %v1205_v61 = vpop.f32.mrb[15].mxu1  ;;  %v1951_v30 = vpop.f32.mrb[15].mxu0 }
 0x389   : > { %v1825_v63 = vmul.f32 -1.442695, %v1254_v62 }
 0x38a   : > { %2205 = vpow2.f32 %v1824_v60 }
 0x38b   : > { %2207 = vpow2.f32 %v1825_v63 }
 0x394   : > { %v2206_v0 = vpop.eup %2205 }
 0x395   : > { %v1251_v1 = vadd.f32 1.0, %v2206_v0  ;;  %v2208_v2 = vpop.eup %2207 }
 0x396   : > { %v1258_v3 = vadd.f32 1.0, %v2208_v2 }
 0x397   : > { %2209 = vrcp.f32 %v1251_v1 }
 0x398   : > { %2211 = vrcp.f32 %v1258_v3  ;;  %v1397_v3 = vld [vmem:[%s1394_s9 + $0x10] sm:$0xff] }
 0x3a1   : > { %v2210_v5 = vpop.eup %2209 }
 0x3a2   : > { %v1262_v7 = vmul.f32 %v2210_v5, %v1261_v4  ;;  %v2212_v9 = vpop.eup %2211 }
 0x3a3   : > { %v1265_v10 = vsub.f32 1.0, %v2212_v9  ;;  %v1267_v14 = vmul.f32 %v2212_v9, %v2852_v23 }
 0x3a4   : > { %v1263_v8 = vadd.f32 %v1262_v7, %v1163_v6 }
 0x3a6   : > { %2213 = vtanh.f32 %v1263_v8 }
 0x3b0   : > { %v2214_v12 = vpop.eup %2213 }
 0x3b1   : > { %v1266_v13 = vmul.f32 %v2214_v12, %v1265_v10 }
 0x3b3   : > { %v2900_v15 = vadd.f32 %v1267_v14, %v1266_v13 }
 0x3b5   : > { %v1270_v16 = vpack.c.bf16 %v2900_v15, %v2900_v15 }
 0x3b7   : > { %1273 = vst [vmem:[%s1272_s17] sm:$0xf] %v1270_v16  ;;  %1316 = vmatmul.mubr.bf16.vlgmr.msra.gmra.mrb[16].mxu1 %v1270_v16  ;;  %1969 = vmatmul.mubr.bf16.vlgmr.msra.gmra.mrb[16].mxu0 %v1270_v16 }
 0x3b8   : > { %1401 = vmatpush1.bf16.msra.mxu1 %v2695_v31  ;;  %1973 = vmatpush3.bf16.msra.mxu0 %v2722_v39  ;;  %v1278_v31 = vld [vmem:[%s1277_s7] sm:$0xff] }
 0x3b9   : > { %1402 = vmatprep.subr.bf16.mxu1 %v2701_v34  ;;  %1974 = vmatprep.subr.bf16.mxu0 %v2386_v32 }
 0x3ba   : > { %1432 = vmatprep.mubr.bf16.mxu1 %v2387_v33  ;;  %1988 = vmatprep.mubr.msk.bf16.mxu0 %vm2388_vm0, %v2386_v32 }
 0x3bc   : > { %1403 = vmatpush1.bf16.msra.mxu1 %v2707_v35  ;;  %1975 = vmatpush3.bf16.msra.mxu0 %v2735_v42 }
 0x3bd   : > { %1404 = vmatprep.subr.bf16.mxu1 %v2711_v36  ;;  %1976 = vmatprep.subr.bf16.mxu0 %v2386_v32  ;;  %v1279_v36 = vld [vmem:[%s1277_s7 + $0x8] sm:$0xff] }
 0x3c0   : > { %1405 = vmatpush1.bf16.msra.mxu1 %v2715_v37  ;;  %1977 = vmatpush3.bf16.msra.mxu0 %v2743_v44 }
 0x3c1   : > { %1406 = vmatprep.subr.bf16.mxu1 %v2719_v38  ;;  %1978 = vmatprep.subr.bf16.mxu0 %v2386_v32 }
 0x3c4   : > { %1407 = vmatpush1.bf16.msra.mxu1 %v2726_v40  ;;  %1979 = vmatpush3.bf16.msra.mxu0 %v2756_v47 }
 0x3c5   : > { %1408 = vmatprep.subr.bf16.mxu1 %v2731_v41  ;;  %1980 = vmatprep.subr.bf16.mxu0 %v2386_v32 }
 0x3c8   : > { %1409 = vmatpush1.bf16.msra.mxu1 %v2738_v43  ;;  %1981 = vmatpush3.bf16.msra.mxu0 %v2769_v50 }
 0x3c9   : > { %1410 = vmatprep.subr.bf16.mxu1 %v2747_v45  ;;  %1982 = vmatprep.subr.bf16.mxu0 %v2386_v32 }
 0x3cc   : > { %1411 = vmatpush1.bf16.msra.mxu1 %v2752_v46  ;;  %1983 = vmatpush3.bf16.msra.mxu0 %v2784_v54 }
 0x3cd   : > { %1412 = vmatprep.subr.bf16.mxu1 %v2760_v48  ;;  %1984 = vmatprep.subr.bf16.mxu0 %v2386_v32 }
 0x3d0   : > { %1413 = vmatpush1.bf16.msra.mxu1 %v2765_v49  ;;  %1985 = vmatpush3.bf16.msra.mxu0 %v2793_v56 }
 0x3d1   : > { %1414 = vmatprep.subr.bf16.mxu1 %v2773_v51  ;;  %1986 = vmatprep.subr.bf16.mxu0 %v2386_v32  ;;  %v1280_v51 = vld [vmem:[%s1277_s7 + $0x10] sm:$0xff]  ;;  %s1523_s7 = scalar_lea.vmem (%p3017_p8), %s3018_s8, %s1839_s12 }
 0x3d4   : > { %1415 = vmatpush1.bf16.msra.mxu1 %v2778_v52  ;;  %1987 = vmatpush3.bf16.msra.mxu0 %v2799_v57 }
 0x48a   : > { %v1317_v33 = vpop.f32.mrb[16].mxu1  ;;  %v1358_v34 = vpop.f32.mrb[16].mxu0 }
 0x48b   : > { %v1364_v35 = vadd.f32 %v1317_v33, %v1278_v31  ;;  %v1319_v37 = vpop.f32.mrb[17].mxu1  ;;  %v1970_v38 = vpop.f32.mrb[17].mxu0  ;;  %v1378_v49 = vadd.f32 %v2847_v11, %v1358_v34 }
 0x48c   : > { %v1321_v39 = vpop.f32.mrb[18].mxu1  ;;  %v1361_v40 = vpop.f32.mrb[18].mxu0  ;;  %v1371_v43 = vadd.f32 %v1319_v37, %v1279_v36 }
 0x48d   : > { %v1828_v32 = vmul.f32 -1.442695, %v1364_v35  ;;  %v1322_v41 = vpop.f32.mrb[19].mxu1  ;;  %v1971_v42 = vpop.f32.mrb[19].mxu0 }
 0x48e   : > { %v1829_v44 = vmul.f32 -1.442695, %v1371_v43 }
 0x48f   : > { %2215 = vpow2.f32 %v1828_v32 }
 0x490   : > { %2217 = vpow2.f32 %v1829_v44 }
 0x499   : > { %v2216_v45 = vpop.eup %2215 }
 0x49a   : > { %v1368_v46 = vadd.f32 1.0, %v2216_v45  ;;  %v2218_v47 = vpop.eup %2217 }
 0x49b   : > { %v1375_v48 = vadd.f32 1.0, %v2218_v47 }
 0x49c   : > { %2219 = vrcp.f32 %v1368_v46 }
 0x49d   : > { %2221 = vrcp.f32 %v1375_v48 }
 0x4a6   : > { %v2220_v50 = vpop.eup %2219 }
 0x4a7   : > { %v1379_v52 = vmul.f32 %v2220_v50, %v1378_v49  ;;  %v2222_v56 = vpop.eup %2221 }
 0x4a8   : > { %v1382_v57 = vsub.f32 1.0, %v2222_v56  ;;  %v1384_v19 = vmul.f32 %v2222_v56, %v2900_v15 }
 0x4a9   : > { %v1380_v54 = vadd.f32 %v1379_v52, %v1280_v51 }
 0x4ab   : > { %2223 = vtanh.f32 %v1380_v54 }
 0x4b5   : > { %v2224_v17 = vpop.eup %2223 }
 0x4b6   : > { %v1383_v18 = vmul.f32 %v2224_v17, %v1382_v57 }
 0x4b8   : > { %v1385_v20 = vadd.f32 %v1384_v19, %v1383_v18 }
 0x4ba   : > { %v1387_v21 = vpack.c.bf16 %v1385_v20, %v1385_v20 }
 0x4bc   : > { %1390 = vst [vmem:[%s1389_s20] sm:$0xf] %v1387_v21  ;;  %1433 = vmatmul.mubr.bf16.vlgmr.msra.gmra.mrb[20].mxu1 %v1387_v21  ;;  %1989 = vmatmul.mubr.bf16.vlgmr.msra.gmra.mrb[20].mxu0 %v1387_v21 }
 0x58f   : > { %v1434_v23 = vpop.f32.mrb[20].mxu1  ;;  %v1475_v24 = vpop.f32.mrb[20].mxu0 }
 0x590   : > { %v1481_v25 = vadd.f32 %v1434_v23, %v1395_v22  ;;  %v1436_v27 = vpop.f32.mrb[21].mxu1  ;;  %v1990_v28 = vpop.f32.mrb[21].mxu0  ;;  %v1495_v1 = vadd.f32 %v2847_v11, %v1475_v24 }
 0x591   : > { %v1438_v29 = vpop.f32.mrb[22].mxu1  ;;  %v1478_v53 = vpop.f32.mrb[22].mxu0  ;;  %v1488_v60 = vadd.f32 %v1436_v27, %v1396_v26 }
 0x592   : > { %v1832_v55 = vmul.f32 -1.442695, %v1481_v25  ;;  %v1439_v58 = vpop.f32.mrb[23].mxu1  ;;  %v1991_v59 = vpop.f32.mrb[23].mxu0 }
 0x593   : > { %v1833_v61 = vmul.f32 -1.442695, %v1488_v60 }
 0x594   : > { %2225 = vpow2.f32 %v1832_v55 }
 0x595   : > { %2227 = vpow2.f32 %v1833_v61 }
 0x59e   : > { %v2226_v30 = vpop.eup %2225 }
 0x59f   : > { %v1485_v62 = vadd.f32 1.0, %v2226_v30  ;;  %v2228_v63 = vpop.eup %2227 }
 0x5a0   : > { %v1492_v0 = vadd.f32 1.0, %v2228_v63 }
 0x5a1   : > { %2229 = vrcp.f32 %v1485_v62 }
 0x5a2   : > { %2231 = vrcp.f32 %v1492_v0 }
 0x5ab   : > { %v2230_v2 = vpop.eup %2229 }
 0x5ac   : > { %v1496_v4 = vmul.f32 %v2230_v2, %v1495_v1  ;;  %v2232_v6 = vpop.eup %2231 }
 0x5ad   : > { %v1499_v7 = vsub.f32 1.0, %v2232_v6  ;;  %v1501_v10 = vmul.f32 %v2232_v6, %v1385_v20 }
 0x5ae   : > { %v1497_v5 = vadd.f32 %v1496_v4, %v1397_v3 }
 0x5b0   : > { %2233 = vtanh.f32 %v1497_v5 }
 0x5ba   : > { %v2234_v8 = vpop.eup %2233 }
 0x5bb   : > { %v1500_v9 = vmul.f32 %v2234_v8, %v1499_v7  ;;  %1514 = sbr.rel (!%p3017_p8) target bundleno = 1483 (0x5cb), region = 56 }
 0x5bd   : > { %v1502_v12 = vadd.f32 %v1501_v10, %v1500_v9 }
 0x5bf   : > { %1503 = vst [vmem:[#allocation3] sm:$0xff] %v1502_v12  ;;  %v1504_v13 = vpack.c.bf16 %v1502_v12, %v1502_v12 }
 0x5c1   : > { %1507 = vst [vmem:[%s1506_s5] sm:$0xf] %v1504_v13 }
 0x5c8   : > { %v1539_v11 = vld [vmem:[%s2688_s15] sm:$0xf]  ;;  %v1541_v14 = vld [vmem:[%s2688_s15 + $0x4] sm:$0xf]  ;;  %v1543_v15 = vld [vmem:[%s2688_s15 + $0x8] sm:$0xf] }
 0x5c9   : > { %v1545_v16 = vld [vmem:[%s2688_s15 + $0xc] sm:$0xf]  ;;  %1540 = vst [vmem:[%s1523_s7] sm:$0xf] %v1539_v11  ;;  %1542 = vst [vmem:[%s1523_s7 + $0x8] sm:$0xf] %v1541_v14 }
 0x5ca   : > { %1544 = vst [vmem:[%s1523_s7 + $0x10] sm:$0xf] %v1543_v15  ;;  %1546 = vst [vmem:[%s1523_s7 + $0x18] sm:$0xf] %v1545_v16 }
 0x5cb PF: > { %s21_s27 = sadd.s32 1, %s2381_s27   ;;  %s3019_s0 = sld [smem:[#allocation11_spill]] }
 0x5cc   : > { %p18_p9 = scmp.ge.s32.totalorder %s21_s27, 6   ;;  %s3020_s18 = smov %s2349_s19 }
 0x5cd   : > { %s3021_s19 = smov %s2512_s13  ;;  %s3022_s20 = smov %s2357_s21 }
 0x5ce   : > { %s3023_s21 = smov %s2361_s22  ;;  %s3024_s22 = smov %s2495_s16 }
 0x5cf   : > { %s3025_s23 = smov %s2373_s25  ;;  %s3026_s24 = smov %s2377_s26 }
 0x5d0   : > { %s3027_s25 = smov %s3030_s29  ;;  %20 = sbr.rel (!%p18_p9) target bundleno = 11 (0xb), region = 155 }
 0x5d1   : > { %s3028_s26 = smov %s3019_s0 }
 0x5d7   :  { %1587 = vsyncpa [#allocation5], 1 }
 0x5d8   :  { %1589 = vsyncpa [#allocation5 + $0x1], 1 }
 0x5d9   :  { %1590 = vsyncpa [#allocation7], 1 }
 0x5da   :  { %1592 = vsyncpa [#allocation7 + $0x1], 1 }

</bundles_post_ra>
